<compile_context>
chip_gen: v6e
topology: v6e:2x2x1
jax: 0.10.0
libtpu: 0.0.40
codegen_flags: <defaults>
</compile_context>

<pallas_src>
import math
from functools import partial

import numpy as np
import jax
import jax.numpy as jnp
from jax.experimental import pallas as pl
from jax.experimental.pallas import tpu as pltpu


GROUP_BLOCK = 64     # groups per MAB grid step (amortizes ~0.35us/step, fills the MXU)
SEED_ROWS = 8        # PMA seed replicated to 8 identical rows so every middle dim is a
                     # multiple of the 8-sublane tile (in-kernel reshapes stay tile-exact);
                     # row 0 is numerically identical to the single-seed PyTorch PMA.


def _round_up(n, m):
    return ((n + m - 1) // m) * m


def _const_index(ndim):
    return lambda b: (0,) * ndim


def _layer_norm(x, gamma, beta, eps=1e-5):
    mu = jnp.mean(x, axis=-1, keepdims=True)
    var = jnp.mean((x - mu) ** 2, axis=-1, keepdims=True)
    return (x - mu) * jax.lax.rsqrt(var + eps) * gamma + beta


# ----------------------------------------------------------------------------
# Pallas kernel: batched MultiheadAttentionBlock (MAB) of the SetTransformer
#   out = LN2(h + relu(h @ Wl + bl)),  h = LN1(x + qmask * MHA(x, y, y))
# One grid step processes GB groups at once.
# ----------------------------------------------------------------------------
def mab_kernel(*refs, num_heads, gb, lq, lk, self_attn, fuse_pre_lin):
    idx = 0
    x_ref = refs[idx]; idx += 1                       # [GB*Lq, H] f32 slab
    if self_attn:
        y_ref = x_ref
    else:
        y_ref = refs[idx]; idx += 1                   # [GB*Lk, H] f32 slab
    kmask_ref = refs[idx]; idx += 1                   # [GB, 1, Lk] additive f32
    qmask_ref = refs[idx]; idx += 1                   # [GB*Lq, 1] multiplicative f32
    if fuse_pre_lin:
        wpre_ref = refs[idx]; bpre_ref = refs[idx + 1]; idx += 2
    wqkv_ref = refs[idx]; bqkv_ref = refs[idx + 1]
    wol_ref = refs[idx + 2]; bvec_ref = refs[idx + 3]; idx += 4
    o_ref = refs[idx]                                 # [GB*Lq, H]
    attn_scr = refs[idx + 1]                          # VMEM [GB, Lq, H] f32

    H = x_ref.shape[-1]
    dh = H // num_heads
    scale = 1.0 / math.sqrt(dh)

    x2 = x_ref[...]                                   # keep f32 for residual / LN
    xb = x2.astype(jnp.bfloat16)
    if self_attn:
        yb = xb
    else:
        yb = y_ref[...].astype(jnp.bfloat16)

    if fuse_pre_lin:
        # PMA pre-pooling Linear + ReLU fused on the key/value stream.
        yp = jnp.maximum(
            jnp.dot(yb, wpre_ref[...], preferred_element_type=jnp.float32)
            + bpre_ref[...], 0.0)
        yb = yp.astype(jnp.bfloat16)

    w_all = wqkv_ref[...]                             # [H, 3H] bf16
    b_all = bqkv_ref[...]                             # [1, 3H] f32
    q2 = jnp.dot(xb, w_all[:, :H], preferred_element_type=jnp.float32) + b_all[:, :H]
    k2 = jnp.dot(yb, w_all[:, H:2 * H], preferred_element_type=jnp.float32) + b_all[:, H:2 * H]
    v2 = jnp.dot(yb, w_all[:, 2 * H:], preferred_element_type=jnp.float32) + b_all[:, 2 * H:]

    q3 = q2.reshape(gb, lq, H).astype(jnp.bfloat16)
    k3 = k2.reshape(gb, lk, H).astype(jnp.bfloat16)
    v3 = v2.reshape(gb, lk, H).astype(jnp.bfloat16)
    kmask = kmask_ref[...]                            # f32; -1e9 mask never enters bf16

    for h in range(num_heads):
        sl = slice(h * dh, (h + 1) * dh)
        s = jnp.einsum('bqd,bkd->bqk', q3[:, :, sl], k3[:, :, sl],
                       preferred_element_type=jnp.float32) * scale
        s = s + kmask
        s = s - jnp.max(s, axis=-1, keepdims=True)
        e = jnp.exp(s)
        p = e * pl.reciprocal(jnp.sum(e, axis=-1, keepdims=True), approx=True)
        attn_scr[:, :, sl] = jnp.einsum('bqk,bkd->bqd', p.astype(jnp.bfloat16),
                                        v3[:, :, sl],
                                        preferred_element_type=jnp.float32)

    attn2 = attn_scr[...].reshape(gb * lq, H)
    attn2 = (jnp.dot(attn2.astype(jnp.bfloat16), wol_ref[0],
                     preferred_element_type=jnp.float32) + bvec_ref[0:1, :])
    attn2 = attn2 * qmask_ref[...]                    # zero attention on padded queries

    out = x2 + attn2
    out = _layer_norm(out, bvec_ref[2:3, :], bvec_ref[3:4, :])
    ff = jnp.maximum(jnp.dot(out.astype(jnp.bfloat16), wol_ref[1],
                             preferred_element_type=jnp.float32) + bvec_ref[1:2, :], 0.0)
    out = out + ff
    # TODO(synk): pad hidden to 128 lanes (with masked LayerNorm) for unmasked vst stores.
    o_ref[...] = _layer_norm(out, bvec_ref[4:5, :], bvec_ref[5:6, :])


def mab_block(x, y, kmask, qmask, p, num_heads, *, self_attn, fuse_pre_lin=False,
              group_block=GROUP_BLOCK):
    B, Lq, H = x.shape
    Lk = Lq if self_attn else y.shape[1]
    GB = min(group_block, B)
    assert B % GB == 0 and GB % 8 == 0 and Lq % 8 == 0 and Lk % 8 == 0
    nblk = B // GB

    x2 = x.reshape(B * Lq, H)
    q2 = qmask.reshape(B * Lq, 1)

    inputs = [x2]
    in_specs = [pl.BlockSpec((GB * Lq, H), lambda b: (b, 0))]
    if not self_attn:
        inputs.append(y.reshape(B * Lk, H))
        in_specs.append(pl.BlockSpec((GB * Lk, H), lambda b: (b, 0)))
    inputs += [kmask, q2]
    in_specs += [pl.BlockSpec((GB, 1, Lk), lambda b: (b, 0, 0)),
                 pl.BlockSpec((GB * Lq, 1), lambda b: (b, 0))]

    weights = []
    if fuse_pre_lin:
        weights += [p["wpre"], p["bpre"]]
    weights += [p["wqkv"], p["bqkv"], p["wol"], p["bvec"]]
    inputs += weights
    in_specs += [pl.BlockSpec(w.shape, _const_index(w.ndim)) for w in weights]

    out2 = pl.pallas_call(
        partial(mab_kernel, num_heads=num_heads, gb=GB, lq=Lq, lk=Lk,
                self_attn=self_attn, fuse_pre_lin=fuse_pre_lin),
        out_shape=jax.ShapeDtypeStruct((B * Lq, H), jnp.float32),
        grid=(nblk,),
        in_specs=in_specs,
        out_specs=pl.BlockSpec((GB * Lq, H), lambda b: (b, 0)),
        scratch_shapes=[pltpu.VMEM((GB, Lq, H), jnp.float32)],
        compiler_params=pltpu.CompilerParams(dimension_semantics=("parallel",)),
    )(*inputs)
    return out2.reshape(B, Lq, H)


# ----------------------------------------------------------------------------
# Pallas kernel: StoichHypergraphConv, tiled over reaction columns
#   x' = x @ W ; h'_r = H_r @ W
#   alpha[m,r] = softmax_m( leaky_relu(<x'_m, att_x> + <h'_r, att_h>) ) (per hyperedge)
#   E_r   = (1/sum_m|s_mr|) * sum_m alpha*stoich*x'_m
#   out_m = (1/sum_r|s_mr|) * sum_r alpha*stoich*E_r + bias
# Incidence is derived in-kernel from stoich != 0 (only one M x R stream from HBM).
# ----------------------------------------------------------------------------
def stoich_conv_kernel(x_ref, he_ref, st_ref, w_ref, att_ref, bias_ref,
                       o_ref, xp_scr, sx_scr, deg_scr, *, negative_slope):
    k = pl.program_id(0)

    @pl.when(k == 0)
    def _init():
        xp0 = jnp.dot(x_ref[...].astype(jnp.bfloat16), w_ref[...],
                      preferred_element_type=jnp.float32)            # [M, H]
        xp_scr[...] = xp0
        sx_scr[...] = jnp.sum(xp0 * att_ref[0:1, :], axis=-1, keepdims=True)
        deg_scr[...] = jnp.zeros_like(deg_scr)
        o_ref[...] = jnp.zeros_like(o_ref)

    xp = xp_scr[...]                                                  # [M, H] f32
    hep = jnp.dot(he_ref[...].astype(jnp.bfloat16), w_ref[...],
                  preferred_element_type=jnp.float32)                 # [tR, H]
    sh = jnp.sum(hep * att_ref[1:2, :], axis=-1, keepdims=True)       # [tR, 1] (VPU reduce)

    st = st_ref[...]                                                  # [M, tR] signed stoich
    inc = (st != 0.0).astype(jnp.float32)

    score = sx_scr[...] + sh.T                                        # [M, tR]
    score = jnp.where(score > 0, score, negative_slope * score)       # leaky relu
    score = jnp.where(inc > 0, score, -1e9)                           # masking in f32
    score = score - jnp.max(score, axis=0, keepdims=True)
    p = jnp.exp(score) * inc
    denom = jnp.maximum(jnp.sum(p, axis=0, keepdims=True), 1e-12)
    alpha = p * pl.reciprocal(denom, approx=True)                     # per-hyperedge softmax

    msg = alpha * st                                                  # [M, tR]

    b_deg = jnp.sum(jnp.abs(st), axis=0, keepdims=True)               # [1, tR]
    b_inv = jnp.where(b_deg > 0, 1.0 / b_deg, 0.0)

    e = jnp.dot(msg.T.astype(jnp.bfloat16), xp.astype(jnp.bfloat16),
                preferred_element_type=jnp.float32) * b_inv.T         # [tR, H] node->edge
    o_ref[...] += jnp.dot(msg.astype(jnp.bfloat16), e.astype(jnp.bfloat16),
                          preferred_element_type=jnp.float32)         # edge->node accumulate
    deg_scr[...] += jnp.sum(jnp.abs(st), axis=1, keepdims=True)

    @pl.when(k == pl.num_programs(0) - 1)
    def _finalize():
        d_inv = jnp.where(deg_scr[...] > 0, 1.0 / deg_scr[...], 0.0)
        o_ref[...] = o_ref[...] * d_inv + bias_ref[...]


def _stoich_tiles(num_reactions):
    if num_reactions <= 512:
        t_r = _round_up(max(num_reactions, 1), 8)
        return t_r, t_r
    t_r = 512
    return _round_up(num_reactions, t_r), t_r


def stoich_hypergraph_conv(x, he_pad, st_dense, p, t_r):
    # TODO(synk): additionally tile over metabolites for GEMs with very large M.
    M, H = x.shape
    nk = st_dense.shape[1] // t_r
    return pl.pallas_call(
        partial(stoich_conv_kernel, negative_slope=0.2),
        out_shape=jax.ShapeDtypeStruct((M, H), jnp.float32),
        grid=(nk,),
        in_specs=[
            pl.BlockSpec((M, H), lambda k: (0, 0)),
            pl.BlockSpec((t_r, H), lambda k: (k, 0)),
            pl.BlockSpec((M, t_r), lambda k: (0, k)),
            pl.BlockSpec(p["w"].shape, _const_index(2)),
            pl.BlockSpec(p["att"].shape, _const_index(2)),
            pl.BlockSpec(p["bias"].shape, _const_index(2)),
        ],
        out_specs=pl.BlockSpec((M, H), lambda k: (0, 0)),
        scratch_shapes=[pltpu.VMEM((M, H), jnp.float32),
                        pltpu.VMEM((M, 1), jnp.float32),
                        pltpu.VMEM((M, 1), jnp.float32)],
        compiler_params=pltpu.CompilerParams(dimension_semantics=("arbitrary",)),
    )(x, he_pad, st_dense, p["w"], p["att"], p["bias"])


# ----------------------------------------------------------------------------
# SetTransformerAggregation (2 SAB encoders -> PMA(1 seed) -> 1 SAB decoder)
# ----------------------------------------------------------------------------
def to_dense_batch(x, index, dim_size, max_count):
    # positions via sort + searchsorted (O(E log E)); set attention is permutation
    # invariant within a group, so the internal re-ordering is semantics-preserving.
    # TODO(synk): elements beyond max_count per group are silently dropped (OOB scatter).
    E = index.shape[0]
    order = jnp.argsort(index)
    idx_s = index[order]
    x_s = x[order]
    pos = jnp.arange(E) - jnp.searchsorted(idx_s, idx_s, side='left')
    dense = jnp.zeros((dim_size, max_count, x.shape[-1]), x.dtype).at[idx_s, pos].set(x_s)
    mask = jnp.zeros((dim_size, max_count), jnp.float32).at[idx_s, pos].set(1.0)
    return dense, mask


def set_transformer_agg(x_elems, index, dim_size, max_set, stp, num_heads):
    H = x_elems.shape[-1]
    L = _round_up(max(max_set, 1), 8)
    dense, mask = to_dense_batch(x_elems, index, dim_size, L)

    GB = min(GROUP_BLOCK, _round_up(dim_size, 8))
    B_pad = _round_up(dim_size, GB)
    pad_b = B_pad - dim_size
    dense = jnp.pad(dense, ((0, pad_b), (0, 0), (0, 0)))
    mask_p = jnp.pad(mask, ((0, pad_b), (0, 0)))
    kmask = jnp.where(mask_p > 0, 0.0, -1e9).astype(jnp.float32)[:, None, :]  # [B,1,L]
    qmask = mask_p[:, :, None]                                                # [B,L,1]

    h = dense
    for enc in stp["encoders"]:
        h = mab_block(h, None, kmask, qmask, enc, num_heads, self_attn=True)

    # PMA: relu(lin(h)) fused into the MAB kernel; queries = replicated seed rows.
    seed = jnp.broadcast_to(stp["seed"][None, :, :], (B_pad, SEED_ROWS, H))
    ones_q = jnp.ones((B_pad, SEED_ROWS, 1), jnp.float32)
    out = mab_block(seed, h, kmask, ones_q, stp["pma"], num_heads,
                    self_attn=False, fuse_pre_lin=True)

    # decoder SAB(s), no masks (all SEED_ROWS rows are identical copies of the seed output)
    zero_k = jnp.zeros((B_pad, 1, SEED_ROWS), jnp.float32)
    for dec in stp["decoders"]:
        out = mab_block(out, None, zero_k, ones_q, dec, num_heads, self_attn=True)

    pooled = out[:dim_size, 0, :]                      # single seed point -> [B, H]
    nonempty = (jnp.sum(mask, axis=1, keepdims=True) > 0).astype(pooled.dtype)
    return pooled * nonempty                           # matches .nan_to_num() on empty groups


# ----------------------------------------------------------------------------
# full MetabolismProcessor.whole_forward
# ----------------------------------------------------------------------------
def metabolism_processor_forward(params, gene_x, gpr_gene_idx, gpr_rxn_idx,
                                 met_met_idx, met_rxn_idx, stoich,
                                 *, num_genes, num_reactions, num_metabolites,
                                 max_set, num_heads):
    # H_r: aggregate gene features per reaction
    H_r = set_transformer_agg(gene_x[gpr_gene_idx], gpr_rxn_idx, num_reactions,
                              max_set, params["gene_reaction_transformer"], num_heads)

    # metabolite embedding lookup with max_norm = 1.0
    # TODO(synk): PyTorch renormalizes only accessed rows in place; here all rows, every forward.
    emb = params["metabolite_embedding"]
    norm = jnp.sqrt(jnp.sum(emb * emb, axis=-1, keepdims=True))
    Z_m = emb * jnp.minimum(1.0, 1.0 / (norm + 1e-7))

    # dense signed stoichiometry [M, R_pad]; incidence derived in-kernel from st != 0
    R_pad, t_r = _stoich_tiles(num_reactions)
    st_dense = jnp.zeros((num_metabolites, R_pad), jnp.float32
                         ).at[met_met_idx, met_rxn_idx].set(stoich)
    H_r_pad = jnp.pad(H_r, ((0, R_pad - num_reactions), (0, 0)))

    for conv_params in params["metabolite_processor"]:
        Z_m = stoich_hypergraph_conv(Z_m, H_r_pad, st_dense, conv_params, t_r)

    # Z_r: aggregate metabolite features per reaction
    Z_r = set_transformer_agg(Z_m[met_met_idx], met_rxn_idx, num_reactions,
                              max_set, params["reaction_metabolite_transformer"], num_heads)

    # Z_mg: aggregate reaction features back to genes (shared gene_reaction_transformer)
    Z_mg = set_transformer_agg(Z_r[gpr_rxn_idx], gpr_gene_idx, num_genes,
                               max_set, params["gene_reaction_transformer"], num_heads)
    return Z_mg


# ----------------------------------------------------------------------------
# deterministic parameter init (synthetic, no checkpoint) -- packed layouts
# ----------------------------------------------------------------------------
def _init_linear(key, fan_in, fan_out):
    limit = 1.0 / math.sqrt(fan_in)
    kw, kb = jax.random.split(key)
    w = jax.random.uniform(kw, (fan_in, fan_out), jnp.float32, -limit, limit)
    b = jax.random.uniform(kb, (1, fan_out), jnp.float32, -limit, limit)
    return w, b


def init_mab(key, H, with_pre_lin=False):
    keys = jax.random.split(key, 6)
    wq, bq = _init_linear(keys[0], H, H)
    wk, bk = _init_linear(keys[1], H, H)
    wv, bv = _init_linear(keys[2], H, H)
    wo, bo = _init_linear(keys[3], H, H)
    wl, bl = _init_linear(keys[4], H, H)
    p = dict(
        wqkv=jnp.concatenate([wq, wk, wv], axis=1).astype(jnp.bfloat16),
        bqkv=jnp.concatenate([bq, bk, bv], axis=1).astype(jnp.float32),
        wol=jnp.stack([wo, wl], axis=0).astype(jnp.bfloat16),
        bvec=jnp.concatenate([bo, bl,
                              jnp.ones((1, H)), jnp.zeros((1, H)),
                              jnp.ones((1, H)), jnp.zeros((1, H))],
                             axis=0).astype(jnp.float32),
    )
    if with_pre_lin:
        wpre, bpre = _init_linear(keys[5], H, H)
        p["wpre"] = wpre.astype(jnp.bfloat16)
        p["bpre"] = bpre.astype(jnp.float32)
    return p


def init_set_transformer(key, H, num_encoder_blocks=2, num_decoder_blocks=1):
    keys = jax.random.split(key, num_encoder_blocks + num_decoder_blocks + 2)
    encoders = [init_mab(keys[i], H) for i in range(num_encoder_blocks)]
    pma = init_mab(keys[num_encoder_blocks], H, with_pre_lin=True)
    seed = jax.random.normal(keys[num_encoder_blocks + 1], (1, H), jnp.float32) / math.sqrt(H)
    decoders = [init_mab(keys[num_encoder_blocks + 2 + i], H)
                for i in range(num_decoder_blocks)]
    return dict(encoders=encoders, pma=pma, seed=seed, decoders=decoders)


def init_stoich_conv(key, H):
    keys = jax.random.split(key, 2)
    limit = 1.0 / math.sqrt(H)
    w = jax.random.uniform(keys[0], (H, H), jnp.float32, -limit, limit)
    att = jax.random.uniform(keys[1], (2, H), jnp.float32, -limit, limit)  # rows: att_x, att_h
    return dict(w=w.astype(jnp.bfloat16), att=att,
                bias=jnp.zeros((1, H), jnp.float32))


def init_params(key, metabolite_dim, hidden_dim, num_metabolite_layers, num_heads):
    keys = jax.random.split(key, 3 + num_metabolite_layers)
    metab = jax.random.normal(keys[0], (metabolite_dim, hidden_dim), jnp.float32)
    gr = init_set_transformer(keys[1], hidden_dim)
    rm = init_set_transformer(keys[2], hidden_dim)
    convs = [init_stoich_conv(keys[3 + i], hidden_dim)
             for i in range(num_metabolite_layers)]
    return dict(metabolite_embedding=metab,
                gene_reaction_transformer=gr,
                reaction_metabolite_transformer=rm,
                metabolite_processor=convs)


# ----------------------------------------------------------------------------
# main
# ----------------------------------------------------------------------------
if __name__ == "__main__":
    G, R, M, H, HEADS = 8, 8, 8, 32, 2   # genes, reactions, metabolites, hidden, heads
    MAX_SET = 8                          # padded set length for dense batching

    key = jax.random.PRNGKey(0)
    k_param, k_x = jax.random.split(key)
    params = init_params(k_param, metabolite_dim=M, hidden_dim=H,
                         num_metabolite_layers=2, num_heads=HEADS)
    gene_x = jax.random.normal(k_x, (G, H), jnp.float32)

    # gene -> reaction (gpr) hyperedge index: each reaction has 2 genes
    gpr_rxn = np.repeat(np.arange(R), 2)
    gpr_gene = np.array([(2 * r + o) % G for r in range(R) for o in range(2)])

    # metabolite -> reaction hyperedge index with stoichiometry: 2 metabolites / reaction
    met_rxn = np.repeat(np.arange(R), 2)
    met_met = np.array([(r % M) if o == 0 else ((r + 3) % M)
                        for r in range(R) for o in range(2)])
    stoich = np.array([-1.0 if o == 0 else 1.0 for r in range(R) for o in range(2)],
                      dtype=np.float32)
    stoich = stoich * (1.0 + 0.1 * np.arange(2 * R, dtype=np.float32) / (2 * R))

    fwd = jax.jit(partial(metabolism_processor_forward,
                          num_genes=G, num_reactions=R, num_metabolites=M,
                          max_set=MAX_SET, num_heads=HEADS))

    Z_mg = fwd(params, gene_x,
               jnp.asarray(gpr_gene, jnp.int32), jnp.asarray(gpr_rxn, jnp.int32),
               jnp.asarray(met_met, jnp.int32), jnp.asarray(met_rxn, jnp.int32),
               jnp.asarray(stoich))
    Z_mg = jax.block_until_ready(Z_mg)

    assert Z_mg.shape == (G, H), Z_mg.shape
    assert bool(jnp.all(jnp.isfinite(Z_mg)))
    print("KERNEL_OK")
</pallas_src>

<mosaic_0001>
module attributes {stable_mosaic.version = 11 : i64} {
  func.func @mab_kernel(%arg0: i32, %arg1: memref<64x32xf32, #tpu.memory_space<vmem>>, %arg2: memref<8x1x8xf32, #tpu.memory_space<vmem>>, %arg3: memref<64x1xf32, #tpu.memory_space<vmem>>, %arg4: memref<32x96xbf16, #tpu.memory_space<vmem>>, %arg5: memref<1x96xf32, #tpu.memory_space<vmem>>, %arg6: memref<2x32x32xbf16, #tpu.memory_space<vmem>>, %arg7: memref<6x32xf32, #tpu.memory_space<vmem>>, %arg8: memref<64x32xf32, #tpu.memory_space<vmem>>, %arg9: memref<8x8x32xf32, #tpu.memory_space<vmem>>) attributes {dimension_semantics = [#tpu.dimension_semantics<parallel>], iteration_bounds = array<i64: 1>, scalar_prefetch = 0 : i64, scratch_operands = 1 : i64, tpu.core_type = #tpu.core_type<tc>, window_params = [{transform_indices = @transform_0, window_bounds = array<i64: 64, 32>}, {transform_indices = @transform_1, window_bounds = array<i64: 8, 1, 8>}, {transform_indices = @transform_2, window_bounds = array<i64: 64, 1>}, {pipeline_mode = #tpu.pipeline_mode<synchronous>, transform_indices = @transform_3, window_bounds = array<i64: 32, 96>}, {pipeline_mode = #tpu.pipeline_mode<synchronous>, transform_indices = @transform_4, window_bounds = array<i64: 1, 96>}, {pipeline_mode = #tpu.pipeline_mode<synchronous>, transform_indices = @transform_5, window_bounds = array<i64: 2, 32, 32>}, {pipeline_mode = #tpu.pipeline_mode<synchronous>, transform_indices = @transform_6, window_bounds = array<i64: 6, 32>}, {transform_indices = @transform_7, window_bounds = array<i64: 64, 32>}]} {
    %c0 = arith.constant 0 : index
    %c0_0 = arith.constant 0 : index
    %0 = vector.load %arg1[%c0, %c0_0] : memref<64x32xf32, #tpu.memory_space<vmem>>, vector<64x32xf32>
    %1 = arith.truncf %0 : vector<64x32xf32> to vector<64x32xbf16>
    %c0_1 = arith.constant 0 : index
    %c0_2 = arith.constant 0 : index
    %2 = vector.load %arg4[%c0_1, %c0_2] : memref<32x96xbf16, #tpu.memory_space<vmem>>, vector<32x96xbf16>
    %c0_3 = arith.constant 0 : index
    %c0_4 = arith.constant 0 : index
    %3 = vector.load %arg5[%c0_3, %c0_4] : memref<1x96xf32, #tpu.memory_space<vmem>>, vector<1x96xf32>
    %4 = vector.extract_strided_slice %2 {offsets = [0, 0], sizes = [32, 32], strides = [1, 1]} : vector<32x96xbf16> to vector<32x32xbf16>
    %cst = arith.constant dense<0.000000e+00> : vector<64x32xf32>
    %5 = tpu.matmul %1, %4, %cst {dimension_numbers = #tpu.dot_dimension_numbers<[1], [0], [0], [1], [0, 0, 1, 1], [], []>} : vector<64x32xbf16>, vector<32x32xbf16>, vector<64x32xf32> -> vector<64x32xf32>
    %6 = vector.extract_strided_slice %3 {offsets = [0, 0], sizes = [1, 32], strides = [1, 1]} : vector<1x96xf32> to vector<1x32xf32>
    %7 = vector.broadcast %6 : vector<1x32xf32> to vector<64x32xf32>
    %8 = arith.addf %5, %7 : vector<64x32xf32>
    %9 = vector.extract_strided_slice %2 {offsets = [0, 32], sizes = [32, 32], strides = [1, 1]} : vector<32x96xbf16> to vector<32x32xbf16>
    %cst_5 = arith.constant dense<0.000000e+00> : vector<64x32xf32>
    %10 = tpu.matmul %1, %9, %cst_5 {dimension_numbers = #tpu.dot_dimension_numbers<[1], [0], [0], [1], [0, 0, 1, 1], [], []>} : vector<64x32xbf16>, vector<32x32xbf16>, vector<64x32xf32> -> vector<64x32xf32>
    %11 = vector.extract_strided_slice %3 {offsets = [0, 32], sizes = [1, 32], strides = [1, 1]} : vector<1x96xf32> to vector<1x32xf32>
    %12 = vector.broadcast %11 : vector<1x32xf32> to vector<64x32xf32>
    %13 = arith.addf %10, %12 : vector<64x32xf32>
    %14 = vector.extract_strided_slice %2 {offsets = [0, 64], sizes = [32, 32], strides = [1, 1]} : vector<32x96xbf16> to vector<32x32xbf16>
    %cst_6 = arith.constant dense<0.000000e+00> : vector<64x32xf32>
    %15 = tpu.matmul %1, %14, %cst_6 {dimension_numbers = #tpu.dot_dimension_numbers<[1], [0], [0], [1], [0, 0, 1, 1], [], []>} : vector<64x32xbf16>, vector<32x32xbf16>, vector<64x32xf32> -> vector<64x32xf32>
    %16 = vector.extract_strided_slice %3 {offsets = [0, 64], sizes = [1, 32], strides = [1, 1]} : vector<1x96xf32> to vector<1x32xf32>
    %17 = vector.broadcast %16 : vector<1x32xf32> to vector<64x32xf32>
    %18 = arith.addf %15, %17 : vector<64x32xf32>
    %19 = vector.shape_cast %8 : vector<64x32xf32> to vector<8x8x32xf32>
    %20 = arith.truncf %19 : vector<8x8x32xf32> to vector<8x8x32xbf16>
    %21 = vector.shape_cast %13 : vector<64x32xf32> to vector<8x8x32xf32>
    %22 = arith.truncf %21 : vector<8x8x32xf32> to vector<8x8x32xbf16>
    %23 = vector.shape_cast %18 : vector<64x32xf32> to vector<8x8x32xf32>
    %24 = arith.truncf %23 : vector<8x8x32xf32> to vector<8x8x32xbf16>
    %c0_7 = arith.constant 0 : index
    %c0_8 = arith.constant 0 : index
    %c0_9 = arith.constant 0 : index
    %25 = vector.load %arg2[%c0_7, %c0_8, %c0_9] : memref<8x1x8xf32, #tpu.memory_space<vmem>>, vector<8x1x8xf32>
    %26 = vector.extract_strided_slice %20 {offsets = [0, 0, 0], sizes = [8, 8, 16], strides = [1, 1, 1]} : vector<8x8x32xbf16> to vector<8x8x16xbf16>
    %27 = vector.extract_strided_slice %22 {offsets = [0, 0, 0], sizes = [8, 8, 16], strides = [1, 1, 1]} : vector<8x8x32xbf16> to vector<8x8x16xbf16>
    "tpu.trace_start"() <{level = 10 : i32, message = "bqd,bkd->bqk"}> : () -> ()
    %cst_10 = arith.constant dense<0.000000e+00> : vector<8x8x8xf32>
    %28 = tpu.matmul %26, %27, %cst_10 {dimension_numbers = #tpu.dot_dimension_numbers<[2], [2], [1], [1], [0, 0, 0, 1, 1, 1], [0], [0]>} : vector<8x8x16xbf16>, vector<8x8x16xbf16>, vector<8x8x8xf32> -> vector<8x8x8xf32>
    "tpu.trace_stop"() : () -> ()
    %cst_11 = arith.constant 2.500000e-01 : f32
    %29 = vector.broadcast %cst_11 : f32 to vector<8x8x8xf32>
    %30 = arith.mulf %28, %29 : vector<8x8x8xf32>
    %31 = vector.broadcast %25 : vector<8x1x8xf32> to vector<8x8x8xf32>
    %32 = arith.addf %30, %31 : vector<8x8x8xf32>
    %cst_12 = arith.constant dense<0xFF800000> : vector<8x8xf32>
    %33 = vector.multi_reduction <maximumf>, %32, %cst_12 [2] : vector<8x8x8xf32> to vector<8x8xf32>
    %34 = vector.shape_cast %33 : vector<8x8xf32> to vector<8x8x1xf32>
    %35 = vector.broadcast %34 : vector<8x8x1xf32> to vector<8x8x8xf32>
    %36 = arith.subf %32, %35 : vector<8x8x8xf32>
    %37 = math.exp %36 : vector<8x8x8xf32>
    %cst_13 = arith.constant dense<0.000000e+00> : vector<8x8xf32>
    %38 = vector.multi_reduction <add>, %37, %cst_13 [2] : vector<8x8x8xf32> to vector<8x8xf32>
    %39 = vector.shape_cast %38 : vector<8x8xf32> to vector<8x8x1xf32>
    %40 = tpu.reciprocal %39 {approx = true} : vector<8x8x1xf32> -> vector<8x8x1xf32>
    %41 = vector.broadcast %40 : vector<8x8x1xf32> to vector<8x8x8xf32>
    %42 = arith.mulf %37, %41 : vector<8x8x8xf32>
    %43 = arith.truncf %42 : vector<8x8x8xf32> to vector<8x8x8xbf16>
    %44 = vector.extract_strided_slice %24 {offsets = [0, 0, 0], sizes = [8, 8, 16], strides = [1, 1, 1]} : vector<8x8x32xbf16> to vector<8x8x16xbf16>
    "tpu.trace_start"() <{level = 10 : i32, message = "bqk,bkd->bqd"}> : () -> ()
    %cst_14 = arith.constant dense<0.000000e+00> : vector<8x8x16xf32>
    %45 = tpu.matmul %43, %44, %cst_14 {dimension_numbers = #tpu.dot_dimension_numbers<[2], [1], [1], [2], [0, 0, 0, 1, 1, 2], [0], [0]>} : vector<8x8x8xbf16>, vector<8x8x16xbf16>, vector<8x8x16xf32> -> vector<8x8x16xf32>
    "tpu.trace_stop"() : () -> ()
    %c0_15 = arith.constant 0 : index
    %c0_16 = arith.constant 0 : index
    %c0_17 = arith.constant 0 : index
    %46 = vector.load %arg9[%c0_15, %c0_16, %c0_17] : memref<8x8x32xf32, #tpu.memory_space<vmem>>, vector<8x8x16xf32>
    tpu.vector_store %arg9[%c0_15, %c0_16, %c0_17], %45 {strides = array<i32>} : memref<8x8x32xf32, #tpu.memory_space<vmem>>, vector<8x8x16xf32>,
    %47 = vector.extract_strided_slice %20 {offsets = [0, 0, 16], sizes = [8, 8, 16], strides = [1, 1, 1]} : vector<8x8x32xbf16> to vector<8x8x16xbf16>
    %48 = vector.extract_strided_slice %22 {offsets = [0, 0, 16], sizes = [8, 8, 16], strides = [1, 1, 1]} : vector<8x8x32xbf16> to vector<8x8x16xbf16>
    "tpu.trace_start"() <{level = 10 : i32, message = "bqd,bkd->bqk"}> : () -> ()
    %cst_18 = arith.constant dense<0.000000e+00> : vector<8x8x8xf32>
    %49 = tpu.matmul %47, %48, %cst_18 {dimension_numbers = #tpu.dot_dimension_numbers<[2], [2], [1], [1], [0, 0, 0, 1, 1, 1], [0], [0]>} : vector<8x8x16xbf16>, vector<8x8x16xbf16>, vector<8x8x8xf32> -> vector<8x8x8xf32>
    "tpu.trace_stop"() : () -> ()
    %cst_19 = arith.constant 2.500000e-01 : f32
    %50 = vector.broadcast %cst_19 : f32 to vector<8x8x8xf32>
    %51 = arith.mulf %49, %50 : vector<8x8x8xf32>
    %52 = vector.broadcast %25 : vector<8x1x8xf32> to vector<8x8x8xf32>
    %53 = arith.addf %51, %52 : vector<8x8x8xf32>
    %cst_20 = arith.constant dense<0xFF800000> : vector<8x8xf32>
    %54 = vector.multi_reduction <maximumf>, %53, %cst_20 [2] : vector<8x8x8xf32> to vector<8x8xf32>
    %55 = vector.shape_cast %54 : vector<8x8xf32> to vector<8x8x1xf32>
    %56 = vector.broadcast %55 : vector<8x8x1xf32> to vector<8x8x8xf32>
    %57 = arith.subf %53, %56 : vector<8x8x8xf32>
    %58 = math.exp %57 : vector<8x8x8xf32>
    %cst_21 = arith.constant dense<0.000000e+00> : vector<8x8xf32>
    %59 = vector.multi_reduction <add>, %58, %cst_21 [2] : vector<8x8x8xf32> to vector<8x8xf32>
    %60 = vector.shape_cast %59 : vector<8x8xf32> to vector<8x8x1xf32>
    %61 = tpu.reciprocal %60 {approx = true} : vector<8x8x1xf32> -> vector<8x8x1xf32>
    %62 = vector.broadcast %61 : vector<8x8x1xf32> to vector<8x8x8xf32>
    %63 = arith.mulf %58, %62 : vector<8x8x8xf32>
    %64 = arith.truncf %63 : vector<8x8x8xf32> to vector<8x8x8xbf16>
    %65 = vector.extract_strided_slice %24 {offsets = [0, 0, 16], sizes = [8, 8, 16], strides = [1, 1, 1]} : vector<8x8x32xbf16> to vector<8x8x16xbf16>
    "tpu.trace_start"() <{level = 10 : i32, message = "bqk,bkd->bqd"}> : () -> ()
    %cst_22 = arith.constant dense<0.000000e+00> : vector<8x8x16xf32>
    %66 = tpu.matmul %64, %65, %cst_22 {dimension_numbers = #tpu.dot_dimension_numbers<[2], [1], [1], [2], [0, 0, 0, 1, 1, 2], [0], [0]>} : vector<8x8x8xbf16>, vector<8x8x16xbf16>, vector<8x8x16xf32> -> vector<8x8x16xf32>
    "tpu.trace_stop"() : () -> ()
    %c0_23 = arith.constant 0 : index
    %c0_24 = arith.constant 0 : index
    %c16 = arith.constant 16 : index
    %67 = vector.load %arg9[%c0_23, %c0_24, %c16] : memref<8x8x32xf32, #tpu.memory_space<vmem>>, vector<8x8x16xf32>
    tpu.vector_store %arg9[%c0_23, %c0_24, %c16], %66 {strides = array<i32>} : memref<8x8x32xf32, #tpu.memory_space<vmem>>, vector<8x8x16xf32>,
    %c0_25 = arith.constant 0 : index
    %c0_26 = arith.constant 0 : index
    %c0_27 = arith.constant 0 : index
    %68 = vector.load %arg9[%c0_25, %c0_26, %c0_27] : memref<8x8x32xf32, #tpu.memory_space<vmem>>, vector<8x8x32xf32>
    %69 = vector.shape_cast %68 : vector<8x8x32xf32> to vector<64x32xf32>
    %70 = arith.truncf %69 : vector<64x32xf32> to vector<64x32xbf16>
    %c0_28 = arith.constant 0 : index
    %c0_29 = arith.constant 0 : index
    %c0_30 = arith.constant 0 : index
    %71 = vector.load %arg6[%c0_28, %c0_29, %c0_30] : memref<2x32x32xbf16, #tpu.memory_space<vmem>>, vector<1x32x32xbf16>
    %72 = vector.shape_cast %71 : vector<1x32x32xbf16> to vector<32x32xbf16>
    %cst_31 = arith.constant dense<0.000000e+00> : vector<64x32xf32>
    %73 = tpu.matmul %70, %72, %cst_31 {dimension_numbers = #tpu.dot_dimension_numbers<[1], [0], [0], [1], [0, 0, 1, 1], [], []>} : vector<64x32xbf16>, vector<32x32xbf16>, vector<64x32xf32> -> vector<64x32xf32>
    %c0_32 = arith.constant 0 : index
    %c0_33 = arith.constant 0 : index
    %74 = vector.load %arg7[%c0_32, %c0_33] : memref<6x32xf32, #tpu.memory_space<vmem>>, vector<1x32xf32>
    %75 = vector.broadcast %74 : vector<1x32xf32> to vector<64x32xf32>
    %76 = arith.addf %73, %75 : vector<64x32xf32>
    %c0_34 = arith.constant 0 : index
    %c0_35 = arith.constant 0 : index
    %77 = vector.load %arg3[%c0_34, %c0_35] : memref<64x1xf32, #tpu.memory_space<vmem>>, vector<64x1xf32>
    %78 = vector.broadcast %77 : vector<64x1xf32> to vector<64x32xf32>
    %79 = arith.mulf %76, %78 : vector<64x32xf32>
    %80 = arith.addf %0, %79 : vector<64x32xf32>
    %c2 = arith.constant 2 : index
    %c0_36 = arith.constant 0 : index
    %81 = vector.load %arg7[%c2, %c0_36] : memref<6x32xf32, #tpu.memory_space<vmem>>, vector<1x32xf32>
    %c3 = arith.constant 3 : index
    %c0_37 = arith.constant 0 : index
    %82 = vector.load %arg7[%c3, %c0_37] : memref<6x32xf32, #tpu.memory_space<vmem>>, vector<1x32xf32>
    %cst_38 = arith.constant dense<0.000000e+00> : vector<64xf32>
    %83 = vector.multi_reduction <add>, %80, %cst_38 [1] : vector<64x32xf32> to vector<64xf32>
    %84 = vector.shape_cast %83 : vector<64xf32> to vector<64x1xf32>
    %cst_39 = arith.constant 3.200000e+01 : f32
    %85 = vector.broadcast %cst_39 : f32 to vector<64x1xf32>
    %86 = arith.divf %84, %85 : vector<64x1xf32>
    %87 = vector.broadcast %86 : vector<64x1xf32> to vector<64x32xf32>
    %88 = arith.subf %80, %87 : vector<64x32xf32>
    %89 = arith.mulf %88, %88 : vector<64x32xf32>
    %cst_40 = arith.constant dense<0.000000e+00> : vector<64xf32>
    %90 = vector.multi_reduction <add>, %89, %cst_40 [1] : vector<64x32xf32> to vector<64xf32>
    %91 = vector.shape_cast %90 : vector<64xf32> to vector<64x1xf32>
    %cst_41 = arith.constant 3.200000e+01 : f32
    %92 = vector.broadcast %cst_41 : f32 to vector<64x1xf32>
    %93 = arith.divf %91, %92 : vector<64x1xf32>
    %94 = vector.broadcast %86 : vector<64x1xf32> to vector<64x32xf32>
    %95 = arith.subf %80, %94 : vector<64x32xf32>
    %cst_42 = arith.constant 9.99999974E-6 : f32
    %96 = vector.broadcast %cst_42 : f32 to vector<64x1xf32>
    %97 = arith.addf %93, %96 : vector<64x1xf32>
    %98 = math.rsqrt %97 : vector<64x1xf32>
    %99 = vector.broadcast %98 : vector<64x1xf32> to vector<64x32xf32>
    %100 = arith.mulf %95, %99 : vector<64x32xf32>
    %101 = vector.broadcast %81 : vector<1x32xf32> to vector<64x32xf32>
    %102 = arith.mulf %100, %101 : vector<64x32xf32>
    %103 = vector.broadcast %82 : vector<1x32xf32> to vector<64x32xf32>
    %104 = arith.addf %102, %103 : vector<64x32xf32>
    %105 = arith.truncf %104 : vector<64x32xf32> to vector<64x32xbf16>
    %c1 = arith.constant 1 : index
    %c0_43 = arith.constant 0 : index
    %c0_44 = arith.constant 0 : index
    %106 = vector.load %arg6[%c1, %c0_43, %c0_44] : memref<2x32x32xbf16, #tpu.memory_space<vmem>>, vector<1x32x32xbf16>
    %107 = vector.shape_cast %106 : vector<1x32x32xbf16> to vector<32x32xbf16>
    %cst_45 = arith.constant dense<0.000000e+00> : vector<64x32xf32>
    %108 = tpu.matmul %105, %107, %cst_45 {dimension_numbers = #tpu.dot_dimension_numbers<[1], [0], [0], [1], [0, 0, 1, 1], [], []>} : vector<64x32xbf16>, vector<32x32xbf16>, vector<64x32xf32> -> vector<64x32xf32>
    %c1_46 = arith.constant 1 : index
    %c0_47 = arith.constant 0 : index
    %109 = vector.load %arg7[%c1_46, %c0_47] : memref<6x32xf32, #tpu.memory_space<vmem>>, vector<1x32xf32>
    %110 = vector.broadcast %109 : vector<1x32xf32> to vector<64x32xf32>
    %111 = arith.addf %108, %110 : vector<64x32xf32>
    %cst_48 = arith.constant 0.000000e+00 : f32
    %112 = vector.broadcast %cst_48 : f32 to vector<64x32xf32>
    %113 = arith.maximumf %111, %112 : vector<64x32xf32>
    %114 = arith.addf %104, %113 : vector<64x32xf32>
    %c4 = arith.constant 4 : index
    %c0_49 = arith.constant 0 : index
    %115 = vector.load %arg7[%c4, %c0_49] : memref<6x32xf32, #tpu.memory_space<vmem>>, vector<1x32xf32>
    %c5 = arith.constant 5 : index
    %c0_50 = arith.constant 0 : index
    %116 = vector.load %arg7[%c5, %c0_50] : memref<6x32xf32, #tpu.memory_space<vmem>>, vector<1x32xf32>
    %cst_51 = arith.constant dense<0.000000e+00> : vector<64xf32>
    %117 = vector.multi_reduction <add>, %114, %cst_51 [1] : vector<64x32xf32> to vector<64xf32>
    %118 = vector.shape_cast %117 : vector<64xf32> to vector<64x1xf32>
    %cst_52 = arith.constant 3.200000e+01 : f32
    %119 = vector.broadcast %cst_52 : f32 to vector<64x1xf32>
    %120 = arith.divf %118, %119 : vector<64x1xf32>
    %121 = vector.broadcast %120 : vector<64x1xf32> to vector<64x32xf32>
    %122 = arith.subf %114, %121 : vector<64x32xf32>
    %123 = arith.mulf %122, %122 : vector<64x32xf32>
    %cst_53 = arith.constant dense<0.000000e+00> : vector<64xf32>
    %124 = vector.multi_reduction <add>, %123, %cst_53 [1] : vector<64x32xf32> to vector<64xf32>
    %125 = vector.shape_cast %124 : vector<64xf32> to vector<64x1xf32>
    %cst_54 = arith.constant 3.200000e+01 : f32
    %126 = vector.broadcast %cst_54 : f32 to vector<64x1xf32>
    %127 = arith.divf %125, %126 : vector<64x1xf32>
    %128 = vector.broadcast %120 : vector<64x1xf32> to vector<64x32xf32>
    %129 = arith.subf %114, %128 : vector<64x32xf32>
    %cst_55 = arith.constant 9.99999974E-6 : f32
    %130 = vector.broadcast %cst_55 : f32 to vector<64x1xf32>
    %131 = arith.addf %127, %130 : vector<64x1xf32>
    %132 = math.rsqrt %131 : vector<64x1xf32>
    %133 = vector.broadcast %132 : vector<64x1xf32> to vector<64x32xf32>
    %134 = arith.mulf %129, %133 : vector<64x32xf32>
    %135 = vector.broadcast %115 : vector<1x32xf32> to vector<64x32xf32>
    %136 = arith.mulf %134, %135 : vector<64x32xf32>
    %137 = vector.broadcast %116 : vector<1x32xf32> to vector<64x32xf32>
    %138 = arith.addf %136, %137 : vector<64x32xf32>
    %c0_56 = arith.constant 0 : index
    %c0_57 = arith.constant 0 : index
    %139 = vector.load %arg8[%c0_56, %c0_57] : memref<64x32xf32, #tpu.memory_space<vmem>>, vector<64x32xf32>
    tpu.vector_store %arg8[%c0_56, %c0_57], %138 {strides = array<i32>} : memref<64x32xf32, #tpu.memory_space<vmem>>, vector<64x32xf32>,
    return
  }
  func.func @transform_0(%arg0: i32) -> (i32, i32) {
    %c0_i32 = arith.constant 0 : i32
    %c0_i32_0 = arith.constant 0 : i32
    return %arg0, %c0_i32 : i32, i32
  }
  func.func @transform_1(%arg0: i32) -> (i32, i32, i32) {
    %c0_i32 = arith.constant 0 : i32
    %c0_i32_0 = arith.constant 0 : i32
    %c0_i32_1 = arith.constant 0 : i32
    return %arg0, %c0_i32, %c0_i32_0 : i32, i32, i32
  }
  func.func @transform_2(%arg0: i32) -> (i32, i32) {
    %c0_i32 = arith.constant 0 : i32
    %c0_i32_0 = arith.constant 0 : i32
    return %arg0, %c0_i32 : i32, i32
  }
  func.func @transform_3(%arg0: i32) -> (i32, i32) {
    %c0_i32 = arith.constant 0 : i32
    %c0_i32_0 = arith.constant 0 : i32
    %c0_i32_1 = arith.constant 0 : i32
    return %c0_i32, %c0_i32_0 : i32, i32
  }
  func.func @transform_4(%arg0: i32) -> (i32, i32) {
    %c0_i32 = arith.constant 0 : i32
    %c0_i32_0 = arith.constant 0 : i32
    %c0_i32_1 = arith.constant 0 : i32
    return %c0_i32, %c0_i32_0 : i32, i32
  }
  func.func @transform_5(%arg0: i32) -> (i32, i32, i32) {
    %c0_i32 = arith.constant 0 : i32
    %c0_i32_0 = arith.constant 0 : i32
    %c0_i32_1 = arith.constant 0 : i32
    %c0_i32_2 = arith.constant 0 : i32
    return %c0_i32, %c0_i32_0, %c0_i32_1 : i32, i32, i32
  }
  func.func @transform_6(%arg0: i32) -> (i32, i32) {
    %c0_i32 = arith.constant 0 : i32
    %c0_i32_0 = arith.constant 0 : i32
    %c0_i32_1 = arith.constant 0 : i32
    return %c0_i32, %c0_i32_0 : i32, i32
  }
  func.func @transform_7(%arg0: i32) -> (i32, i32) {
    %c0_i32 = arith.constant 0 : i32
    %c0_i32_0 = arith.constant 0 : i32
    return %arg0, %c0_i32 : i32, i32
  }
}

module attributes {stable_mosaic.version = 11 : i64} {
  func.func @mab_kernel(%arg0: i32, %arg1: memref<64x32xf32, #tpu.memory_space<vmem>>, %arg2: memref<64x32xf32, #tpu.memory_space<vmem>>, %arg3: memref<8x1x8xf32, #tpu.memory_space<vmem>>, %arg4: memref<64x1xf32, #tpu.memory_space<vmem>>, %arg5: memref<32x32xbf16, #tpu.memory_space<vmem>>, %arg6: memref<1x32xf32, #tpu.memory_space<vmem>>, %arg7: memref<32x96xbf16, #tpu.memory_space<vmem>>, %arg8: memref<1x96xf32, #tpu.memory_space<vmem>>, %arg9: memref<2x32x32xbf16, #tpu.memory_space<vmem>>, %arg10: memref<6x32xf32, #tpu.memory_space<vmem>>, %arg11: memref<64x32xf32, #tpu.memory_space<vmem>>, %arg12: memref<8x8x32xf32, #tpu.memory_space<vmem>>) attributes {dimension_semantics = [#tpu.dimension_semantics<parallel>], iteration_bounds = array<i64: 1>, scalar_prefetch = 0 : i64, scratch_operands = 1 : i64, tpu.core_type = #tpu.core_type<tc>, window_params = [{transform_indices = @transform_0, window_bounds = array<i64: 64, 32>}, {transform_indices = @transform_1, window_bounds = array<i64: 64, 32>}, {transform_indices = @transform_2, window_bounds = array<i64: 8, 1, 8>}, {transform_indices = @transform_3, window_bounds = array<i64: 64, 1>}, {pipeline_mode = #tpu.pipeline_mode<synchronous>, transform_indices = @transform_4, window_bounds = array<i64: 32, 32>}, {pipeline_mode = #tpu.pipeline_mode<synchronous>, transform_indices = @transform_5, window_bounds = array<i64: 1, 32>}, {pipeline_mode = #tpu.pipeline_mode<synchronous>, transform_indices = @transform_6, window_bounds = array<i64: 32, 96>}, {pipeline_mode = #tpu.pipeline_mode<synchronous>, transform_indices = @transform_7, window_bounds = array<i64: 1, 96>}, {pipeline_mode = #tpu.pipeline_mode<synchronous>, transform_indices = @transform_8, window_bounds = array<i64: 2, 32, 32>}, {pipeline_mode = #tpu.pipeline_mode<synchronous>, transform_indices = @transform_9, window_bounds = array<i64: 6, 32>}, {transform_indices = @transform_10, window_bounds = array<i64: 64, 32>}]} {
    %c0 = arith.constant 0 : index
    %c0_0 = arith.constant 0 : index
    %0 = vector.load %arg1[%c0, %c0_0] : memref<64x32xf32, #tpu.memory_space<vmem>>, vector<64x32xf32>
    %1 = arith.truncf %0 : vector<64x32xf32> to vector<64x32xbf16>
    %c0_1 = arith.constant 0 : index
    %c0_2 = arith.constant 0 : index
    %2 = vector.load %arg2[%c0_1, %c0_2] : memref<64x32xf32, #tpu.memory_space<vmem>>, vector<64x32xf32>
    %3 = arith.truncf %2 : vector<64x32xf32> to vector<64x32xbf16>
    %c0_3 = arith.constant 0 : index
    %c0_4 = arith.constant 0 : index
    %4 = vector.load %arg5[%c0_3, %c0_4] : memref<32x32xbf16, #tpu.memory_space<vmem>>, vector<32x32xbf16>
    %cst = arith.constant dense<0.000000e+00> : vector<64x32xf32>
    %5 = tpu.matmul %3, %4, %cst {dimension_numbers = #tpu.dot_dimension_numbers<[1], [0], [0], [1], [0, 0, 1, 1], [], []>} : vector<64x32xbf16>, vector<32x32xbf16>, vector<64x32xf32> -> vector<64x32xf32>
    %c0_5 = arith.constant 0 : index
    %c0_6 = arith.constant 0 : index
    %6 = vector.load %arg6[%c0_5, %c0_6] : memref<1x32xf32, #tpu.memory_space<vmem>>, vector<1x32xf32>
    %7 = vector.broadcast %6 : vector<1x32xf32> to vector<64x32xf32>
    %8 = arith.addf %5, %7 : vector<64x32xf32>
    %cst_7 = arith.constant 0.000000e+00 : f32
    %9 = vector.broadcast %cst_7 : f32 to vector<64x32xf32>
    %10 = arith.maximumf %8, %9 : vector<64x32xf32>
    %11 = arith.truncf %10 : vector<64x32xf32> to vector<64x32xbf16>
    %c0_8 = arith.constant 0 : index
    %c0_9 = arith.constant 0 : index
    %12 = vector.load %arg7[%c0_8, %c0_9] : memref<32x96xbf16, #tpu.memory_space<vmem>>, vector<32x96xbf16>
    %c0_10 = arith.constant 0 : index
    %c0_11 = arith.constant 0 : index
    %13 = vector.load %arg8[%c0_10, %c0_11] : memref<1x96xf32, #tpu.memory_space<vmem>>, vector<1x96xf32>
    %14 = vector.extract_strided_slice %12 {offsets = [0, 0], sizes = [32, 32], strides = [1, 1]} : vector<32x96xbf16> to vector<32x32xbf16>
    %cst_12 = arith.constant dense<0.000000e+00> : vector<64x32xf32>
    %15 = tpu.matmul %1, %14, %cst_12 {dimension_numbers = #tpu.dot_dimension_numbers<[1], [0], [0], [1], [0, 0, 1, 1], [], []>} : vector<64x32xbf16>, vector<32x32xbf16>, vector<64x32xf32> -> vector<64x32xf32>
    %16 = vector.extract_strided_slice %13 {offsets = [0, 0], sizes = [1, 32], strides = [1, 1]} : vector<1x96xf32> to vector<1x32xf32>
    %17 = vector.broadcast %16 : vector<1x32xf32> to vector<64x32xf32>
    %18 = arith.addf %15, %17 : vector<64x32xf32>
    %19 = vector.extract_strided_slice %12 {offsets = [0, 32], sizes = [32, 32], strides = [1, 1]} : vector<32x96xbf16> to vector<32x32xbf16>
    %cst_13 = arith.constant dense<0.000000e+00> : vector<64x32xf32>
    %20 = tpu.matmul %11, %19, %cst_13 {dimension_numbers = #tpu.dot_dimension_numbers<[1], [0], [0], [1], [0, 0, 1, 1], [], []>} : vector<64x32xbf16>, vector<32x32xbf16>, vector<64x32xf32> -> vector<64x32xf32>
    %21 = vector.extract_strided_slice %13 {offsets = [0, 32], sizes = [1, 32], strides = [1, 1]} : vector<1x96xf32> to vector<1x32xf32>
    %22 = vector.broadcast %21 : vector<1x32xf32> to vector<64x32xf32>
    %23 = arith.addf %20, %22 : vector<64x32xf32>
    %24 = vector.extract_strided_slice %12 {offsets = [0, 64], sizes = [32, 32], strides = [1, 1]} : vector<32x96xbf16> to vector<32x32xbf16>
    %cst_14 = arith.constant dense<0.000000e+00> : vector<64x32xf32>
    %25 = tpu.matmul %11, %24, %cst_14 {dimension_numbers = #tpu.dot_dimension_numbers<[1], [0], [0], [1], [0, 0, 1, 1], [], []>} : vector<64x32xbf16>, vector<32x32xbf16>, vector<64x32xf32> -> vector<64x32xf32>
    %26 = vector.extract_strided_slice %13 {offsets = [0, 64], sizes = [1, 32], strides = [1, 1]} : vector<1x96xf32> to vector<1x32xf32>
    %27 = vector.broadcast %26 : vector<1x32xf32> to vector<64x32xf32>
    %28 = arith.addf %25, %27 : vector<64x32xf32>
    %29 = vector.shape_cast %18 : vector<64x32xf32> to vector<8x8x32xf32>
    %30 = arith.truncf %29 : vector<8x8x32xf32> to vector<8x8x32xbf16>
    %31 = vector.shape_cast %23 : vector<64x32xf32> to vector<8x8x32xf32>
    %32 = arith.truncf %31 : vector<8x8x32xf32> to vector<8x8x32xbf16>
    %33 = vector.shape_cast %28 : vector<64x32xf32> to vector<8x8x32xf32>
    %34 = arith.truncf %33 : vector<8x8x32xf32> to vector<8x8x32xbf16>
    %c0_15 = arith.constant 0 : index
    %c0_16 = arith.constant 0 : index
    %c0_17 = arith.constant 0 : index
    %35 = vector.load %arg3[%c0_15, %c0_16, %c0_17] : memref<8x1x8xf32, #tpu.memory_space<vmem>>, vector<8x1x8xf32>
    %36 = vector.extract_strided_slice %30 {offsets = [0, 0, 0], sizes = [8, 8, 16], strides = [1, 1, 1]} : vector<8x8x32xbf16> to vector<8x8x16xbf16>
    %37 = vector.extract_strided_slice %32 {offsets = [0, 0, 0], sizes = [8, 8, 16], strides = [1, 1, 1]} : vector<8x8x32xbf16> to vector<8x8x16xbf16>
    "tpu.trace_start"() <{level = 10 : i32, message = "bqd,bkd->bqk"}> : () -> ()
    %cst_18 = arith.constant dense<0.000000e+00> : vector<8x8x8xf32>
    %38 = tpu.matmul %36, %37, %cst_18 {dimension_numbers = #tpu.dot_dimension_numbers<[2], [2], [1], [1], [0, 0, 0, 1, 1, 1], [0], [0]>} : vector<8x8x16xbf16>, vector<8x8x16xbf16>, vector<8x8x8xf32> -> vector<8x8x8xf32>
    "tpu.trace_stop"() : () -> ()
    %cst_19 = arith.constant 2.500000e-01 : f32
    %39 = vector.broadcast %cst_19 : f32 to vector<8x8x8xf32>
    %40 = arith.mulf %38, %39 : vector<8x8x8xf32>
    %41 = vector.broadcast %35 : vector<8x1x8xf32> to vector<8x8x8xf32>
    %42 = arith.addf %40, %41 : vector<8x8x8xf32>
    %cst_20 = arith.constant dense<0xFF800000> : vector<8x8xf32>
    %43 = vector.multi_reduction <maximumf>, %42, %cst_20 [2] : vector<8x8x8xf32> to vector<8x8xf32>
    %44 = vector.shape_cast %43 : vector<8x8xf32> to vector<8x8x1xf32>
    %45 = vector.broadcast %44 : vector<8x8x1xf32> to vector<8x8x8xf32>
    %46 = arith.subf %42, %45 : vector<8x8x8xf32>
    %47 = math.exp %46 : vector<8x8x8xf32>
    %cst_21 = arith.constant dense<0.000000e+00> : vector<8x8xf32>
    %48 = vector.multi_reduction <add>, %47, %cst_21 [2] : vector<8x8x8xf32> to vector<8x8xf32>
    %49 = vector.shape_cast %48 : vector<8x8xf32> to vector<8x8x1xf32>
    %50 = tpu.reciprocal %49 {approx = true} : vector<8x8x1xf32> -> vector<8x8x1xf32>
    %51 = vector.broadcast %50 : vector<8x8x1xf32> to vector<8x8x8xf32>
    %52 = arith.mulf %47, %51 : vector<8x8x8xf32>
    %53 = arith.truncf %52 : vector<8x8x8xf32> to vector<8x8x8xbf16>
    %54 = vector.extract_strided_slice %34 {offsets = [0, 0, 0], sizes = [8, 8, 16], strides = [1, 1, 1]} : vector<8x8x32xbf16> to vector<8x8x16xbf16>
    "tpu.trace_start"() <{level = 10 : i32, message = "bqk,bkd->bqd"}> : () -> ()
    %cst_22 = arith.constant dense<0.000000e+00> : vector<8x8x16xf32>
    %55 = tpu.matmul %53, %54, %cst_22 {dimension_numbers = #tpu.dot_dimension_numbers<[2], [1], [1], [2], [0, 0, 0, 1, 1, 2], [0], [0]>} : vector<8x8x8xbf16>, vector<8x8x16xbf16>, vector<8x8x16xf32> -> vector<8x8x16xf32>
    "tpu.trace_stop"() : () -> ()
    %c0_23 = arith.constant 0 : index
    %c0_24 = arith.constant 0 : index
    %c0_25 = arith.constant 0 : index
    %56 = vector.load %arg12[%c0_23, %c0_24, %c0_25] : memref<8x8x32xf32, #tpu.memory_space<vmem>>, vector<8x8x16xf32>
    tpu.vector_store %arg12[%c0_23, %c0_24, %c0_25], %55 {strides = array<i32>} : memref<8x8x32xf32, #tpu.memory_space<vmem>>, vector<8x8x16xf32>,
    %57 = vector.extract_strided_slice %30 {offsets = [0, 0, 16], sizes = [8, 8, 16], strides = [1, 1, 1]} : vector<8x8x32xbf16> to vector<8x8x16xbf16>
    %58 = vector.extract_strided_slice %32 {offsets = [0, 0, 16], sizes = [8, 8, 16], strides = [1, 1, 1]} : vector<8x8x32xbf16> to vector<8x8x16xbf16>
    "tpu.trace_start"() <{level = 10 : i32, message = "bqd,bkd->bqk"}> : () -> ()
    %cst_26 = arith.constant dense<0.000000e+00> : vector<8x8x8xf32>
    %59 = tpu.matmul %57, %58, %cst_26 {dimension_numbers = #tpu.dot_dimension_numbers<[2], [2], [1], [1], [0, 0, 0, 1, 1, 1], [0], [0]>} : vector<8x8x16xbf16>, vector<8x8x16xbf16>, vector<8x8x8xf32> -> vector<8x8x8xf32>
    "tpu.trace_stop"() : () -> ()
    %cst_27 = arith.constant 2.500000e-01 : f32
    %60 = vector.broadcast %cst_27 : f32 to vector<8x8x8xf32>
    %61 = arith.mulf %59, %60 : vector<8x8x8xf32>
    %62 = vector.broadcast %35 : vector<8x1x8xf32> to vector<8x8x8xf32>
    %63 = arith.addf %61, %62 : vector<8x8x8xf32>
    %cst_28 = arith.constant dense<0xFF800000> : vector<8x8xf32>
    %64 = vector.multi_reduction <maximumf>, %63, %cst_28 [2] : vector<8x8x8xf32> to vector<8x8xf32>
    %65 = vector.shape_cast %64 : vector<8x8xf32> to vector<8x8x1xf32>
    %66 = vector.broadcast %65 : vector<8x8x1xf32> to vector<8x8x8xf32>
    %67 = arith.subf %63, %66 : vector<8x8x8xf32>
    %68 = math.exp %67 : vector<8x8x8xf32>
    %cst_29 = arith.constant dense<0.000000e+00> : vector<8x8xf32>
    %69 = vector.multi_reduction <add>, %68, %cst_29 [2] : vector<8x8x8xf32> to vector<8x8xf32>
    %70 = vector.shape_cast %69 : vector<8x8xf32> to vector<8x8x1xf32>
    %71 = tpu.reciprocal %70 {approx = true} : vector<8x8x1xf32> -> vector<8x8x1xf32>
    %72 = vector.broadcast %71 : vector<8x8x1xf32> to vector<8x8x8xf32>
    %73 = arith.mulf %68, %72 : vector<8x8x8xf32>
    %74 = arith.truncf %73 : vector<8x8x8xf32> to vector<8x8x8xbf16>
    %75 = vector.extract_strided_slice %34 {offsets = [0, 0, 16], sizes = [8, 8, 16], strides = [1, 1, 1]} : vector<8x8x32xbf16> to vector<8x8x16xbf16>
    "tpu.trace_start"() <{level = 10 : i32, message = "bqk,bkd->bqd"}> : () -> ()
    %cst_30 = arith.constant dense<0.000000e+00> : vector<8x8x16xf32>
    %76 = tpu.matmul %74, %75, %cst_30 {dimension_numbers = #tpu.dot_dimension_numbers<[2], [1], [1], [2], [0, 0, 0, 1, 1, 2], [0], [0]>} : vector<8x8x8xbf16>, vector<8x8x16xbf16>, vector<8x8x16xf32> -> vector<8x8x16xf32>
    "tpu.trace_stop"() : () -> ()
    %c0_31 = arith.constant 0 : index
    %c0_32 = arith.constant 0 : index
    %c16 = arith.constant 16 : index
    %77 = vector.load %arg12[%c0_31, %c0_32, %c16] : memref<8x8x32xf32, #tpu.memory_space<vmem>>, vector<8x8x16xf32>
    tpu.vector_store %arg12[%c0_31, %c0_32, %c16], %76 {strides = array<i32>} : memref<8x8x32xf32, #tpu.memory_space<vmem>>, vector<8x8x16xf32>,
    %c0_33 = arith.constant 0 : index
    %c0_34 = arith.constant 0 : index
    %c0_35 = arith.constant 0 : index
    %78 = vector.load %arg12[%c0_33, %c0_34, %c0_35] : memref<8x8x32xf32, #tpu.memory_space<vmem>>, vector<8x8x32xf32>
    %79 = vector.shape_cast %78 : vector<8x8x32xf32> to vector<64x32xf32>
    %80 = arith.truncf %79 : vector<64x32xf32> to vector<64x32xbf16>
    %c0_36 = arith.constant 0 : index
    %c0_37 = arith.constant 0 : index
    %c0_38 = arith.constant 0 : index
    %81 = vector.load %arg9[%c0_36, %c0_37, %c0_38] : memref<2x32x32xbf16, #tpu.memory_space<vmem>>, vector<1x32x32xbf16>
    %82 = vector.shape_cast %81 : vector<1x32x32xbf16> to vector<32x32xbf16>
    %cst_39 = arith.constant dense<0.000000e+00> : vector<64x32xf32>
    %83 = tpu.matmul %80, %82, %cst_39 {dimension_numbers = #tpu.dot_dimension_numbers<[1], [0], [0], [1], [0, 0, 1, 1], [], []>} : vector<64x32xbf16>, vector<32x32xbf16>, vector<64x32xf32> -> vector<64x32xf32>
    %c0_40 = arith.constant 0 : index
    %c0_41 = arith.constant 0 : index
    %84 = vector.load %arg10[%c0_40, %c0_41] : memref<6x32xf32, #tpu.memory_space<vmem>>, vector<1x32xf32>
    %85 = vector.broadcast %84 : vector<1x32xf32> to vector<64x32xf32>
    %86 = arith.addf %83, %85 : vector<64x32xf32>
    %c0_42 = arith.constant 0 : index
    %c0_43 = arith.constant 0 : index
    %87 = vector.load %arg4[%c0_42, %c0_43] : memref<64x1xf32, #tpu.memory_space<vmem>>, vector<64x1xf32>
    %88 = vector.broadcast %87 : vector<64x1xf32> to vector<64x32xf32>
    %89 = arith.mulf %86, %88 : vector<64x32xf32>
    %90 = arith.addf %0, %89 : vector<64x32xf32>
    %c2 = arith.constant 2 : index
    %c0_44 = arith.constant 0 : index
    %91 = vector.load %arg10[%c2, %c0_44] : memref<6x32xf32, #tpu.memory_space<vmem>>, vector<1x32xf32>
    %c3 = arith.constant 3 : index
    %c0_45 = arith.constant 0 : index
    %92 = vector.load %arg10[%c3, %c0_45] : memref<6x32xf32, #tpu.memory_space<vmem>>, vector<1x32xf32>
    %cst_46 = arith.constant dense<0.000000e+00> : vector<64xf32>
    %93 = vector.multi_reduction <add>, %90, %cst_46 [1] : vector<64x32xf32> to vector<64xf32>
    %94 = vector.shape_cast %93 : vector<64xf32> to vector<64x1xf32>
    %cst_47 = arith.constant 3.200000e+01 : f32
    %95 = vector.broadcast %cst_47 : f32 to vector<64x1xf32>
    %96 = arith.divf %94, %95 : vector<64x1xf32>
    %97 = vector.broadcast %96 : vector<64x1xf32> to vector<64x32xf32>
    %98 = arith.subf %90, %97 : vector<64x32xf32>
    %99 = arith.mulf %98, %98 : vector<64x32xf32>
    %cst_48 = arith.constant dense<0.000000e+00> : vector<64xf32>
    %100 = vector.multi_reduction <add>, %99, %cst_48 [1] : vector<64x32xf32> to vector<64xf32>
    %101 = vector.shape_cast %100 : vector<64xf32> to vector<64x1xf32>
    %cst_49 = arith.constant 3.200000e+01 : f32
    %102 = vector.broadcast %cst_49 : f32 to vector<64x1xf32>
    %103 = arith.divf %101, %102 : vector<64x1xf32>
    %104 = vector.broadcast %96 : vector<64x1xf32> to vector<64x32xf32>
    %105 = arith.subf %90, %104 : vector<64x32xf32>
    %cst_50 = arith.constant 9.99999974E-6 : f32
    %106 = vector.broadcast %cst_50 : f32 to vector<64x1xf32>
    %107 = arith.addf %103, %106 : vector<64x1xf32>
    %108 = math.rsqrt %107 : vector<64x1xf32>
    %109 = vector.broadcast %108 : vector<64x1xf32> to vector<64x32xf32>
    %110 = arith.mulf %105, %109 : vector<64x32xf32>
    %111 = vector.broadcast %91 : vector<1x32xf32> to vector<64x32xf32>
    %112 = arith.mulf %110, %111 : vector<64x32xf32>
    %113 = vector.broadcast %92 : vector<1x32xf32> to vector<64x32xf32>
    %114 = arith.addf %112, %113 : vector<64x32xf32>
    %115 = arith.truncf %114 : vector<64x32xf32> to vector<64x32xbf16>
    %c1 = arith.constant 1 : index
    %c0_51 = arith.constant 0 : index
    %c0_52 = arith.constant 0 : index
    %116 = vector.load %arg9[%c1, %c0_51, %c0_52] : memref<2x32x32xbf16, #tpu.memory_space<vmem>>, vector<1x32x32xbf16>
    %117 = vector.shape_cast %116 : vector<1x32x32xbf16> to vector<32x32xbf16>
    %cst_53 = arith.constant dense<0.000000e+00> : vector<64x32xf32>
    %118 = tpu.matmul %115, %117, %cst_53 {dimension_numbers = #tpu.dot_dimension_numbers<[1], [0], [0], [1], [0, 0, 1, 1], [], []>} : vector<64x32xbf16>, vector<32x32xbf16>, vector<64x32xf32> -> vector<64x32xf32>
    %c1_54 = arith.constant 1 : index
    %c0_55 = arith.constant 0 : index
    %119 = vector.load %arg10[%c1_54, %c0_55] : memref<6x32xf32, #tpu.memory_space<vmem>>, vector<1x32xf32>
    %120 = vector.broadcast %119 : vector<1x32xf32> to vector<64x32xf32>
    %121 = arith.addf %118, %120 : vector<64x32xf32>
    %cst_56 = arith.constant 0.000000e+00 : f32
    %122 = vector.broadcast %cst_56 : f32 to vector<64x32xf32>
    %123 = arith.maximumf %121, %122 : vector<64x32xf32>
    %124 = arith.addf %114, %123 : vector<64x32xf32>
    %c4 = arith.constant 4 : index
    %c0_57 = arith.constant 0 : index
    %125 = vector.load %arg10[%c4, %c0_57] : memref<6x32xf32, #tpu.memory_space<vmem>>, vector<1x32xf32>
    %c5 = arith.constant 5 : index
    %c0_58 = arith.constant 0 : index
    %126 = vector.load %arg10[%c5, %c0_58] : memref<6x32xf32, #tpu.memory_space<vmem>>, vector<1x32xf32>
    %cst_59 = arith.constant dense<0.000000e+00> : vector<64xf32>
    %127 = vector.multi_reduction <add>, %124, %cst_59 [1] : vector<64x32xf32> to vector<64xf32>
    %128 = vector.shape_cast %127 : vector<64xf32> to vector<64x1xf32>
    %cst_60 = arith.constant 3.200000e+01 : f32
    %129 = vector.broadcast %cst_60 : f32 to vector<64x1xf32>
    %130 = arith.divf %128, %129 : vector<64x1xf32>
    %131 = vector.broadcast %130 : vector<64x1xf32> to vector<64x32xf32>
    %132 = arith.subf %124, %131 : vector<64x32xf32>
    %133 = arith.mulf %132, %132 : vector<64x32xf32>
    %cst_61 = arith.constant dense<0.000000e+00> : vector<64xf32>
    %134 = vector.multi_reduction <add>, %133, %cst_61 [1] : vector<64x32xf32> to vector<64xf32>
    %135 = vector.shape_cast %134 : vector<64xf32> to vector<64x1xf32>
    %cst_62 = arith.constant 3.200000e+01 : f32
    %136 = vector.broadcast %cst_62 : f32 to vector<64x1xf32>
    %137 = arith.divf %135, %136 : vector<64x1xf32>
    %138 = vector.broadcast %130 : vector<64x1xf32> to vector<64x32xf32>
    %139 = arith.subf %124, %138 : vector<64x32xf32>
    %cst_63 = arith.constant 9.99999974E-6 : f32
    %140 = vector.broadcast %cst_63 : f32 to vector<64x1xf32>
    %141 = arith.addf %137, %140 : vector<64x1xf32>
    %142 = math.rsqrt %141 : vector<64x1xf32>
    %143 = vector.broadcast %142 : vector<64x1xf32> to vector<64x32xf32>
    %144 = arith.mulf %139, %143 : vector<64x32xf32>
    %145 = vector.broadcast %125 : vector<1x32xf32> to vector<64x32xf32>
    %146 = arith.mulf %144, %145 : vector<64x32xf32>
    %147 = vector.broadcast %126 : vector<1x32xf32> to vector<64x32xf32>
    %148 = arith.addf %146, %147 : vector<64x32xf32>
    %c0_64 = arith.constant 0 : index
    %c0_65 = arith.constant 0 : index
    %149 = vector.load %arg11[%c0_64, %c0_65] : memref<64x32xf32, #tpu.memory_space<vmem>>, vector<64x32xf32>
    tpu.vector_store %arg11[%c0_64, %c0_65], %148 {strides = array<i32>} : memref<64x32xf32, #tpu.memory_space<vmem>>, vector<64x32xf32>,
    return
  }
  func.func @transform_0(%arg0: i32) -> (i32, i32) {
    %c0_i32 = arith.constant 0 : i32
    %c0_i32_0 = arith.constant 0 : i32
    return %arg0, %c0_i32 : i32, i32
  }
  func.func @transform_1(%arg0: i32) -> (i32, i32) {
    %c0_i32 = arith.constant 0 : i32
    %c0_i32_0 = arith.constant 0 : i32
    return %arg0, %c0_i32 : i32, i32
  }
  func.func @transform_2(%arg0: i32) -> (i32, i32, i32) {
    %c0_i32 = arith.constant 0 : i32
    %c0_i32_0 = arith.constant 0 : i32
    %c0_i32_1 = arith.constant 0 : i32
    return %arg0, %c0_i32, %c0_i32_0 : i32, i32, i32
  }
  func.func @transform_3(%arg0: i32) -> (i32, i32) {
    %c0_i32 = arith.constant 0 : i32
    %c0_i32_0 = arith.constant 0 : i32
    return %arg0, %c0_i32 : i32, i32
  }
  func.func @transform_4(%arg0: i32) -> (i32, i32) {
    %c0_i32 = arith.constant 0 : i32
    %c0_i32_0 = arith.constant 0 : i32
    %c0_i32_1 = arith.constant 0 : i32
    return %c0_i32, %c0_i32_0 : i32, i32
  }
  func.func @transform_5(%arg0: i32) -> (i32, i32) {
    %c0_i32 = arith.constant 0 : i32
    %c0_i32_0 = arith.constant 0 : i32
    %c0_i32_1 = arith.constant 0 : i32
    return %c0_i32, %c0_i32_0 : i32, i32
  }
  func.func @transform_6(%arg0: i32) -> (i32, i32) {
    %c0_i32 = arith.constant 0 : i32
    %c0_i32_0 = arith.constant 0 : i32
    %c0_i32_1 = arith.constant 0 : i32
    return %c0_i32, %c0_i32_0 : i32, i32
  }
  func.func @transform_7(%arg0: i32) -> (i32, i32) {
    %c0_i32 = arith.constant 0 : i32
    %c0_i32_0 = arith.constant 0 : i32
    %c0_i32_1 = arith.constant 0 : i32
    return %c0_i32, %c0_i32_0 : i32, i32
  }
  func.func @transform_8(%arg0: i32) -> (i32, i32, i32) {
    %c0_i32 = arith.constant 0 : i32
    %c0_i32_0 = arith.constant 0 : i32
    %c0_i32_1 = arith.constant 0 : i32
    %c0_i32_2 = arith.constant 0 : i32
    return %c0_i32, %c0_i32_0, %c0_i32_1 : i32, i32, i32
  }
  func.func @transform_9(%arg0: i32) -> (i32, i32) {
    %c0_i32 = arith.constant 0 : i32
    %c0_i32_0 = arith.constant 0 : i32
    %c0_i32_1 = arith.constant 0 : i32
    return %c0_i32, %c0_i32_0 : i32, i32
  }
  func.func @transform_10(%arg0: i32) -> (i32, i32) {
    %c0_i32 = arith.constant 0 : i32
    %c0_i32_0 = arith.constant 0 : i32
    return %arg0, %c0_i32 : i32, i32
  }
}

module attributes {stable_mosaic.version = 11 : i64} {
  func.func @stoich_conv_kernel(%arg0: i32, %arg1: memref<8x32xf32, #tpu.memory_space<vmem>>, %arg2: memref<8x32xf32, #tpu.memory_space<vmem>>, %arg3: memref<8x8xf32, #tpu.memory_space<vmem>>, %arg4: memref<32x32xbf16, #tpu.memory_space<vmem>>, %arg5: memref<2x32xf32, #tpu.memory_space<vmem>>, %arg6: memref<1x32xf32, #tpu.memory_space<vmem>>, %arg7: memref<8x32xf32, #tpu.memory_space<vmem>>, %arg8: memref<8x32xf32, #tpu.memory_space<vmem>>, %arg9: memref<8x1xf32, #tpu.memory_space<vmem>>, %arg10: memref<8x1xf32, #tpu.memory_space<vmem>>) attributes {dimension_semantics = [#tpu.dimension_semantics<arbitrary>], iteration_bounds = array<i64: 1>, scalar_prefetch = 0 : i64, scratch_operands = 3 : i64, tpu.core_type = #tpu.core_type<tc>, window_params = [{pipeline_mode = #tpu.pipeline_mode<synchronous>, transform_indices = @transform_0, window_bounds = array<i64: 8, 32>}, {transform_indices = @transform_1, window_bounds = array<i64: 8, 32>}, {transform_indices = @transform_2, window_bounds = array<i64: 8, 8>}, {pipeline_mode = #tpu.pipeline_mode<synchronous>, transform_indices = @transform_3, window_bounds = array<i64: 32, 32>}, {pipeline_mode = #tpu.pipeline_mode<synchronous>, transform_indices = @transform_4, window_bounds = array<i64: 2, 32>}, {pipeline_mode = #tpu.pipeline_mode<synchronous>, transform_indices = @transform_5, window_bounds = array<i64: 1, 32>}, {pipeline_mode = #tpu.pipeline_mode<synchronous>, transform_indices = @transform_6, window_bounds = array<i64: 8, 32>}]} {
    %c0_i32 = arith.constant 0 : i32
    %0 = arith.cmpi eq, %arg0, %c0_i32 : i32
    %1 = arith.extui %0 : i1 to i32
    %c0_i32_0 = arith.constant 0 : i32
    %2 = arith.cmpi ne, %1, %c0_i32_0 : i32
    scf.if %2 {
      %c0_37 = arith.constant 0 : index
      %c0_38 = arith.constant 0 : index
      %77 = vector.load %arg1[%c0_37, %c0_38] : memref<8x32xf32, #tpu.memory_space<vmem>>, vector<8x32xf32>
      %78 = arith.truncf %77 : vector<8x32xf32> to vector<8x32xbf16>
      %c0_39 = arith.constant 0 : index
      %c0_40 = arith.constant 0 : index
      %79 = vector.load %arg4[%c0_39, %c0_40] : memref<32x32xbf16, #tpu.memory_space<vmem>>, vector<32x32xbf16>
      %cst_41 = arith.constant dense<0.000000e+00> : vector<8x32xf32>
      %80 = tpu.matmul %78, %79, %cst_41 {dimension_numbers = #tpu.dot_dimension_numbers<[1], [0], [0], [1], [0, 0, 1, 1], [], []>} : vector<8x32xbf16>, vector<32x32xbf16>, vector<8x32xf32> -> vector<8x32xf32>
      %c0_42 = arith.constant 0 : index
      %c0_43 = arith.constant 0 : index
      %81 = vector.load %arg8[%c0_42, %c0_43] : memref<8x32xf32, #tpu.memory_space<vmem>>, vector<8x32xf32>
      tpu.vector_store %arg8[%c0_42, %c0_43], %80 {strides = array<i32>} : memref<8x32xf32, #tpu.memory_space<vmem>>, vector<8x32xf32>,
      %c0_44 = arith.constant 0 : index
      %c0_45 = arith.constant 0 : index
      %82 = vector.load %arg5[%c0_44, %c0_45] : memref<2x32xf32, #tpu.memory_space<vmem>>, vector<1x32xf32>
      %83 = vector.broadcast %82 : vector<1x32xf32> to vector<8x32xf32>
      %84 = arith.mulf %80, %83 : vector<8x32xf32>
      %cst_46 = arith.constant dense<0.000000e+00> : vector<8xf32>
      %85 = vector.multi_reduction <add>, %84, %cst_46 [1] : vector<8x32xf32> to vector<8xf32>
      %86 = vector.shape_cast %85 : vector<8xf32> to vector<8x1xf32>
      %c0_47 = arith.constant 0 : index
      %c0_48 = arith.constant 0 : index
      %87 = vector.load %arg9[%c0_47, %c0_48] : memref<8x1xf32, #tpu.memory_space<vmem>>, vector<8x1xf32>
      tpu.vector_store %arg9[%c0_47, %c0_48], %86 {strides = array<i32>} : memref<8x1xf32, #tpu.memory_space<vmem>>, vector<8x1xf32>,
      %cst_49 = arith.constant 0.000000e+00 : f32
      %88 = vector.broadcast %cst_49 : f32 to vector<8x1xf32>
      %c0_50 = arith.constant 0 : index
      %c0_51 = arith.constant 0 : index
      %89 = vector.load %arg10[%c0_50, %c0_51] : memref<8x1xf32, #tpu.memory_space<vmem>>, vector<8x1xf32>
      tpu.vector_store %arg10[%c0_50, %c0_51], %88 {strides = array<i32>} : memref<8x1xf32, #tpu.memory_space<vmem>>, vector<8x1xf32>,
      %cst_52 = arith.constant 0.000000e+00 : f32
      %90 = vector.broadcast %cst_52 : f32 to vector<8x32xf32>
      %c0_53 = arith.constant 0 : index
      %c0_54 = arith.constant 0 : index
      %91 = vector.load %arg7[%c0_53, %c0_54] : memref<8x32xf32, #tpu.memory_space<vmem>>, vector<8x32xf32>
      tpu.vector_store %arg7[%c0_53, %c0_54], %90 {strides = array<i32>} : memref<8x32xf32, #tpu.memory_space<vmem>>, vector<8x32xf32>,
    } else {
    }
    %c0 = arith.constant 0 : index
    %c0_1 = arith.constant 0 : index
    %3 = vector.load %arg8[%c0, %c0_1] : memref<8x32xf32, #tpu.memory_space<vmem>>, vector<8x32xf32>
    %c0_2 = arith.constant 0 : index
    %c0_3 = arith.constant 0 : index
    %4 = vector.load %arg2[%c0_2, %c0_3] : memref<8x32xf32, #tpu.memory_space<vmem>>, vector<8x32xf32>
    %5 = arith.truncf %4 : vector<8x32xf32> to vector<8x32xbf16>
    %c0_4 = arith.constant 0 : index
    %c0_5 = arith.constant 0 : index
    %6 = vector.load %arg4[%c0_4, %c0_5] : memref<32x32xbf16, #tpu.memory_space<vmem>>, vector<32x32xbf16>
    %cst = arith.constant dense<0.000000e+00> : vector<8x32xf32>
    %7 = tpu.matmul %5, %6, %cst {dimension_numbers = #tpu.dot_dimension_numbers<[1], [0], [0], [1], [0, 0, 1, 1], [], []>} : vector<8x32xbf16>, vector<32x32xbf16>, vector<8x32xf32> -> vector<8x32xf32>
    %c1 = arith.constant 1 : index
    %c0_6 = arith.constant 0 : index
    %8 = vector.load %arg5[%c1, %c0_6] : memref<2x32xf32, #tpu.memory_space<vmem>>, vector<1x32xf32>
    %9 = vector.broadcast %8 : vector<1x32xf32> to vector<8x32xf32>
    %10 = arith.mulf %7, %9 : vector<8x32xf32>
    %cst_7 = arith.constant dense<0.000000e+00> : vector<8xf32>
    %11 = vector.multi_reduction <add>, %10, %cst_7 [1] : vector<8x32xf32> to vector<8xf32>
    %12 = vector.shape_cast %11 : vector<8xf32> to vector<8x1xf32>
    %c0_8 = arith.constant 0 : index
    %c0_9 = arith.constant 0 : index
    %13 = vector.load %arg3[%c0_8, %c0_9] : memref<8x8xf32, #tpu.memory_space<vmem>>, vector<8x8xf32>
    %cst_10 = arith.constant 0.000000e+00 : f32
    %14 = vector.broadcast %cst_10 : f32 to vector<8x8xf32>
    %15 = arith.cmpf one, %13, %14 : vector<8x8xf32>
    %16 = arith.extui %15 : vector<8x8xi1> to vector<8x8xi32>
    %17 = arith.sitofp %16 : vector<8x8xi32> to vector<8x8xf32>
    %c0_11 = arith.constant 0 : index
    %c0_12 = arith.constant 0 : index
    %18 = vector.load %arg9[%c0_11, %c0_12] : memref<8x1xf32, #tpu.memory_space<vmem>>, vector<8x1xf32>
    %19 = tpu.transpose %12, [1, 0] : vector<8x1xf32> -> vector<1x8xf32>
    %20 = vector.broadcast %18 : vector<8x1xf32> to vector<8x8xf32>
    %21 = vector.broadcast %19 : vector<1x8xf32> to vector<8x8xf32>
    %22 = arith.addf %20, %21 : vector<8x8xf32>
    %cst_13 = arith.constant 0.000000e+00 : f32
    %23 = vector.broadcast %cst_13 : f32 to vector<8x8xf32>
    %24 = arith.cmpf ogt, %22, %23 : vector<8x8xf32>
    %cst_14 = arith.constant 2.000000e-01 : f32
    %25 = vector.broadcast %cst_14 : f32 to vector<8x8xf32>
    %26 = arith.mulf %25, %22 : vector<8x8xf32>
    %27 = arith.select %24, %22, %26 : vector<8x8xi1>, vector<8x8xf32>
    %cst_15 = arith.constant 0.000000e+00 : f32
    %28 = vector.broadcast %cst_15 : f32 to vector<8x8xf32>
    %29 = arith.cmpf ogt, %17, %28 : vector<8x8xf32>
    %cst_16 = arith.constant -1.000000e+09 : f32
    %30 = vector.broadcast %cst_16 : f32 to vector<8x8xf32>
    %31 = arith.select %29, %27, %30 : vector<8x8xi1>, vector<8x8xf32>
    %cst_17 = arith.constant dense<0xFF800000> : vector<8xf32>
    %32 = vector.multi_reduction <maximumf>, %31, %cst_17 [0] : vector<8x8xf32> to vector<8xf32>
    %33 = vector.shape_cast %32 : vector<8xf32> to vector<1x8xf32>
    %34 = vector.broadcast %33 : vector<1x8xf32> to vector<8x8xf32>
    %35 = arith.subf %31, %34 : vector<8x8xf32>
    %36 = math.exp %35 : vector<8x8xf32>
    %37 = arith.mulf %36, %17 : vector<8x8xf32>
    %cst_18 = arith.constant dense<0.000000e+00> : vector<8xf32>
    %38 = vector.multi_reduction <add>, %37, %cst_18 [0] : vector<8x8xf32> to vector<8xf32>
    %39 = vector.shape_cast %38 : vector<8xf32> to vector<1x8xf32>
    %cst_19 = arith.constant 9.99999996E-13 : f32
    %40 = vector.broadcast %cst_19 : f32 to vector<1x8xf32>
    %41 = arith.maximumf %39, %40 : vector<1x8xf32>
    %42 = tpu.reciprocal %41 {approx = true} : vector<1x8xf32> -> vector<1x8xf32>
    %43 = vector.broadcast %42 : vector<1x8xf32> to vector<8x8xf32>
    %44 = arith.mulf %37, %43 : vector<8x8xf32>
    %45 = arith.mulf %44, %13 : vector<8x8xf32>
    %46 = math.absf %13 : vector<8x8xf32>
    %cst_20 = arith.constant dense<0.000000e+00> : vector<8xf32>
    %47 = vector.multi_reduction <add>, %46, %cst_20 [0] : vector<8x8xf32> to vector<8xf32>
    %48 = vector.shape_cast %47 : vector<8xf32> to vector<1x8xf32>
    %cst_21 = arith.constant 0.000000e+00 : f32
    %49 = vector.broadcast %cst_21 : f32 to vector<1x8xf32>
    %50 = arith.cmpf ogt, %48, %49 : vector<1x8xf32>
    %cst_22 = arith.constant 1.000000e+00 : f32
    %51 = vector.broadcast %cst_22 : f32 to vector<1x8xf32>
    %52 = arith.divf %51, %48 : vector<1x8xf32>
    %cst_23 = arith.constant 0.000000e+00 : f32
    %53 = vector.broadcast %cst_23 : f32 to vector<1x8xf32>
    %54 = arith.select %50, %52, %53 : vector<1x8xi1>, vector<1x8xf32>
    %55 = tpu.transpose %45, [1, 0] : vector<8x8xf32> -> vector<8x8xf32>
    %56 = arith.truncf %55 : vector<8x8xf32> to vector<8x8xbf16>
    %57 = arith.truncf %3 : vector<8x32xf32> to vector<8x32xbf16>
    %cst_24 = arith.constant dense<0.000000e+00> : vector<8x32xf32>
    %58 = tpu.matmul %56, %57, %cst_24 {dimension_numbers = #tpu.dot_dimension_numbers<[1], [0], [0], [1], [0, 0, 1, 1], [], []>} : vector<8x8xbf16>, vector<8x32xbf16>, vector<8x32xf32> -> vector<8x32xf32>
    %59 = tpu.transpose %54, [1, 0] : vector<1x8xf32> -> vector<8x1xf32>
    %60 = vector.broadcast %59 : vector<8x1xf32> to vector<8x32xf32>
    %61 = arith.mulf %58, %60 : vector<8x32xf32>
    %c0_25 = arith.constant 0 : index
    %c0_26 = arith.constant 0 : index
    %62 = vector.load %arg7[%c0_25, %c0_26] : memref<8x32xf32, #tpu.memory_space<vmem>>, vector<8x32xf32>
    %63 = arith.truncf %45 : vector<8x8xf32> to vector<8x8xbf16>
    %64 = arith.truncf %61 : vector<8x32xf32> to vector<8x32xbf16>
    %cst_27 = arith.constant dense<0.000000e+00> : vector<8x32xf32>
    %65 = tpu.matmul %63, %64, %cst_27 {dimension_numbers = #tpu.dot_dimension_numbers<[1], [0], [0], [1], [0, 0, 1, 1], [], []>} : vector<8x8xbf16>, vector<8x32xbf16>, vector<8x32xf32> -> vector<8x32xf32>
    %66 = arith.addf %62, %65 : vector<8x32xf32>
    %c0_28 = arith.constant 0 : index
    %c0_29 = arith.constant 0 : index
    %67 = vector.load %arg7[%c0_28, %c0_29] : memref<8x32xf32, #tpu.memory_space<vmem>>, vector<8x32xf32>
    tpu.vector_store %arg7[%c0_28, %c0_29], %66 {strides = array<i32>} : memref<8x32xf32, #tpu.memory_space<vmem>>, vector<8x32xf32>,
    %c0_30 = arith.constant 0 : index
    %c0_31 = arith.constant 0 : index
    %68 = vector.load %arg10[%c0_30, %c0_31] : memref<8x1xf32, #tpu.memory_space<vmem>>, vector<8x1xf32>
    %69 = math.absf %13 : vector<8x8xf32>
    %cst_32 = arith.constant dense<0.000000e+00> : vector<8xf32>
    %70 = vector.multi_reduction <add>, %69, %cst_32 [1] : vector<8x8xf32> to vector<8xf32>
    %71 = vector.shape_cast %70 : vector<8xf32> to vector<8x1xf32>
    %72 = arith.addf %68, %71 : vector<8x1xf32>
    %c0_33 = arith.constant 0 : index
    %c0_34 = arith.constant 0 : index
    %73 = vector.load %arg10[%c0_33, %c0_34] : memref<8x1xf32, #tpu.memory_space<vmem>>, vector<8x1xf32>
    tpu.vector_store %arg10[%c0_33, %c0_34], %72 {strides = array<i32>} : memref<8x1xf32, #tpu.memory_space<vmem>>, vector<8x1xf32>,
    %c0_i32_35 = arith.constant 0 : i32
    %74 = arith.cmpi eq, %arg0, %c0_i32_35 : i32
    %75 = arith.extui %74 : i1 to i32
    %c0_i32_36 = arith.constant 0 : i32
    %76 = arith.cmpi ne, %75, %c0_i32_36 : i32
    scf.if %76 {
      %c0_37 = arith.constant 0 : index
      %c0_38 = arith.constant 0 : index
      %77 = vector.load %arg10[%c0_37, %c0_38] : memref<8x1xf32, #tpu.memory_space<vmem>>, vector<8x1xf32>
      %cst_39 = arith.constant 0.000000e+00 : f32
      %78 = vector.broadcast %cst_39 : f32 to vector<8x1xf32>
      %79 = arith.cmpf ogt, %77, %78 : vector<8x1xf32>
      %c0_40 = arith.constant 0 : index
      %c0_41 = arith.constant 0 : index
      %80 = vector.load %arg10[%c0_40, %c0_41] : memref<8x1xf32, #tpu.memory_space<vmem>>, vector<8x1xf32>
      %cst_42 = arith.constant 1.000000e+00 : f32
      %81 = vector.broadcast %cst_42 : f32 to vector<8x1xf32>
      %82 = arith.divf %81, %80 : vector<8x1xf32>
      %cst_43 = arith.constant 0.000000e+00 : f32
      %83 = vector.broadcast %cst_43 : f32 to vector<8x1xf32>
      %84 = arith.select %79, %82, %83 : vector<8x1xi1>, vector<8x1xf32>
      %c0_44 = arith.constant 0 : index
      %c0_45 = arith.constant 0 : index
      %85 = vector.load %arg7[%c0_44, %c0_45] : memref<8x32xf32, #tpu.memory_space<vmem>>, vector<8x32xf32>
      %86 = vector.broadcast %84 : vector<8x1xf32> to vector<8x32xf32>
      %87 = arith.mulf %85, %86 : vector<8x32xf32>
      %c0_46 = arith.constant 0 : index
      %c0_47 = arith.constant 0 : index
      %88 = vector.load %arg6[%c0_46, %c0_47] : memref<1x32xf32, #tpu.memory_space<vmem>>, vector<1x32xf32>
      %89 = vector.broadcast %88 : vector<1x32xf32> to vector<8x32xf32>
      %90 = arith.addf %87, %89 : vector<8x32xf32>
      %c0_48 = arith.constant 0 : index
      %c0_49 = arith.constant 0 : index
      %91 = vector.load %arg7[%c0_48, %c0_49] : memref<8x32xf32, #tpu.memory_space<vmem>>, vector<8x32xf32>
      tpu.vector_store %arg7[%c0_48, %c0_49], %90 {strides = array<i32>} : memref<8x32xf32, #tpu.memory_space<vmem>>, vector<8x32xf32>,
    } else {
    }
    return
  }
  func.func @transform_0(%arg0: i32) -> (i32, i32) {
    %c0_i32 = arith.constant 0 : i32
    %c0_i32_0 = arith.constant 0 : i32
    %c0_i32_1 = arith.constant 0 : i32
    return %c0_i32, %c0_i32_0 : i32, i32
  }
  func.func @transform_1(%arg0: i32) -> (i32, i32) {
    %c0_i32 = arith.constant 0 : i32
    %c0_i32_0 = arith.constant 0 : i32
    return %arg0, %c0_i32 : i32, i32
  }
  func.func @transform_2(%arg0: i32) -> (i32, i32) {
    %c0_i32 = arith.constant 0 : i32
    %c0_i32_0 = arith.constant 0 : i32
    return %c0_i32, %arg0 : i32, i32
  }
  func.func @transform_3(%arg0: i32) -> (i32, i32) {
    %c0_i32 = arith.constant 0 : i32
    %c0_i32_0 = arith.constant 0 : i32
    %c0_i32_1 = arith.constant 0 : i32
    return %c0_i32, %c0_i32_0 : i32, i32
  }
  func.func @transform_4(%arg0: i32) -> (i32, i32) {
    %c0_i32 = arith.constant 0 : i32
    %c0_i32_0 = arith.constant 0 : i32
    %c0_i32_1 = arith.constant 0 : i32
    return %c0_i32, %c0_i32_0 : i32, i32
  }
  func.func @transform_5(%arg0: i32) -> (i32, i32) {
    %c0_i32 = arith.constant 0 : i32
    %c0_i32_0 = arith.constant 0 : i32
    %c0_i32_1 = arith.constant 0 : i32
    return %c0_i32, %c0_i32_0 : i32, i32
  }
  func.func @transform_6(%arg0: i32) -> (i32, i32) {
    %c0_i32 = arith.constant 0 : i32
    %c0_i32_0 = arith.constant 0 : i32
    %c0_i32_1 = arith.constant 0 : i32
    return %c0_i32, %c0_i32_0 : i32, i32
  }
}

</mosaic_0001>

<bundles_post_ra>
// kernel: custom-call.18
= control target key start
LH: loop header
LB: loop body
LE: loop exit
PB: predicated region body
PF: predicated region fallthrough
CT: control target
= control target key end

     0   :  { %s6_s0 = inlined_call_operand.vmem [shape: u32[16], index: 0, kind: output, shape index: {}]  }

// kernel: metabolism_processor_forward.18
= control target key start
LH: loop header
LB: loop body
LE: loop exit
PB: predicated region body
PF: predicated region fallthrough
CT: control target
= control target key end

     0   :  { %v534_v0 = vmov 0.0   ;;  %vm535_vm0 = vmmov 0   ;;  %vm46_vm1 = vcmask 261120   ;;  %vm100_vm2 = vcmask 7168   ;;  %s654_s3 = inlined_call_operand.vmem [shape: bf16[32,32], index: 3, kind: input, shape index: {}]   ;;  %s655_s0 = inlined_call_operand.vmem [shape: f32[8,32], index: 0, kind: input, shape index: {}]   ;;  %s656_s1 = inlined_call_operand.vmem [shape: f32[8,32], index: 1, kind: input, shape index: {}]   ;;  %s657_s4 = inlined_call_operand.vmem [shape: f32[2,32], index: 4, kind: input, shape index: {}]   ;;  %s658_s2 = inlined_call_operand.vmem [shape: f32[8,8], index: 2, kind: input, shape index: {}]   ;;  %s659_s6 = inlined_call_operand.vmem [shape: f32[8,32], index: 6, kind: output, shape index: {}]   ;;  %s660_s5 = inlined_call_operand.vmem [shape: f32[1,32], index: 5, kind: input, shape index: {}]  }
   0x1   :  { %489 = vmatprep.subr.bf16.mxu0 %v534_v0  ;;  %v522_v1 = vld [vmem:[%s654_s3 + $0x8] sm:$0xff]   ;;  %493 = vmatprep.mubr.msk.bf16.mxu0 %vm535_vm0, %v534_v0  ;;  %v523_v2 = vld [vmem:[%s654_s3] sm:$0xff]   ;;  %102 = vst.msk [vmem:[#allocation4] sm:$0xff] %vm100_vm2, %v534_v0  ;;  %vm300_vm3 = vcmask 1043456   ;;  %v536_v26 = vmov 0   ;;  %vm228_vm4 = vcmask 64512   ;;  %v218_v41 = vlaneseq }
   0x2   :  { %497 = vmatprep.subr.bf16.mxu1 %v534_v0  ;;  %501 = vmatprep.mubr.msk.bf16.mxu1 %vm535_vm0, %v534_v0  ;;  %v28_v3 = vld [vmem:[%s655_s0] sm:$0xff]  ;;  %v524_v4 = vld [vmem:[%s654_s3 + $0x8] sm:$0xff]   ;;  %103 = vst.msk [vmem:[%s659_s6] sm:$0xff] %vm46_vm1, %v534_v0 }
   0x3   :  { %490 = vmatpush3.bf16.msra.mxu0 %v522_v1  ;;  %v29_v5 = vpack.c.bf16 %v28_v3, %v28_v3  ;;  %498 = vmatpush3.bf16.msra.mxu1 %v524_v4  ;;  %v525_v6 = vld [vmem:[%s654_s3] sm:$0xff]   ;;  %v219_v42 = vshrl.u32 %v218_v41, 7 }
   0x4   :  { %491 = vmatprep.subr.bf16.mxu0 %v534_v0  ;;  %v105_v7 = vld [vmem:[%s656_s1] sm:$0xff]  ;;  %499 = vmatprep.subr.bf16.mxu1 %v534_v0 }
   0x5   :  { %v106_v8 = vpack.c.bf16 %v105_v7, %v105_v7  ;;  %v470_v9 = vld [vmem:[%s657_s4] ss:$0 sm:$0xff]  ;;  %v474_v12 = vld [vmem:[%s657_s4 + $0x1] ss:$0 sm:$0xff]  ;;  %520 = vset.pattern.permute.xlu1 %v536_v26  ;;  %v220_v44 = vsub.s32 0, %v219_v42 }
   0x6   :  { %v176_v28 = vld [vmem:[%s658_s2] sm:$0xff] }
   0x7   :  { %492 = vmatpush3.bf16.msra.mxu0 %v523_v2  ;;  %500 = vmatpush3.bf16.msra.mxu1 %v525_v6  ;;  %v251_v29 = vand.u32 2147483647, %v176_v28  ;;  %vm177_vm6 = vcmp.ne.f32.partialorder %v176_v28, 0.0 }
   0x8   :  { %505 = vmatprep.subr.bf16.mxu0 %v534_v0  ;;  %511 = vmatprep.subr.bf16.mxu1 %v534_v0  ;;  %v475_v47 = vsel %vm177_vm6, 1.0, %v534_v0 }
   0x9   :  { %v252_v31 = vsel %vm228_vm4, %v251_v29, 0.0  ;;  %vm226_vm8 = vcmp.gt.f32.partialorder %v475_v47, 0.0 }
   0xa   :  { %494 = vmatmul.mubr.msk.bf16.vlgmr.msra.gmra.mxu0 %vm46_vm1, %v29_v5  ;;  %502 = vmatmul.mubr.msk.bf16.vlgmr.msra.gmra.mxu1 %vm46_vm1, %v106_v8  ;;  %v253_v32 = vrot.slane %v252_v31, 4 }
   0xb   :  { %507 = vmatprep.mubr.msk.bf16.mxu0 %vm535_vm0, %v534_v0  ;;  %513 = vmatprep.mubr.msk.bf16.mxu1 %vm535_vm0, %v534_v0  ;;  %v382_v0 = vld [vmem:[%s659_s6] sm:$0xff] }
   0xc   :  { %v254_v33 = vadd.f32 %v253_v32, %v252_v31 }
   0xe   :  { %v255_v34 = vrot.slane %v254_v33, 2 }
  0x10   :  { %v256_v35 = vadd.f32 %v255_v34, %v254_v33 }
  0x12   :  { %v257_v36 = vrot.slane %v256_v35, 1 }
  0x14   :  { %v258_v37 = vadd.f32 %v257_v36, %v256_v35  ;;  %v478_v36 = vld [vmem:[%s660_s5] ss:$0 sm:$0xff] }
  0x16   :  { %526 = vrcp.f32 %v258_v37  ;;  %vm259_vm5 = vcmp.gt.f32.partialorder %v258_v37, 0.0 }
  0x23   :  { %v527_v39 = vpop.eup %526 }
  0x24   :  { %v262_v40 = vsel %vm259_vm5, %v527_v39, 0.0 }
  0xca   :  { %v84_v10 = vpop.f32.mrf.mxu0  ;;  %v161_v15 = vpop.f32.mrf.mxu1 }
  0xcb   :  { %90 = vst.msk [vmem:[#allocation2] sm:$0xff] %vm46_vm1, %v84_v10  ;;  %v96_v11 = vmul.f32 %v470_v9, %v84_v10  ;;  %v172_v17 = vmul.f32 %v474_v12, %v161_v15 }
  0xcc   :  { %v495_v13 = vpop.f32.mrf.mxu0  ;;  %v503_v18 = vpop.f32.mrf.mxu1 }
  0xcd   :  { %v97_v14 = vsel %vm46_vm1, %v96_v11, 0.0  ;;  %v173_v20 = vsel %vm46_vm1, %v172_v17, 0.0 }
  0xce   :  { %98 = vadd.xlane.f32.xlu0 %v97_v14  ;;  %v87_v16 = vpop.f32.mrf.mxu0  ;;  %v164_v21 = vpop.f32.mrf.mxu1  ;;  %v433_v14 = vld [vmem:[#allocation4] sm:$0xff] }
  0xd0   :  { %v496_v19 = vpop.f32.mrf.mxu0  ;;  %v504_v24 = vpop.f32.mrf.mxu1 }
  0xd2   :  { %v104_v22 = vld [vmem:[#allocation2] sm:$0xff]  ;;  %174 = vadd.xlane.f32.xlu0 %v173_v20 }
  0xd3   :  { %v296_v23 = vpack.c.bf16 %v104_v22, %v104_v22 }
  0xd5   :  { %v302_v25 = vsel %vm300_vm3, %v296_v23, 0 }
  0xd6   :  { %506 = vmatpush3.bf16.msra.mxu0 %v302_v25 }
 0x157   :  { %v99_v27 = vpop.xlane.xlu0 %98 }
 0x158   :  { %101 = vst.msk [vmem:[#allocation3] sm:$0xff] %vm100_vm2, %v99_v27 }
 0x15b   :  { %v175_v38 = vpop.xlane.xlu0 %174 }
 0x15f   :  { %v180_v30 = vld [vmem:[#allocation3] sm:$0xff] }
 0x160   :  { %215 = vperm.xlu1 %520, %v180_v30  }
 0x189   :  { %181 = vxpose.xlu1.b32.start.end [1/1] (short) (narrow) %v175_v38, 8 }
 0x18d   :  { %344 = vxpose.xlu1.b32.start.end [1/1] (short) (narrow) %v262_v40, 8 }
 0x1db   :  { %v216_v43 = vpop.permute.xlu1 %215 }
 0x205   :  { %v197_v45 = vpop.trf.xlu1 }
 0x206   :  { %v221_v46 = vrot.slane %v197_v45, %v220_v44 }
 0x208   :  { %v222_v48 = vadd.f32 %v221_v46, %v216_v43 }
 0x209   :  { %v360_v49 = vpop.trf.xlu1 }
 0x20a   :  { %vm223_vm7 = vcmp.gt.f32.partialorder %v222_v48, 0.0  ;;  %v224_v50 = vmul.f32 0.2, %v222_v48  ;;  %378 = vperm.xlu1 %520, %v360_v49  }
 0x20c   :  { %v225_v51 = vsel %vm223_vm7, %v222_v48, %v224_v50 }
 0x20d   :  { %v227_v52 = vsel %vm226_vm8, %v225_v51, -1e+09 }
 0x20e   :  { %v229_v53 = vsel %vm228_vm4, %v227_v52, -inf }
 0x20f   :  { %v230_v54 = vrot.slane %v229_v53, 4 }
 0x211   :  { %v231_v55 = vmax.f32 %v229_v53, %v230_v54 }
 0x213   :  { %v232_v56 = vrot.slane %v231_v55, 2 }
 0x215   :  { %v233_v57 = vmax.f32 %v231_v55, %v232_v56 }
 0x217   :  { %v234_v58 = vrot.slane %v233_v57, 1 }
 0x219   :  { %v235_v59 = vmax.f32 %v233_v57, %v234_v58 }
 0x21b   :  { %v236_v60 = vsub.f32 %v227_v52, %v235_v59 }
 0x21d   :  { %v237_v61 = vmul.f32 1.442695, %v236_v60 }
 0x21f   :  { %528 = vpow2.f32 %v237_v61 }
 0x22c   :  { %v529_v62 = vpop.eup %528 }
 0x22d   :  { %v239_v63 = vmul.f32 %v529_v62, %v475_v47 }
 0x22f   :  { %v240_v1 = vsel %vm228_vm4, %v239_v63, 0.0 }
 0x230   :  { %v241_v2 = vrot.slane %v240_v1, 4 }
 0x232   :  { %v242_v3 = vadd.f32 %v241_v2, %v240_v1 }
 0x234   :  { %v243_v4 = vrot.slane %v242_v3, 2 }
 0x236   :  { %v244_v5 = vadd.f32 %v243_v4, %v242_v3 }
 0x238   :  { %v245_v6 = vrot.slane %v244_v5, 1 }
 0x23a   :  { %v246_v7 = vadd.f32 %v245_v6, %v244_v5 }
 0x23c   :  { %v247_v8 = vmax.f32 %v246_v7, 1e-12 }
 0x23e   :  { %530 = vrcp.f32 %v247_v8 }
 0x24b   :  { %v531_v9 = vpop.eup %530 }
 0x24c   :  { %v249_v10 = vmul.f32 %v531_v9, %v239_v63 }
 0x24e   :  { %v250_v11 = vmul.f32 %v249_v10, %v176_v28 }
 0x250   :  { %263 = vxpose.xlu0.b32.start.end [1/1] (short) (narrow) %v250_v11, 8  ;;  %v383_v28 = vpack.c.bf16 %v250_v11, %v250_v11 }
 0x279   :  { %521 = vset.pattern.permute.xlu0 %v536_v26 }
 0x27d   :  { %434 = vadd.xlane.f32.xlu0 %v252_v31 }
 0x285   :  { %v379_v20 = vpop.permute.xlu1 %378 }
 0x2cc   :  { %v279_v12 = vpop.trf.xlu0 }
 0x2cd   :  { %v295_v13 = vpack.c.bf16 %v279_v12, %v279_v12 }
 0x2cf   :  { %508 = vmatmul.mubr.msk.bf16.vlgmr.msra.gmra.mxu0 %vm228_vm4, %v295_v13 }
 0x306   :  { %v435_v15 = vpop.xlane.xlu0 %434 }
 0x307   :  { %v436_v16 = vadd.f32 %v435_v15, %v433_v14 }
 0x309   :  { %438 = vst.msk [vmem:[#allocation4] sm:$0xff] %vm100_vm2, %v436_v16 }
 0x310   :  { %v442_v17 = vld [vmem:[#allocation4] sm:$0xff] }
 0x311   :  { %532 = vrcp.f32 %v442_v17  ;;  %vm443_vm9 = vcmp.gt.f32.partialorder %v442_v17, 0.0 }
 0x31e   :  { %v533_v18 = vpop.eup %532 }
 0x31f   :  { %v446_v19 = vsel %vm443_vm9, %v533_v18, 0.0 }
 0x320   :  { %450 = vperm.xlu1 %520, %v446_v19  }
 0x38f   :  { %v338_v21 = vpop.f32.mrf.mxu0 }
 0x390   :  { %v381_v22 = vmul.f32 %v379_v20, %v338_v21 }
 0x391   :  { %v509_v23 = vpop.f32.mrf.mxu0 }
 0x392   :  { %v384_v24 = vpack.c.bf16 %v381_v22, %v381_v22 }
 0x393   :  { %v341_v25 = vpop.f32.mrf.mxu0 }
 0x394   :  { %v389_v26 = vsel %vm300_vm3, %v384_v24, 0 }
 0x395   :  { %v510_v27 = vpop.f32.mrf.mxu0  ;;  %512 = vmatpush3.bf16.msra.mxu1 %v389_v26 }
 0x398   :  { %514 = vmatmul.mubr.msk.bf16.vlgmr.msra.gmra.mxu1 %vm228_vm4, %v383_v28 }
 0x39b   :  { %v451_v34 = vpop.permute.xlu1 %450 }
 0x458   :  { %v425_v29 = vpop.f32.mrf.mxu1 }
 0x459   :  { %v431_v30 = vadd.f32 %v425_v29, %v382_v0 }
 0x45a   :  { %v515_v31 = vpop.f32.mrf.mxu1 }
 0x45b   :  { %432 = vst.msk [vmem:[%s659_s6] sm:$0xff] %vm46_vm1, %v431_v30 }
 0x45c   :  { %v428_v32 = vpop.f32.mrf.mxu1 }
 0x45e   :  { %v516_v33 = vpop.f32.mrf.mxu1 }
 0x462   :  { %v447_v35 = vld [vmem:[%s659_s6] sm:$0xff] }
 0x463   :  { %v453_v37 = vmul.f32 %v451_v34, %v447_v35 }
 0x465   :  { %v461_v38 = vadd.f32 %v478_v36, %v453_v37 }
 0x467   :  { %462 = vst.msk [vmem:[%s659_s6] sm:$0xff] %vm46_vm1, %v461_v38 }

// kernel: metabolism_processor_forward.14
= control target key start
LH: loop header
LB: loop body
LE: loop exit
PB: predicated region body
PF: predicated region fallthrough
CT: control target
= control target key end

     0   :  { %s3296_s26 = smov 96   ;;  %vm62_vm0 = vcmask 261120   ;;  %s3297_s19 = smov 64   ;;  %v3298_v20 = vmov 0.0   ;;  %vm3299_vm1 = vmmov 0   ;;  %vm320_vm2 = vcmask 130048   ;;  %s4151_s3 = inlined_call_operand.vmem [shape: bf16[32,96], index: 3, kind: input, shape index: {}]   ;;  %s4152_s0 = inlined_call_operand.vmem [shape: f32[64,32], index: 0, kind: input, shape index: {}]   ;;  %s4153_s4 = inlined_call_operand.vmem [shape: f32[1,96], index: 4, kind: input, shape index: {}]   ;;  %s4154_s1 = inlined_call_operand.vmem [shape: f32[8,1,8], index: 1, kind: input, shape index: {}]   ;;  %s4155_s5 = inlined_call_operand.vmem [shape: bf16[2,32,32], index: 5, kind: input, shape index: {}]   ;;  %s4156_s2 = inlined_call_operand.vmem [shape: f32[64,1], index: 2, kind: input, shape index: {}]   ;;  %s4157_s6 = inlined_call_operand.vmem [shape: f32[6,32], index: 6, kind: input, shape index: {}]   ;;  %s4158_s7 = inlined_call_operand.vmem [shape: f32[64,32], index: 7, kind: output, shape index: {}]  }
   0x1   :  { %v3186_v0 = vld [vmem:[%s4151_s3 + $0x8] sm:$0xff]   ;;  %v3187_v1 = vld [vmem:[%s4151_s3] sm:$0xff]   ;;  %v29_v5 = vld [vmem:[%s4152_s0 + $0x10] sm:$0xff]  ;;  %vm753_vm3 = vcmask 64512   ;;  %vm853_vm4 = vcmask 1043456   ;;  %s3301_s15 = smov 16  }
   0x2   :  { %142 = vrot.lane.b32.xlu0 %v3186_v0, %s3296_s26  ;;  %v27_v2 = vld [vmem:[%s4152_s0] sm:$0xff]  ;;  %v28_v3 = vld [vmem:[%s4152_s0 + $0x8] sm:$0xff]  ;;  %2925 = vmatprep.subr.bf16.mxu0 %v3186_v0  ;;  %v30_v6 = vld [vmem:[%s4152_s0 + $0x18] sm:$0xff]  ;;  %vm2179_vm5 = vcmask 261248  }
   0x3   :  { %v35_v4 = vpack.c.bf16 %v28_v3, %v27_v2  ;;  %2926 = vmatpush3.bf16.msra.mxu0 %v3186_v0  ;;  %v31_v7 = vld [vmem:[%s4152_s0 + $0x20] sm:$0xff]  ;;  %v32_v8 = vld [vmem:[%s4152_s0 + $0x28] sm:$0xff]  ;;  %v36_v10 = vpack.c.bf16 %v30_v6, %v29_v5  ;;  %v33_v12 = vld [vmem:[%s4152_s0 + $0x30] sm:$0xff] }
   0x4   :  { %2927 = vmatprep.subr.bf16.mxu0 %v3187_v1  ;;  %v3372_v9 = vld [vmem:[%s4153_s4] ss:$0 sm:$0xff]  ;;  %v37_v11 = vpack.c.bf16 %v32_v8, %v31_v7  ;;  %v34_v13 = vld [vmem:[%s4152_s0 + $0x38] sm:$0xff] }
   0x5   :  { %2941 = vmatprep.mubr.msk.bf16.mxu1 %vm62_vm0, %v35_v4  ;;  %2929 = vmatprep.mubr.msk.bf16.mxu0 %vm62_vm0, %v35_v4  ;;  %v38_v14 = vpack.c.bf16 %v34_v13, %v33_v12 }
   0x6   :  { %140 = vrot.lane.b32.xlu0 %v3187_v1, %s3296_s26  ;;  %146 = vrot.lane.b32.xlu1 %v3372_v9, %s3296_s26 }
   0x7   :  { %2928 = vmatpush3.bf16.msra.mxu0 %v3187_v1 }
   0xa   :  { %2930 = vmatmul.mubr.msk.bf16.vlgmr.msra.gmra.mxu0 %vm62_vm0, %v36_v10  ;;  %214 = vrot.lane.b32.xlu0 %v3187_v1, %s3297_s19 }
   0xb   :  { %2933 = vmatprep.mubr.msk.bf16.mxu0 %vm62_vm0, %v37_v11  ;;  %216 = vrot.lane.b32.xlu1 %v3186_v0, %s3297_s19 }
  0x12   :  { %2934 = vmatmul.mubr.msk.bf16.gmra.mxu0 %vm62_vm0, %v38_v14 }
  0x13   :  { %2953 = vmatprep.mubr.msk.bf16.mxu0 %vm62_vm0, %v35_v4 }
  0x74   :  { %v143_v15 = vpop.permute.xlu0 %142 }
  0x75   :  { %2937 = vmatprep.subr.bf16.mxu1 %v143_v15 }
  0x76   :  { %2938 = vmatpush3.bf16.msra.mxu1 %v143_v15 }
  0x78   :  { %v141_v16 = vpop.permute.xlu0 %140  ;;  %v3387_v17 = vpop.permute.xlu1 %146 }
  0x79   :  { %2939 = vmatprep.subr.bf16.mxu1 %v141_v16 }
  0x7a   :  { %2940 = vmatpush3.bf16.msra.mxu1 %v141_v16 }
  0x7b   :  { %2961 = vmatprep.subr.bf16.mxu1 %v3298_v20 }
  0x7c   :  { %v215_v19 = vpop.permute.xlu0 %214 }
  0x7d   :  { %2942 = vmatmul.mubr.msk.bf16.vlgmr.msra.gmra.mxu1 %vm62_vm0, %v36_v10  ;;  %v217_v18 = vpop.permute.xlu1 %216 }
  0x7e   :  { %2945 = vmatprep.mubr.msk.bf16.mxu1 %vm62_vm0, %v37_v11  ;;  %2949 = vmatprep.subr.bf16.mxu0 %v217_v18 }
  0x7f   :  { %2950 = vmatpush3.bf16.msra.mxu0 %v217_v18 }
  0x80   :  { %2951 = vmatprep.subr.bf16.mxu0 %v215_v19 }
  0x83   :  { %2952 = vmatpush3.bf16.msra.mxu0 %v215_v19 }
  0x84   :  { %2973 = vmatprep.subr.bf16.mxu0 %v3298_v20 }
  0x85   :  { %2946 = vmatmul.mubr.msk.bf16.gmra.mxu1 %vm62_vm0, %v38_v14 }
  0x86   :  { %2954 = vmatmul.mubr.msk.bf16.vlgmr.msra.gmra.mxu0 %vm62_vm0, %v36_v10  ;;  %2963 = vmatprep.mubr.msk.bf16.mxu1 %vm3299_vm1, %v3298_v20 }
  0x87   :  { %2957 = vmatprep.mubr.msk.bf16.mxu0 %vm62_vm0, %v37_v11 }
  0x8e   :  { %2958 = vmatmul.mubr.msk.bf16.gmra.mxu0 %vm62_vm0, %v38_v14 }
  0x8f   :  { %2975 = vmatprep.mubr.msk.bf16.mxu0 %vm3299_vm1, %v3298_v20 }
  0xca   :  { %v2931_v21 = vpop.f32.mrf.mxu0 }
  0xcb   :  { %v118_v32 = vadd.f32 %v2931_v21, %v3372_v9 }
  0xcc   :  { %v109_v22 = vpop.f32.mrf.mxu0 }
  0xcd   :  { %v3414_v38 = vpack.c.bf16 %v118_v32, %v118_v32  ;;  %v110_v39 = vadd.f32 %v3372_v9, %v109_v22 }
  0xce   :  { %v2932_v28 = vpop.f32.mrf.mxu0 }
  0xcf   :  { %v3421_v44 = vpack.c.bf16 %v110_v39, %v110_v39  ;;  %v121_v62 = vadd.f32 %v2932_v28, %v3372_v9 }
  0xd0   :  { %v112_v36 = vpop.f32.mrf.mxu0 }
  0xd1   :  { %v113_v53 = vadd.f32 %v3372_v9, %v112_v36  ;;  %v3470_v2 = vpack.c.bf16 %v121_v62, %v121_v62 }
  0xd2   :  { %v2935_v40 = vpop.f32.mrf.mxu0 }
  0xd3   :  { %v3449_v58 = vpack.c.bf16 %v113_v53, %v113_v53  ;;  %v134_v63 = vadd.f32 %v2935_v40, %v3372_v9  ;;  %v3534_v40 = vld [vmem:[%s4154_s1 + $0x1] ss:$0 sm:$0xff] }
  0xd4   :  { %v125_v46 = vpop.f32.mrf.mxu0 }
  0xd5   :  { %v126_v47 = vadd.f32 %v3372_v9, %v125_v46  ;;  %v3472_v3 = vpack.c.bf16 %v134_v63, %v134_v63 }
  0xd6   :  { %v2936_v0 = vpop.f32.mrf.mxu0 }
  0xd7   :  { %v3447_v56 = vpack.c.bf16 %v126_v47, %v126_v47  ;;  %v137_v12 = vadd.f32 %v2936_v0, %v3372_v9  ;;  %v3552_v0 = vld [vmem:[%s4154_s1 + $0x3] ss:$0 sm:$0xff] }
  0xd8   :  { %v128_v4 = vpop.f32.mrf.mxu0 }
  0xd9   :  { %v129_v7 = vadd.f32 %v3372_v9, %v128_v4  ;;  %v3499_v13 = vpack.c.bf16 %v137_v12, %v137_v12 }
  0xdb   :  { %v3489_v10 = vpack.c.bf16 %v129_v7, %v129_v7 }
 0x13d   :  { %v2943_v23 = vpop.f32.mrf.mxu1 }
 0x13e   :  { %v192_v24 = vadd.f32 %v2943_v23, %v3387_v17 }
 0x13f   :  { %v183_v25 = vpop.f32.mrf.mxu1 }
 0x140   :  { %v3402_v26 = vpack.c.bf16 %v192_v24, %v192_v24  ;;  %v184_v27 = vadd.f32 %v183_v25, %v3387_v17 }
 0x141   :  { %v2944_v29 = vpop.f32.mrf.mxu1 }
 0x142   :  { %v417_v30 = vsel %vm320_vm2, %v3402_v26, 0  ;;  %v3407_v31 = vpack.c.bf16 %v184_v27, %v184_v27  ;;  %v195_v48 = vadd.f32 %v2944_v29, %v3387_v17  ;;  %v3524_v27 = vld [vmem:[%s4154_s1] ss:$0 sm:$0xff] }
 0x143   :  { %v186_v33 = vpop.f32.mrf.mxu1  ;;  %2974 = vmatpush3.bf16.xpose.msra.mxu0 %v417_v30 }
 0x144   :  { %v325_v34 = vsel %vm320_vm2, %v3407_v31, 0  ;;  %v187_v35 = vadd.f32 %v186_v33, %v3387_v17  ;;  %2985 = vmatprep.subr.bf16.mxu0 %v3298_v20  ;;  %v3443_v54 = vpack.c.bf16 %v195_v48, %v195_v48  ;;  %v3539_v48 = vld [vmem:[%s4154_s1 + $0x2] ss:$0 sm:$0xff] }
 0x145   :  { %v2947_v37 = vpop.f32.mrf.mxu1  ;;  %2962 = vmatpush3.bf16.xpose.msra.mxu1 %v325_v34 }
 0x146   :  { %2967 = vmatprep.subr.bf16.mxu1 %v3298_v20  ;;  %v3418_v42 = vpack.c.bf16 %v187_v35, %v187_v35  ;;  %v208_v50 = vadd.f32 %v2947_v37, %v3387_v17  ;;  %v463_v59 = vsel %vm320_vm2, %v3443_v54, 0  ;;  %v3505_v14 = vpop.f32.mrf.mxu0 }
 0x147   :  { %v199_v41 = vpop.f32.mrf.mxu1 }
 0x148   :  { %v200_v43 = vadd.f32 %v199_v41, %v3387_v17  ;;  %v371_v49 = vsel %vm320_vm2, %v3418_v42, 0  ;;  %v3445_v55 = vpack.c.bf16 %v208_v50, %v208_v50  ;;  %v3507_v15 = vpop.f32.mrf.mxu0 }
 0x149   :  { %v2948_v52 = vpop.f32.mrf.mxu1 }
 0x14a   :  { %v3423_v45 = vpack.c.bf16 %v200_v43, %v200_v43  ;;  %2976 = vmatmul.mubr.msk.bf16.vlgmr.msra.gmra.mxu0 %vm320_vm2, %v3414_v38  ;;  %v601_v60 = vsel %vm320_vm2, %v3445_v55, 0  ;;  %v211_v5 = vadd.f32 %v2948_v52, %v3387_v17  ;;  %v3509_v16 = vpop.f32.mrf.mxu0 }
 0x14b   :  { %2987 = vmatprep.mubr.msk.bf16.mxu0 %vm3299_vm1, %v3298_v20  ;;  %v202_v57 = vpop.f32.mrf.mxu1 }
 0x14c   :  { %v509_v51 = vsel %vm320_vm2, %v3423_v45, 0  ;;  %2964 = vmatmul.mubr.msk.bf16.vlgmr.msra.gmra.mxu1 %vm320_vm2, %v3421_v44  ;;  %v203_v61 = vadd.f32 %v202_v57, %v3387_v17  ;;  %v3487_v8 = vpack.c.bf16 %v211_v5, %v211_v5  ;;  %v3511_v17 = vpop.f32.mrf.mxu0 }
 0x14d   :  { %2968 = vmatpush3.bf16.xpose.msra.mxu1 %v371_v49  ;;  %2986 = vmatpush3.bf16.xpose.msra.mxu0 %v509_v51 }
 0x14e   :  { %2969 = vmatprep.mubr.msk.bf16.mxu1 %vm3299_vm1, %v3298_v20  ;;  %2979 = vmatprep.subr.bf16.mxu1 %v3298_v20  ;;  %v3468_v1 = vpack.c.bf16 %v203_v61, %v203_v61  ;;  %v647_v11 = vsel %vm320_vm2, %v3487_v8, 0  ;;  %v3513_v18 = vpop.f32.mrf.mxu0  ;;  %v3547_v61 = vld [vmem:[%s4154_s1 + $0x4] ss:$0 sm:$0xff] }
 0x14f   :  { %2997 = vmatprep.subr.bf16.mxu0 %v3298_v20 }
 0x150   :  { %v555_v6 = vsel %vm320_vm2, %v3468_v1, 0  ;;  %v3515_v19 = vpop.f32.mrf.mxu0 }
 0x152   :  { %v3517_v21 = vpop.f32.mrf.mxu0 }
 0x154   :  { %2970 = vmatmul.mubr.msk.bf16.vlgmr.msra.gmra.mxu1 %vm320_vm2, %v3449_v58  ;;  %2988 = vmatmul.mubr.msk.bf16.vlgmr.msra.gmra.mxu0 %vm320_vm2, %v3447_v56  ;;  %v3519_v22 = vpop.f32.mrf.mxu0 }
 0x155   :  { %2980 = vmatpush3.bf16.xpose.msra.mxu1 %v463_v59  ;;  %2998 = vmatpush3.bf16.xpose.msra.mxu0 %v601_v60 }
 0x156   :  { %2981 = vmatprep.mubr.msk.bf16.mxu1 %vm3299_vm1, %v3298_v20  ;;  %2999 = vmatprep.mubr.msk.bf16.mxu0 %vm3299_vm1, %v3298_v20 }
 0x157   :  { %2991 = vmatprep.subr.bf16.mxu1 %v3298_v20  ;;  %3009 = vmatprep.subr.bf16.mxu0 %v3298_v20 }
 0x15c   :  { %2982 = vmatmul.mubr.msk.bf16.vlgmr.msra.gmra.mxu1 %vm320_vm2, %v3470_v2  ;;  %3000 = vmatmul.mubr.msk.bf16.vlgmr.msra.gmra.mxu0 %vm320_vm2, %v3472_v3 }
 0x15d   :  { %2992 = vmatpush3.bf16.xpose.msra.mxu1 %v555_v6  ;;  %2993 = vmatprep.mubr.msk.bf16.mxu1 %vm3299_vm1, %v3298_v20 }
 0x15e   :  { %3003 = vmatprep.subr.bf16.mxu1 %v3298_v20  ;;  %3011 = vmatprep.mubr.msk.bf16.mxu0 %vm3299_vm1, %v3298_v20 }
 0x164   :  { %2994 = vmatmul.mubr.msk.bf16.vlgmr.msra.gmra.mxu1 %vm320_vm2, %v3489_v10 }
 0x165   :  { %3004 = vmatpush3.bf16.xpose.msra.mxu1 %v647_v11  ;;  %3005 = vmatprep.mubr.msk.bf16.mxu1 %vm3299_vm1, %v3298_v20 }
 0x166   :  { %3015 = vmatprep.subr.bf16.mxu1 %v3298_v20 }
 0x16c   :  { %3006 = vmatmul.mubr.msk.bf16.vlgmr.msra.gmra.mxu1 %vm320_vm2, %v3499_v13 }
 0x16d   :  { %3017 = vmatprep.mubr.msk.bf16.mxu1 %vm3299_vm1, %v3298_v20 }
 0x20a   :  { %v453_v23 = vpop.f32.mrf.mxu0 }
 0x20b   :  { %v691_v41 = vmul.f32 0.25, %v453_v23  ;;  %v3559_v23 = vld [vmem:[%s4154_s1 + $0x6] ss:$0 sm:$0xff] }
 0x20c   :  { %v361_v24 = vpop.f32.mrf.mxu1  ;;  %v2977_v25 = vpop.f32.mrf.mxu0 }
 0x20d   :  { %v689_v28 = vmul.f32 0.25, %v361_v24  ;;  %v747_v57 = vadd.f32 %v3539_v48, %v691_v41 }
 0x20e   :  { %v2965_v29 = vpop.f32.mrf.mxu1  ;;  %v456_v30 = vpop.f32.mrf.mxu0 }
 0x20f   :  { %v3527_v32 = vadd.f32 %v3524_v27, %v689_v28  ;;  %v760_v6 = vsel %vm753_vm3, %v747_v57, -inf }
 0x210   :  { %v364_v33 = vpop.f32.mrf.mxu1  ;;  %v2978_v34 = vpop.f32.mrf.mxu0 }
 0x211   :  { %v754_v35 = vsel %vm753_vm3, %v3527_v32, -inf }
 0x212   :  { %755 = vmax.xlane.f32.xlu1 %v754_v35  ;;  %v2966_v36 = vpop.f32.mrf.mxu1 }
 0x214   :  { %v407_v37 = vpop.f32.mrf.mxu1  ;;  %v545_v39 = vpop.f32.mrf.mxu0 }
 0x215   :  { %v690_v43 = vmul.f32 0.25, %v407_v37  ;;  %v693_v52 = vmul.f32 0.25, %v545_v39  ;;  %v3568_v37 = vld [vmem:[%s4154_s1 + $0x5] ss:$0 sm:$0xff] }
 0x216   :  { %v2971_v46 = vpop.f32.mrf.mxu1  ;;  %v2989_v47 = vpop.f32.mrf.mxu0 }
 0x217   :  { %v746_v49 = vadd.f32 %v3534_v40, %v690_v43  ;;  %v749_v7 = vadd.f32 %v3547_v61, %v693_v52 }
 0x218   :  { %v410_v50 = vpop.f32.mrf.mxu1  ;;  %v548_v51 = vpop.f32.mrf.mxu0 }
 0x219   :  { %v757_v53 = vsel %vm753_vm3, %v746_v49, -inf  ;;  %v766_v29 = vsel %vm753_vm3, %v749_v7, -inf }
 0x21a   :  { %v2990_v59 = vpop.f32.mrf.mxu0  ;;  %758 = vmax.xlane.f32.xlu0 %v757_v53  ;;  %v2972_v60 = vpop.f32.mrf.mxu1  ;;  %v3576_v53 = vld [vmem:[%s4154_s1 + $0x7] ss:$0 sm:$0xff]  ;;  %s3300_s1 = smov 112  }
 0x21c   :  { %v499_v62 = vpop.f32.mrf.mxu1  ;;  %v637_v63 = vpop.f32.mrf.mxu0 }
 0x21d   :  { %v692_v4 = vmul.f32 0.25, %v499_v62  ;;  %v695_v5 = vmul.f32 0.25, %v637_v63 }
 0x21e   :  { %v3001_v11 = vpop.f32.mrf.mxu0  ;;  %761 = vmax.xlane.f32.xlu0 %v760_v6  ;;  %v2983_v12 = vpop.f32.mrf.mxu1 }
 0x21f   :  { %v748_v24 = vadd.f32 %v3552_v0, %v692_v4  ;;  %v751_v33 = vadd.f32 %v3559_v23, %v695_v5 }
 0x220   :  { %v502_v25 = vpop.f32.mrf.mxu1  ;;  %v640_v28 = vpop.f32.mrf.mxu0 }
 0x221   :  { %v763_v30 = vsel %vm753_vm3, %v748_v24, -inf  ;;  %v772_v41 = vsel %vm753_vm3, %v751_v33, -inf }
 0x222   :  { %v3002_v34 = vpop.f32.mrf.mxu0  ;;  %767 = vmax.xlane.f32.xlu0 %v766_v29  ;;  %764 = vmax.xlane.f32.xlu1 %v763_v30  ;;  %v2984_v35 = vpop.f32.mrf.mxu1 }
 0x224   :  { %v591_v36 = vpop.f32.mrf.mxu1 }
 0x225   :  { %v694_v39 = vmul.f32 0.25, %v591_v36 }
 0x226   :  { %773 = vmax.xlane.f32.xlu0 %v772_v41  ;;  %v2995_v43 = vpop.f32.mrf.mxu1 }
 0x227   :  { %v750_v46 = vadd.f32 %v3568_v37, %v694_v39 }
 0x228   :  { %v594_v47 = vpop.f32.mrf.mxu1 }
 0x229   :  { %v769_v50 = vsel %vm753_vm3, %v750_v46, -inf }
 0x22a   :  { %770 = vmax.xlane.f32.xlu1 %v769_v50  ;;  %v2996_v51 = vpop.f32.mrf.mxu1 }
 0x22c   :  { %v683_v52 = vpop.f32.mrf.mxu1 }
 0x22d   :  { %v696_v59 = vmul.f32 0.25, %v683_v52 }
 0x22e   :  { %v3007_v60 = vpop.f32.mrf.mxu1 }
 0x22f   :  { %v752_v62 = vadd.f32 %v3576_v53, %v696_v59 }
 0x230   :  { %v686_v63 = vpop.f32.mrf.mxu1 }
 0x231   :  { %v775_v4 = vsel %vm753_vm3, %v752_v62, -inf }
 0x232   :  { %776 = vmax.xlane.f32.xlu1 %v775_v4  ;;  %v3008_v5 = vpop.f32.mrf.mxu1 }
 0x29b   :  { %v756_v6 = vpop.xlane.xlu1 %755 }
 0x29c   :  { %v778_v25 = vsub.f32 %v3527_v32, %v756_v6 }
 0x29e   :  { %v786_v34 = vmul.f32 1.442695, %v778_v25 }
 0x2a3   :  { %v759_v11 = vpop.xlane.xlu0 %758 }
 0x2a4   :  { %v779_v12 = vsub.f32 %v746_v49, %v759_v11 }
 0x2a6   :  { %v788_v28 = vmul.f32 1.442695, %v779_v12 }
 0x2a7   :  { %v762_v29 = vpop.xlane.xlu0 %761 }
 0x2a8   :  { %3192 = vpow2.f32 %v788_v28  ;;  %v780_v30 = vsub.f32 %v747_v57, %v762_v29 }
 0x2aa   :  { %v790_v35 = vmul.f32 1.442695, %v780_v30 }
 0x2ab   :  { %v768_v36 = vpop.xlane.xlu0 %767  ;;  %v765_v39 = vpop.xlane.xlu1 %764 }
 0x2ac   :  { %3194 = vpow2.f32 %v790_v35  ;;  %v782_v41 = vsub.f32 %v749_v7, %v768_v36  ;;  %v781_v43 = vsub.f32 %v748_v24, %v765_v39 }
 0x2ad   :  { %3196 = vpow2.f32 %v786_v34 }
 0x2ae   :  { %v794_v47 = vmul.f32 1.442695, %v782_v41  ;;  %v792_v50 = vmul.f32 1.442695, %v781_v43 }
 0x2af   :  { %v774_v51 = vpop.xlane.xlu0 %773 }
 0x2b0   :  { %v784_v52 = vsub.f32 %v751_v33, %v774_v51  ;;  %3198 = vpow2.f32 %v792_v50 }
 0x2b1   :  { %3200 = vpow2.f32 %v794_v47 }
 0x2b2   :  { %v798_v49 = vmul.f32 1.442695, %v784_v52 }
 0x2b3   :  { %v771_v32 = vpop.xlane.xlu1 %770 }
 0x2b4   :  { %3202 = vpow2.f32 %v798_v49  ;;  %v783_v59 = vsub.f32 %v750_v46, %v771_v32 }
 0x2b5   :  { %v3581_v60 = vpop.eup %3192 }
 0x2b6   :  { %v796_v57 = vmul.f32 1.442695, %v783_v59  ;;  %v805_v63 = vsel %vm753_vm3, %v3581_v60, 0.0 }
 0x2b7   :  { %806 = vadd.xlane.f32.xlu1 %v805_v63 }
 0x2b8   :  { %3204 = vpow2.f32 %v796_v57 }
 0x2b9   :  { %v3585_v7 = vpop.eup %3194 }
 0x2ba   :  { %v808_v24 = vsel %vm753_vm3, %v3585_v7, 0.0  ;;  %v3589_v33 = vpop.eup %3196 }
 0x2bb   :  { %809 = vadd.xlane.f32.xlu0 %v808_v24  ;;  %v802_v46 = vsel %vm753_vm3, %v3589_v33, 0.0  ;;  %v777_v30 = vpop.xlane.xlu1 %776 }
 0x2bc   :  { %v785_v34 = vsub.f32 %v752_v62, %v777_v30 }
 0x2bd   :  { %v3591_v4 = vpop.eup %3198 }
 0x2be   :  { %v3595_v5 = vpop.eup %3200  ;;  %v811_v6 = vsel %vm753_vm3, %v3591_v4, 0.0  ;;  %v800_v35 = vmul.f32 1.442695, %v785_v34 }
 0x2bf   :  { %803 = vadd.xlane.f32.xlu0 %v802_v46  ;;  %812 = vadd.xlane.f32.xlu1 %v811_v6  ;;  %v814_v12 = vsel %vm753_vm3, %v3595_v5, 0.0 }
 0x2c0   :  { %3206 = vpow2.f32 %v800_v35 }
 0x2c1   :  { %v3599_v11 = vpop.eup %3202 }
 0x2c2   :  { %v820_v25 = vsel %vm753_vm3, %v3599_v11, 0.0 }
 0x2c3   :  { %815 = vadd.xlane.f32.xlu0 %v814_v12  ;;  %821 = vadd.xlane.f32.xlu1 %v820_v25 }
 0x2c5   :  { %v3605_v28 = vpop.eup %3204 }
 0x2c6   :  { %v817_v29 = vsel %vm753_vm3, %v3605_v28, 0.0 }
 0x2c7   :  { %818 = vadd.xlane.f32.xlu1 %v817_v29 }
 0x2d8   :  { %1231 = vrot.lane.b32.xlu1 %v3407_v31, %s3300_s1 }
 0x2d9   :  { %220 = vrot.lane.b32.xlu0 %v3372_v9, %s3297_s19  ;;  %v3627_v9 = vpop.eup %3206 }
 0x2dd   :  { %1283 = vrot.lane.b32.xlu0 %v3418_v42, %s3300_s1 }
 0x2e1   :  { %1228 = vrot.lane.b32.xlu0 %v3421_v44, %s3300_s1 }
 0x2e5   :  { %1335 = vrot.lane.b32.xlu0 %v3402_v26, %s3300_s1  ;;  %v823_v26 = vsel %vm753_vm3, %v3627_v9, 0.0 }
 0x2e9   :  { %1332 = vrot.lane.b32.xlu0 %v3414_v38, %s3300_s1 }
 0x2ed   :  { %1439 = vrot.lane.b32.xlu0 %v3423_v45, %s3300_s1 }
 0x2f1   :  { %1436 = vrot.lane.b32.xlu0 %v3447_v56, %s3300_s1 }
 0x2f5   :  { %1543 = vrot.lane.b32.xlu0 %v3445_v55, %s3300_s1 }
 0x2f9   :  { %1540 = vrot.lane.b32.xlu0 %v3472_v3, %s3300_s1 }
 0x2fc   :  { %824 = vadd.xlane.f32.xlu1 %v823_v26 }
 0x30d   :  { %1280 = vrot.lane.b32.xlu1 %v3449_v58, %s3300_s1 }
 0x311   :  { %1387 = vrot.lane.b32.xlu1 %v3443_v54, %s3300_s1 }
 0x315   :  { %1384 = vrot.lane.b32.xlu1 %v3470_v2, %s3300_s1 }
 0x319   :  { %1491 = vrot.lane.b32.xlu1 %v3468_v1, %s3300_s1 }
 0x31d   :  { %1488 = vrot.lane.b32.xlu1 %v3489_v10, %s3300_s1 }
 0x321   :  { %1595 = vrot.lane.b32.xlu1 %v3487_v8, %s3300_s1 }
 0x325   :  { %1592 = vrot.lane.b32.xlu1 %v3499_v13, %s3300_s1 }
 0x340   :  { %v807_v31 = vpop.xlane.xlu1 %806 }
 0x341   :  { %3208 = vrcp.f32 %v807_v31 }
 0x344   :  { %v810_v38 = vpop.xlane.xlu0 %809 }
 0x348   :  { %v804_v42 = vpop.xlane.xlu0 %803  ;;  %v813_v44 = vpop.xlane.xlu1 %812 }
 0x349   :  { %3210 = vrcp.f32 %v804_v42 }
 0x34a   :  { %3212 = vrcp.f32 %v813_v44 }
 0x34b   :  { %3214 = vrcp.f32 %v810_v38 }
 0x34c   :  { %v816_v45 = vpop.xlane.xlu0 %815  ;;  %v822_v54 = vpop.xlane.xlu1 %821 }
 0x34e   :  { %v3209_v55 = vpop.eup %3208 }
 0x34f   :  { %v835_v8 = vmul.f32 %v3209_v55, %v3581_v60 }
 0x350   :  { %v221_v56 = vpop.permute.xlu0 %220  ;;  %v819_v58 = vpop.xlane.xlu1 %818 }
 0x351   :  { %v258_v1 = vadd.f32 %v3507_v15, %v221_v56  ;;  %v261_v2 = vadd.f32 %v3511_v17, %v221_v56  ;;  %v269_v3 = vadd.f32 %v3509_v16, %v221_v56  ;;  %3216 = vrcp.f32 %v819_v58 }
 0x352   :  { %v266_v62 = vadd.f32 %v3505_v14, %v221_v56  ;;  %3218 = vrcp.f32 %v816_v45  ;;  %v843_v39 = vpack.c.bf16 %v835_v8, %v835_v8  ;;  %v277_v51 = vadd.f32 %v3519_v22, %v221_v56 }
 0x353   :  { %v304_v10 = vpack.c.bf16 %v258_v1, %v258_v1  ;;  %v3651_v13 = vpack.c.bf16 %v261_v2, %v261_v2  ;;  %v3658_v17 = vpack.c.bf16 %v269_v3, %v269_v3  ;;  %v274_v59 = vadd.f32 %v3515_v19, %v221_v56 }
 0x354   :  { %v3663_v41 = vpack.c.bf16 %v266_v62, %v266_v62  ;;  %3220 = vrcp.f32 %v822_v54  ;;  %v3679_v22 = vpack.c.bf16 %v277_v51, %v277_v51  ;;  %v282_v12 = vadd.f32 %v3513_v18, %v221_v56  ;;  %v1284_v25 = vpop.permute.xlu0 %1283  ;;  %v1232_v38 = vpop.permute.xlu1 %1231 }
 0x355   :  { %1756 = vrot.lane.b32.xlu1 %v304_v10, %s3300_s1  ;;  %v855_v36 = vsel %vm853_vm4, %v304_v10, 0  ;;  %v901_v15 = vsel %vm853_vm4, %v3651_v13, 0  ;;  %v993_v47 = vsel %vm853_vm4, %v3658_v17, 0  ;;  %v3683_v63 = vpack.c.bf16 %v274_v59, %v274_v59 }
 0x356   :  { %v3211_v16 = vpop.eup %3210  ;;  %3010 = vmatpush3.bf16.msra.mxu0 %v855_v36  ;;  %3016 = vmatpush3.bf16.msra.mxu1 %v901_v15  ;;  %v947_v49 = vsel %vm853_vm4, %v3663_v41, 0  ;;  %v1085_v19 = vsel %vm853_vm4, %v3679_v22, 0  ;;  %v3703_v34 = vpack.c.bf16 %v282_v12, %v282_v12  ;;  %v1237_v45 = vsel %vm320_vm2, %v1232_v38, 0 }
 0x357   :  { %3027 = vmatprep.subr.bf16.mxu1 %v3298_v20  ;;  %3021 = vmatprep.subr.bf16.mxu0 %v3298_v20  ;;  %v834_v14 = vmul.f32 %v3211_v16, %v3589_v33  ;;  %v3213_v43 = vpop.eup %3212 }
 0x358   :  { %v3215_v52 = vpop.eup %3214  ;;  %v837_v32 = vmul.f32 %v3213_v43, %v3591_v4  ;;  %v285_v4 = vadd.f32 %v3517_v21, %v221_v56  ;;  %v1229_v26 = vpop.permute.xlu0 %1228 }
 0x359   :  { %3018 = vmatmul.mubr.msk.bf16.vlgmr.msra.gmra.mxu1 %vm753_vm3, %v843_v39  ;;  %v842_v50 = vpack.c.bf16 %v834_v14, %v834_v14  ;;  %v836_v60 = vmul.f32 %v3215_v52, %v3585_v7  ;;  %v1039_v7 = vsel %vm853_vm4, %v3683_v63, 0  ;;  %v1289_v39 = vsel %vm320_vm2, %v1284_v25, 0 }
 0x35a   :  { %3028 = vmatpush3.bf16.msra.mxu1 %v993_v47  ;;  %3029 = vmatprep.mubr.msk.bf16.mxu1 %vm3299_vm1, %v3298_v20  ;;  %v845_v57 = vpack.c.bf16 %v837_v32, %v837_v32  ;;  %v3699_v21 = vpack.c.bf16 %v285_v4, %v285_v4 }
 0x35b   :  { %3012 = vmatmul.mubr.msk.bf16.vlgmr.msra.gmra.mxu0 %vm753_vm3, %v842_v50  ;;  %3039 = vmatprep.subr.bf16.mxu1 %v3298_v20  ;;  %v844_v33 = vpack.c.bf16 %v836_v60, %v836_v60 }
 0x35c   :  { %3022 = vmatpush3.bf16.msra.mxu0 %v947_v49  ;;  %3023 = vmatprep.mubr.msk.bf16.mxu0 %vm3299_vm1, %v3298_v20  ;;  %v1336_v42 = vpop.permute.xlu0 %1335 }
 0x35d   :  { %3033 = vmatprep.subr.bf16.mxu0 %v3298_v20  ;;  %v1341_v55 = vsel %vm320_vm2, %v1336_v42, 0 }
 0x35e   :  { %v3217_v24 = vpop.eup %3216 }
 0x35f   :  { %v3219_v46 = vpop.eup %3218  ;;  %v839_v6 = vmul.f32 %v3217_v24, %v3605_v28  ;;  %v1177_v28 = vsel %vm853_vm4, %v3699_v21, 0 }
 0x360   :  { %v838_v29 = vmul.f32 %v3219_v46, %v3595_v5  ;;  %v1131_v5 = vsel %vm853_vm4, %v3703_v34, 0  ;;  %v1333_v54 = vpop.permute.xlu0 %1332 }
 0x361   :  { %3030 = vmatmul.mubr.msk.bf16.vlgmr.msra.gmra.mxu1 %vm753_vm3, %v845_v57  ;;  %v847_v30 = vpack.c.bf16 %v839_v6, %v839_v6  ;;  %v3221_v35 = vpop.eup %3220 }
 0x362   :  { %3040 = vmatpush3.bf16.msra.mxu1 %v1085_v19  ;;  %3041 = vmatprep.mubr.msk.bf16.mxu1 %vm3299_vm1, %v3298_v20  ;;  %v846_v18 = vpack.c.bf16 %v838_v29, %v838_v29  ;;  %v840_v31 = vmul.f32 %v3221_v35, %v3599_v11 }
 0x363   :  { %3024 = vmatmul.mubr.msk.bf16.vlgmr.msra.gmra.mxu0 %vm753_vm3, %v844_v33  ;;  %3051 = vmatprep.subr.bf16.mxu1 %v3298_v20 }
 0x364   :  { %3034 = vmatpush3.bf16.msra.mxu0 %v1039_v7  ;;  %3035 = vmatprep.mubr.msk.bf16.mxu0 %vm3299_vm1, %v3298_v20  ;;  %v848_v44 = vpack.c.bf16 %v840_v31, %v840_v31  ;;  %v1440_v56 = vpop.permute.xlu0 %1439 }
 0x365   :  { %3045 = vmatprep.subr.bf16.mxu0 %v3298_v20  ;;  %v1445_v58 = vsel %vm320_vm2, %v1440_v56, 0 }
 0x368   :  { %v1437_v11 = vpop.permute.xlu0 %1436 }
 0x369   :  { %3042 = vmatmul.mubr.msk.bf16.vlgmr.msra.gmra.mxu1 %vm753_vm3, %v847_v30 }
 0x36a   :  { %3052 = vmatpush3.bf16.msra.mxu1 %v1177_v28  ;;  %3053 = vmatprep.mubr.msk.bf16.mxu1 %vm3299_vm1, %v3298_v20 }
 0x36b   :  { %3036 = vmatmul.mubr.msk.bf16.vlgmr.msra.gmra.mxu0 %vm753_vm3, %v846_v18  ;;  %3063 = vmatprep.subr.bf16.mxu1 %v3298_v20 }
 0x36c   :  { %3046 = vmatpush3.bf16.msra.mxu0 %v1131_v5  ;;  %3047 = vmatprep.mubr.msk.bf16.mxu0 %vm3299_vm1, %v3298_v20  ;;  %v1544_v2 = vpop.permute.xlu0 %1543 }
 0x36d   :  { %3057 = vmatprep.subr.bf16.mxu0 %v3298_v20  ;;  %v1549_v3 = vsel %vm320_vm2, %v1544_v2, 0 }
 0x370   :  { %v1541_v10 = vpop.permute.xlu0 %1540 }
 0x373   :  { %3048 = vmatmul.mubr.msk.bf16.vlgmr.msra.gmra.mxu0 %vm753_vm3, %v848_v44 }
 0x374   :  { %3058 = vmatpush3.bf16.xpose.msra.mxu0 %v1237_v45  ;;  %3059 = vmatprep.mubr.msk.bf16.mxu0 %vm3299_vm1, %v3298_v20 }
 0x375   :  { %3069 = vmatprep.subr.bf16.mxu0 %v3298_v20 }
 0x37b   :  { %3060 = vmatmul.mubr.msk.bf16.vlgmr.msra.gmra.mxu0 %vm320_vm2, %v1229_v26 }
 0x37c   :  { %3070 = vmatpush3.bf16.xpose.msra.mxu0 %v1341_v55  ;;  %3071 = vmatprep.mubr.msk.bf16.mxu0 %vm3299_vm1, %v3298_v20 }
 0x37d   :  { %3081 = vmatprep.subr.bf16.mxu0 %v3298_v20 }
 0x383   :  { %3072 = vmatmul.mubr.msk.bf16.vlgmr.msra.gmra.mxu0 %vm320_vm2, %v1333_v54 }
 0x384   :  { %3082 = vmatpush3.bf16.xpose.msra.mxu0 %v1445_v58  ;;  %3083 = vmatprep.mubr.msk.bf16.mxu0 %vm3299_vm1, %v3298_v20 }
 0x385   :  { %3093 = vmatprep.subr.bf16.mxu0 %v3298_v20  ;;  %v825_v1 = vpop.xlane.xlu1 %824 }
 0x386   :  { %3222 = vrcp.f32 %v825_v1 }
 0x389   :  { %v1281_v8 = vpop.permute.xlu1 %1280 }
 0x38b   :  { %3084 = vmatmul.mubr.msk.bf16.vlgmr.msra.gmra.mxu0 %vm320_vm2, %v1437_v11 }
 0x38c   :  { %3094 = vmatpush3.bf16.xpose.msra.mxu0 %v1549_v3  ;;  %3095 = vmatprep.mubr.msk.bf16.mxu0 %vm3299_vm1, %v3298_v20 }
 0x38d   :  { %3105 = vmatprep.subr.bf16.mxu0 %v3298_v20  ;;  %v1388_v15 = vpop.permute.xlu1 %1387 }
 0x38e   :  { %v1393_v43 = vsel %vm320_vm2, %v1388_v15, 0 }
 0x391   :  { %v1385_v14 = vpop.permute.xlu1 %1384 }
 0x393   :  { %3096 = vmatmul.mubr.msk.bf16.vlgmr.msra.gmra.mxu0 %vm320_vm2, %v1541_v10  ;;  %v3223_v62 = vpop.eup %3222 }
 0x394   :  { %3107 = vmatprep.mubr.msk.bf16.mxu0 %vm3299_vm1, %v3298_v20  ;;  %v841_v36 = vmul.f32 %v3223_v62, %v3627_v9 }
 0x395   :  { %v1492_v47 = vpop.permute.xlu1 %1491 }
 0x396   :  { %v849_v16 = vpack.c.bf16 %v841_v36, %v841_v36  ;;  %v1497_v50 = vsel %vm320_vm2, %v1492_v47, 0 }
 0x398   :  { %3054 = vmatmul.mubr.msk.bf16.vlgmr.msra.gmra.mxu1 %vm753_vm3, %v849_v16 }
 0x399   :  { %3064 = vmatpush3.bf16.xpose.msra.mxu1 %v1289_v39  ;;  %3065 = vmatprep.mubr.msk.bf16.mxu1 %vm3299_vm1, %v3298_v20  ;;  %v1489_v9 = vpop.permute.xlu1 %1488 }
 0x39a   :  { %3075 = vmatprep.subr.bf16.mxu1 %v3298_v20 }
 0x39d   :  { %v1596_v51 = vpop.permute.xlu1 %1595 }
 0x39e   :  { %v1601_v52 = vsel %vm320_vm2, %v1596_v51, 0 }
 0x3a0   :  { %3066 = vmatmul.mubr.msk.bf16.vlgmr.msra.gmra.mxu1 %vm320_vm2, %v1281_v8 }
 0x3a1   :  { %3076 = vmatpush3.bf16.xpose.msra.mxu1 %v1393_v43  ;;  %3077 = vmatprep.mubr.msk.bf16.mxu1 %vm3299_vm1, %v3298_v20  ;;  %v1593_v49 = vpop.permute.xlu1 %1592 }
 0x3a2   :  { %3087 = vmatprep.subr.bf16.mxu1 %v3298_v20 }
 0x3a8   :  { %3078 = vmatmul.mubr.msk.bf16.vlgmr.msra.gmra.mxu1 %vm320_vm2, %v1385_v14 }
 0x3a9   :  { %3088 = vmatpush3.bf16.xpose.msra.mxu1 %v1497_v50  ;;  %3089 = vmatprep.mubr.msk.bf16.mxu1 %vm3299_vm1, %v3298_v20 }
 0x3aa   :  { %3099 = vmatprep.subr.bf16.mxu1 %v3298_v20 }
 0x3b0   :  { %3090 = vmatmul.mubr.msk.bf16.vlgmr.msra.gmra.mxu1 %vm320_vm2, %v1489_v9 }
 0x3b1   :  { %3100 = vmatpush3.bf16.xpose.msra.mxu1 %v1601_v52  ;;  %3101 = vmatprep.mubr.msk.bf16.mxu1 %vm3299_vm1, %v3298_v20 }
 0x3b2   :  { %3111 = vmatprep.subr.bf16.mxu1 %v3298_v20 }
 0x3b8   :  { %3102 = vmatmul.mubr.msk.bf16.vlgmr.msra.gmra.mxu1 %vm320_vm2, %v1593_v49 }
 0x3b9   :  { %3113 = vmatprep.mubr.msk.bf16.mxu1 %vm3299_vm1, %v3298_v20 }
 0x3c7   :  { %v1757_v32 = vpop.permute.xlu1 %1756 }
 0x3c8   :  { %v1762_v59 = vsel %vm853_vm4, %v1757_v32, 0 }
 0x3c9   :  { %3106 = vmatpush3.bf16.msra.mxu0 %v1762_v59 }
 0x3ca   :  { %3117 = vmatprep.subr.bf16.mxu0 %v3298_v20 }
 0x419   :  { %v937_v60 = vpop.f32.mrf.mxu1 }
 0x41a   :  { %1220 = vst.msk [vmem:[#allocation2 + $0x8] sm:$0xff] %vm320_vm2, %v937_v60 }
 0x41b   :  { %v891_v57 = vpop.f32.mrf.mxu0  ;;  %v3019_v24 = vpop.f32.mrf.mxu1 }
 0x41c   :  { %1219 = vst.msk [vmem:[#allocation2] sm:$0xff] %vm320_vm2, %v891_v57 }
 0x41d   :  { %v3013_v19 = vpop.f32.mrf.mxu0  ;;  %v940_v33 = vpop.f32.mrf.mxu1 }
 0x41f   :  { %v894_v4 = vpop.f32.mrf.mxu0  ;;  %v3020_v46 = vpop.f32.mrf.mxu1 }
 0x421   :  { %v3014_v7 = vpop.f32.mrf.mxu0  ;;  %v1029_v6 = vpop.f32.mrf.mxu1 }
 0x422   :  { %1222 = vst.msk [vmem:[#allocation2 + $0x18] sm:$0xff] %vm320_vm2, %v1029_v6 }
 0x423   :  { %v983_v12 = vpop.f32.mrf.mxu0  ;;  %v3031_v25 = vpop.f32.mrf.mxu1 }
 0x424   :  { %1221 = vst.msk [vmem:[#allocation2 + $0x10] sm:$0xff] %vm320_vm2, %v983_v12 }
 0x425   :  { %v3025_v29 = vpop.f32.mrf.mxu0  ;;  %v1032_v30 = vpop.f32.mrf.mxu1 }
 0x427   :  { %v986_v28 = vpop.f32.mrf.mxu0  ;;  %v3032_v18 = vpop.f32.mrf.mxu1 }
 0x429   :  { %v3026_v35 = vpop.f32.mrf.mxu0  ;;  %v1121_v26 = vpop.f32.mrf.mxu1 }
 0x42a   :  { %1224 = vst.msk [vmem:[#allocation2 + $0x28] sm:$0xff] %vm320_vm2, %v1121_v26 }
 0x42b   :  { %v1075_v5 = vpop.f32.mrf.mxu0  ;;  %v3043_v31 = vpop.f32.mrf.mxu1 }
 0x42c   :  { %1223 = vst.msk [vmem:[#allocation2 + $0x20] sm:$0xff] %vm320_vm2, %v1075_v5 }
 0x42d   :  { %v3037_v38 = vpop.f32.mrf.mxu0  ;;  %v1124_v42 = vpop.f32.mrf.mxu1 }
 0x42f   :  { %v1078_v44 = vpop.f32.mrf.mxu0  ;;  %v3044_v45 = vpop.f32.mrf.mxu1 }
 0x431   :  { %v3038_v54 = vpop.f32.mrf.mxu0 }
 0x433   :  { %v1167_v55 = vpop.f32.mrf.mxu0 }
 0x434   :  { %1225 = vst.msk [vmem:[#allocation2 + $0x30] sm:$0xff] %vm320_vm2, %v1167_v55 }
 0x435   :  { %v3049_v56 = vpop.f32.mrf.mxu0 }
 0x437   :  { %v1170_v11 = vpop.f32.mrf.mxu0 }
 0x439   :  { %v3050_v58 = vpop.f32.mrf.mxu0 }
 0x43b   :  { %v1273_v1 = vpop.f32.mrf.mxu0 }
 0x43c   :  { %v1643_v2 = vmul.f32 0.25, %v1273_v1 }
 0x43d   :  { %v3061_v3 = vpop.f32.mrf.mxu0 }
 0x43e   :  { %v3775_v8 = vadd.f32 %v3524_v27, %v1643_v2 }
 0x43f   :  { %v1276_v10 = vpop.f32.mrf.mxu0 }
 0x440   :  { %v1659_v62 = vsel %vm753_vm3, %v3775_v8, -inf }
 0x441   :  { %1660 = vmax.xlane.f32.xlu0 %v1659_v62  ;;  %v3062_v36 = vpop.f32.mrf.mxu0 }
 0x443   :  { %v1377_v15 = vpop.f32.mrf.mxu0 }
 0x444   :  { %v1645_v16 = vmul.f32 0.25, %v1377_v15 }
 0x445   :  { %v3073_v39 = vpop.f32.mrf.mxu0 }
 0x446   :  { %v3780_v14 = vadd.f32 %v3539_v48, %v1645_v16 }
 0x447   :  { %v1380_v43 = vpop.f32.mrf.mxu0 }
 0x448   :  { %v1665_v47 = vsel %vm753_vm3, %v3780_v14, -inf }
 0x449   :  { %1666 = vmax.xlane.f32.xlu0 %v1665_v47  ;;  %v3074_v9 = vpop.f32.mrf.mxu0 }
 0x44b   :  { %v1481_v27 = vpop.f32.mrf.mxu0 }
 0x44c   :  { %v1647_v4 = vmul.f32 0.25, %v1481_v27 }
 0x44d   :  { %v3085_v50 = vpop.f32.mrf.mxu0 }
 0x44e   :  { %v3788_v30 = vadd.f32 %v3547_v61, %v1647_v4 }
 0x44f   :  { %v1484_v51 = vpop.f32.mrf.mxu0 }
 0x450   :  { %v1671_v26 = vsel %vm753_vm3, %v3788_v30, -inf }
 0x451   :  { %v3086_v52 = vpop.f32.mrf.mxu0 }
 0x453   :  { %v1585_v49 = vpop.f32.mrf.mxu0 }
 0x454   :  { %v1649_v25 = vmul.f32 0.25, %v1585_v49 }
 0x455   :  { %v3097_v32 = vpop.f32.mrf.mxu0 }
 0x456   :  { %v3793_v5 = vadd.f32 %v3559_v23, %v1649_v25 }
 0x457   :  { %v1588_v59 = vpop.f32.mrf.mxu0 }
 0x458   :  { %v1213_v60 = vpop.f32.mrf.mxu1  ;;  %v1677_v42 = vsel %vm753_vm3, %v3793_v5, -inf }
 0x459   :  { %v3098_v57 = vpop.f32.mrf.mxu0  ;;  %1226 = vst.msk [vmem:[#allocation2 + $0x38] sm:$0xff] %vm320_vm2, %v1213_v60 }
 0x45a   :  { %v3055_v24 = vpop.f32.mrf.mxu1 }
 0x45c   :  { %v1216_v48 = vpop.f32.mrf.mxu1 }
 0x45e   :  { %v3056_v19 = vpop.f32.mrf.mxu1 }
 0x460   :  { %v1325_v33 = vpop.f32.mrf.mxu1 }
 0x461   :  { %v1644_v46 = vmul.f32 0.25, %v1325_v33 }
 0x462   :  { %v3067_v7 = vpop.f32.mrf.mxu1 }
 0x463   :  { %v1652_v6 = vadd.f32 %v3534_v40, %v1644_v46 }
 0x464   :  { %v1328_v12 = vpop.f32.mrf.mxu1 }
 0x465   :  { %v1662_v29 = vsel %vm753_vm3, %v1652_v6, -inf }
 0x466   :  { %1663 = vmax.xlane.f32.xlu1 %v1662_v29  ;;  %v3068_v28 = vpop.f32.mrf.mxu1 }
 0x468   :  { %v1429_v18 = vpop.f32.mrf.mxu1 }
 0x469   :  { %v1646_v35 = vmul.f32 0.25, %v1429_v18 }
 0x46a   :  { %1672 = vmax.xlane.f32.xlu1 %v1671_v26  ;;  %v3079_v31 = vpop.f32.mrf.mxu1 }
 0x46b   :  { %v1654_v40 = vadd.f32 %v3552_v0, %v1646_v35 }
 0x46c   :  { %v1432_v38 = vpop.f32.mrf.mxu1 }
 0x46d   :  { %v1668_v61 = vsel %vm753_vm3, %v1654_v40, -inf }
 0x46e   :  { %1678 = vmax.xlane.f32.xlu1 %v1677_v42  ;;  %1669 = vmax.xlane.f32.xlu0 %v1668_v61  ;;  %v3080_v44 = vpop.f32.mrf.mxu1 }
 0x470   :  { %v1533_v45 = vpop.f32.mrf.mxu1 }
 0x471   :  { %v1648_v54 = vmul.f32 0.25, %v1533_v45 }
 0x472   :  { %v3091_v55 = vpop.f32.mrf.mxu1 }
 0x473   :  { %v3800_v56 = vadd.f32 %v3568_v37, %v1648_v54 }
 0x474   :  { %v1536_v23 = vpop.f32.mrf.mxu1 }
 0x475   :  { %v1674_v11 = vsel %vm753_vm3, %v3800_v56, -inf }
 0x476   :  { %1675 = vmax.xlane.f32.xlu0 %v1674_v11  ;;  %v3092_v0 = vpop.f32.mrf.mxu1 }
 0x478   :  { %v1637_v58 = vpop.f32.mrf.mxu1 }
 0x479   :  { %v1650_v1 = vmul.f32 0.25, %v1637_v58 }
 0x47a   :  { %v3103_v2 = vpop.f32.mrf.mxu1 }
 0x47b   :  { %v3805_v3 = vadd.f32 %v3576_v53, %v1650_v1 }
 0x47c   :  { %v1640_v10 = vpop.f32.mrf.mxu1 }
 0x47d   :  { %v1680_v62 = vsel %vm753_vm3, %v3805_v3, -inf }
 0x47e   :  { %1681 = vmax.xlane.f32.xlu0 %v1680_v62  ;;  %v3104_v36 = vpop.f32.mrf.mxu1 }
 0x47f   :  { %1854 = vrot.lane.b32.xlu1 %v3663_v41, %s3300_s1 }
 0x483   :  { %1903 = vrot.lane.b32.xlu1 %v3658_v17, %s3300_s1 }
 0x494   :  { %1805 = vrot.lane.b32.xlu0 %v3651_v13, %s3300_s1 }
 0x4ca   :  { %v1661_v37 = vpop.xlane.xlu0 %1660 }
 0x4cb   :  { %v1683_v15 = vsub.f32 %v3775_v8, %v1661_v37 }
 0x4cd   :  { %v1691_v53 = vmul.f32 1.442695, %v1683_v15 }
 0x4cf   :  { %3224 = vpow2.f32 %v1691_v53 }
 0x4d2   :  { %v1667_v16 = vpop.xlane.xlu0 %1666 }
 0x4d3   :  { %v1685_v39 = vsub.f32 %v3780_v14, %v1667_v16 }
 0x4d5   :  { %v1695_v43 = vmul.f32 1.442695, %v1685_v39 }
 0x4d7   :  { %3226 = vpow2.f32 %v1695_v43 }
 0x4dc   :  { %v3817_v47 = vpop.eup %3224 }
 0x4dd   :  { %v1707_v41 = vsel %vm753_vm3, %v3817_v47, 0.0 }
 0x4de   :  { %1708 = vadd.xlane.f32.xlu1 %v1707_v41 }
 0x4e4   :  { %v3821_v17 = vpop.eup %3226 }
 0x4e5   :  { %v1713_v13 = vsel %vm753_vm3, %v3821_v17, 0.0 }
 0x4e6   :  { %1714 = vadd.xlane.f32.xlu1 %v1713_v13 }
 0x4ef   :  { %v1664_v8 = vpop.xlane.xlu1 %1663 }
 0x4f0   :  { %v1684_v9 = vsub.f32 %v1652_v6, %v1664_v8 }
 0x4f2   :  { %v1693_v27 = vmul.f32 1.442695, %v1684_v9 }
 0x4f3   :  { %v1673_v52 = vpop.xlane.xlu1 %1672 }
 0x4f4   :  { %3228 = vpow2.f32 %v1693_v27  ;;  %v1687_v32 = vsub.f32 %v3788_v30, %v1673_v52 }
 0x4f6   :  { %v1699_v24 = vmul.f32 1.442695, %v1687_v32 }
 0x4f7   :  { %2001 = vrot.lane.b32.xlu1 %v3679_v22, %s3300_s1  ;;  %v1670_v14 = vpop.xlane.xlu0 %1669  ;;  %v1679_v59 = vpop.xlane.xlu1 %1678 }
 0x4f8   :  { %v1686_v50 = vsub.f32 %v1654_v40, %v1670_v14  ;;  %v1689_v48 = vsub.f32 %v3793_v5, %v1679_v59 }
 0x4fa   :  { %v1697_v51 = vmul.f32 1.442695, %v1686_v50  ;;  %v1703_v22 = vmul.f32 1.442695, %v1689_v48 }
 0x4fb   :  { %v1855_v40 = vpop.permute.xlu1 %1854 }
 0x4fc   :  { %3230 = vpow2.f32 %v1697_v51  ;;  %v1860_v54 = vsel %vm853_vm4, %v1855_v40, 0 }
 0x4fd   :  { %3232 = vpow2.f32 %v1699_v24 }
 0x4fe   :  { %3234 = vpow2.f32 %v1703_v22 }
 0x4ff   :  { %v1676_v57 = vpop.xlane.xlu0 %1675 }
 0x500   :  { %v1688_v30 = vsub.f32 %v3800_v56, %v1676_v57 }
 0x501   :  { %v3827_v49 = vpop.eup %3228 }
 0x502   :  { %v1710_v60 = vsel %vm753_vm3, %v3827_v49, 0.0  ;;  %v1701_v28 = vmul.f32 1.442695, %v1688_v30 }
 0x503   :  { %1711 = vadd.xlane.f32.xlu0 %v1710_v60 }
 0x504   :  { %3236 = vpow2.f32 %v1701_v28 }
 0x507   :  { %v1682_v19 = vpop.xlane.xlu0 %1681 }
 0x508   :  { %v1690_v18 = vsub.f32 %v3805_v3, %v1682_v19 }
 0x509   :  { %v3833_v33 = vpop.eup %3230 }
 0x50a   :  { %v1716_v4 = vsel %vm753_vm3, %v3833_v33, 0.0  ;;  %v3839_v6 = vpop.eup %3232  ;;  %v1705_v35 = vmul.f32 1.442695, %v1690_v18 }
 0x50b   :  { %v1806_v46 = vpop.permute.xlu0 %1805  ;;  %1717 = vadd.xlane.f32.xlu0 %v1716_v4  ;;  %v1719_v12 = vsel %vm753_vm3, %v3839_v6, 0.0  ;;  %v3843_v25 = vpop.eup %3234 }
 0x50c   :  { %v1811_v7 = vsel %vm853_vm4, %v1806_v46, 0  ;;  %v1725_v29 = vsel %vm753_vm3, %v3843_v25, 0.0  ;;  %3238 = vpow2.f32 %v1705_v35 }
 0x50d   :  { %3112 = vmatpush3.bf16.msra.mxu1 %v1811_v7 }
 0x50e   :  { %3123 = vmatprep.subr.bf16.mxu1 %v3298_v20 }
 0x511   :  { %v3853_v26 = vpop.eup %3236 }
 0x512   :  { %v1722_v5 = vsel %vm753_vm3, %v3853_v26, 0.0 }
 0x519   :  { %v3857_v31 = vpop.eup %3238 }
 0x51b   :  { %1720 = vadd.xlane.f32.xlu1 %v1719_v12  ;;  %v3189_v12 = vld [vmem:[%s4155_s5] sm:$0xff]  }
 0x51f   :  { %1726 = vadd.xlane.f32.xlu1 %v1725_v29 }
 0x521   :  { %1952 = vrot.lane.b32.xlu0 %v3683_v63, %s3300_s1  ;;  %v1728_v63 = vsel %vm753_vm3, %v3857_v31, 0.0 }
 0x530   :  { %2099 = vrot.lane.b32.xlu1 %v3699_v21, %s3300_s1  ;;  %v1904_v21 = vpop.permute.xlu1 %1903 }
 0x531   :  { %v1909_v10 = vsel %vm853_vm4, %v1904_v21, 0 }
 0x540   :  { %1723 = vadd.xlane.f32.xlu0 %v1722_v5 }
 0x544   :  { %1729 = vadd.xlane.f32.xlu0 %v1728_v63 }
 0x55a   :  { %2050 = vrot.lane.b32.xlu0 %v3703_v34, %s3300_s1 }
 0x567   :  { %v1709_v38 = vpop.xlane.xlu1 %1708 }
 0x568   :  { %3240 = vrcp.f32 %v1709_v38 }
 0x56f   :  { %v1715_v42 = vpop.xlane.xlu1 %1714 }
 0x570   :  { %3242 = vrcp.f32 %v1715_v42 }
 0x573   :  { %v2002_v62 = vpop.permute.xlu1 %2001 }
 0x574   :  { %v2007_v16 = vsel %vm853_vm4, %v2002_v62, 0  ;;  %v2300_v62 = vld [vmem:[%s4156_s2 + $0x10] sm:$0xff] }
 0x575   :  { %v3241_v61 = vpop.eup %3240 }
 0x576   :  { %v1739_v44 = vmul.f32 %v3241_v61, %v3817_v47 }
 0x578   :  { %v1747_v45 = vpack.c.bf16 %v1739_v44, %v1739_v44 }
 0x57a   :  { %3108 = vmatmul.mubr.msk.bf16.vlgmr.msra.gmra.mxu0 %vm753_vm3, %v1747_v45 }
 0x57b   :  { %3118 = vmatpush3.bf16.msra.mxu0 %v1860_v54  ;;  %3119 = vmatprep.mubr.msk.bf16.mxu0 %vm3299_vm1, %v3298_v20 }
 0x57c   :  { %3129 = vmatprep.subr.bf16.mxu0 %v3298_v20 }
 0x57d   :  { %v3243_v34 = vpop.eup %3242 }
 0x57e   :  { %v1741_v55 = vmul.f32 %v3243_v34, %v3821_v17 }
 0x580   :  { %v1749_v56 = vpack.c.bf16 %v1741_v55, %v1741_v55 }
 0x582   :  { %3120 = vmatmul.mubr.msk.bf16.vlgmr.msra.gmra.mxu0 %vm753_vm3, %v1749_v56  ;;  %v3302_v56 = vmov 0  }
 0x583   :  { %3131 = vmatprep.mubr.msk.bf16.mxu0 %vm3299_vm1, %v3298_v20  ;;  %3185 = vset.pattern.permute.xlu1 %v3302_v56 }
 0x584   :  { %3184 = vset.pattern.permute.xlu0 %v3302_v56 }
 0x58c   :  { %v1712_v23 = vpop.xlane.xlu0 %1711 }
 0x58d   :  { %3244 = vrcp.f32 %v1712_v23  ;;  %v2298_v23 = vld [vmem:[%s4156_s2] sm:$0xff] }
 0x594   :  { %v1718_v11 = vpop.xlane.xlu0 %1717 }
 0x595   :  { %3246 = vrcp.f32 %v1718_v11 }
 0x598   :  { %v1953_v0 = vpop.permute.xlu0 %1952 }
 0x599   :  { %v1958_v1 = vsel %vm853_vm4, %v1953_v0, 0  ;;  %v2301_v0 = vld [vmem:[%s4156_s2 + $0x18] sm:$0xff] }
 0x59a   :  { %v3245_v58 = vpop.eup %3244  ;;  %3130 = vmatpush3.bf16.msra.mxu0 %v1958_v1  ;;  %v2299_v1 = vld [vmem:[%s4156_s2 + $0x8] sm:$0xff] }
 0x59b   :  { %v1740_v2 = vmul.f32 %v3245_v58, %v3827_v49  ;;  %3141 = vmatprep.subr.bf16.mxu0 %v3298_v20 }
 0x59d   :  { %v1748_v3 = vpack.c.bf16 %v1740_v2, %v1740_v2 }
 0x59f   :  { %3114 = vmatmul.mubr.msk.bf16.vlgmr.msra.gmra.mxu1 %vm753_vm3, %v1748_v3  ;;  %v2303_v3 = vld [vmem:[%s4156_s2 + $0x28] sm:$0xff] }
 0x5a0   :  { %3124 = vmatpush3.bf16.msra.mxu1 %v1909_v10  ;;  %3125 = vmatprep.mubr.msk.bf16.mxu1 %vm3299_vm1, %v3298_v20 }
 0x5a1   :  { %3135 = vmatprep.subr.bf16.mxu1 %v3298_v20 }
 0x5a2   :  { %v3247_v36 = vpop.eup %3246 }
 0x5a3   :  { %v1742_v15 = vmul.f32 %v3247_v36, %v3833_v33 }
 0x5a4   :  { %v1721_v37 = vpop.xlane.xlu1 %1720 }
 0x5a5   :  { %3248 = vrcp.f32 %v1721_v37  ;;  %v1750_v53 = vpack.c.bf16 %v1742_v15, %v1742_v15  ;;  %v2305_v37 = vld [vmem:[%s4156_s2 + $0x38] sm:$0xff]  ;;  %v2302_v15 = vld [vmem:[%s4156_s2 + $0x20] sm:$0xff] }
 0x5a7   :  { %3126 = vmatmul.mubr.msk.bf16.vlgmr.msra.gmra.mxu1 %vm753_vm3, %v1750_v53  ;;  %v2304_v53 = vld [vmem:[%s4156_s2 + $0x30] sm:$0xff] }
 0x5a8   :  { %3136 = vmatpush3.bf16.msra.mxu1 %v2007_v16  ;;  %3137 = vmatprep.mubr.msk.bf16.mxu1 %vm3299_vm1, %v3298_v20  ;;  %v1727_v41 = vpop.xlane.xlu1 %1726 }
 0x5a9   :  { %3147 = vmatprep.subr.bf16.mxu1 %v3298_v20  ;;  %3250 = vrcp.f32 %v1727_v41 }
 0x5ac   :  { %v2100_v49 = vpop.permute.xlu1 %2099 }
 0x5ad   :  { %v2105_v60 = vsel %vm853_vm4, %v2100_v49, 0 }
 0x5b2   :  { %v3249_v39 = vpop.eup %3248 }
 0x5b3   :  { %v1743_v43 = vmul.f32 %v3249_v39, %v3839_v6 }
 0x5b5   :  { %v1751_v47 = vpack.c.bf16 %v1743_v43, %v1743_v43 }
 0x5b6   :  { %v3251_v13 = vpop.eup %3250 }
 0x5b7   :  { %3132 = vmatmul.mubr.msk.bf16.vlgmr.msra.gmra.mxu0 %vm753_vm3, %v1751_v47  ;;  %v1745_v9 = vmul.f32 %v3251_v13, %v3843_v25 }
 0x5b8   :  { %3143 = vmatprep.mubr.msk.bf16.mxu0 %vm3299_vm1, %v3298_v20 }
 0x5b9   :  { %v1753_v50 = vpack.c.bf16 %v1745_v9, %v1745_v9 }
 0x5c9   :  { %v1724_v17 = vpop.xlane.xlu0 %1723 }
 0x5ca   :  { %3252 = vrcp.f32 %v1724_v17 }
 0x5cd   :  { %v1730_v8 = vpop.xlane.xlu0 %1729 }
 0x5ce   :  { %3254 = vrcp.f32 %v1730_v8 }
 0x5d1   :  { %v2051_v27 = vpop.permute.xlu0 %2050 }
 0x5d2   :  { %v2056_v14 = vsel %vm853_vm4, %v2051_v27, 0 }
 0x5d3   :  { %3142 = vmatpush3.bf16.msra.mxu0 %v2056_v14 }
 0x5d6   :  { %3144 = vmatmul.mubr.msk.bf16.vlgmr.msra.gmra.mxu0 %vm753_vm3, %v1753_v50 }
 0x5d7   :  { %v3253_v51 = vpop.eup %3252 }
 0x5d8   :  { %v1744_v52 = vmul.f32 %v3253_v51, %v3853_v26 }
 0x5da   :  { %v1752_v32 = vpack.c.bf16 %v1744_v52, %v1744_v52 }
 0x5db   :  { %v3255_v59 = vpop.eup %3254 }
 0x5dc   :  { %3138 = vmatmul.mubr.msk.bf16.vlgmr.msra.gmra.mxu1 %vm753_vm3, %v1752_v32  ;;  %v1746_v57 = vmul.f32 %v3255_v59, %v3857_v31 }
 0x5dd   :  { %3148 = vmatpush3.bf16.msra.mxu1 %v2105_v60  ;;  %3149 = vmatprep.mubr.msk.bf16.mxu1 %vm3299_vm1, %v3298_v20  ;;  %v3188_v20 = vld [vmem:[%s4155_s5 + $0x8] sm:$0xff]  }
 0x5de   :  { %v1754_v24 = vpack.c.bf16 %v1746_v57, %v1746_v57  ;;  %3153 = vmatprep.subr.bf16.mxu0 %v3188_v20 }
 0x5df   :  { %3154 = vmatpush3.bf16.msra.mxu0 %v3188_v20 }
 0x5e0   :  { %3155 = vmatprep.subr.bf16.mxu0 %v3189_v12 }
 0x5e3   :  { %3156 = vmatpush3.bf16.msra.mxu0 %v3189_v12 }
 0x5e4   :  { %3150 = vmatmul.mubr.msk.bf16.vlgmr.msra.gmra.mxu1 %vm753_vm3, %v1754_v24 }
 0x63a   :  { %v1798_v48 = vpop.f32.mrf.mxu0 }
 0x63b   :  { %2155 = vrot.lane.b32.xlu0 %v1798_v48, %s3301_s15 }
 0x63c   :  { %v3109_v19 = vpop.f32.mrf.mxu0 }
 0x63e   :  { %v1801_v22 = vpop.f32.mrf.mxu0 }
 0x63f   :  { %v2809_v22 = vld [vmem:[%s4157_s6] ss:$0 sm:$0xff] }
 0x640   :  { %v3110_v33 = vpop.f32.mrf.mxu0 }
 0x642   :  { %v1896_v4 = vpop.f32.mrf.mxu0 }
 0x643   :  { %2159 = vrot.lane.b32.xlu0 %v1896_v4, %s3301_s15 }
 0x644   :  { %v3121_v46 = vpop.f32.mrf.mxu0 }
 0x646   :  { %v1899_v7 = vpop.f32.mrf.mxu0 }
 0x648   :  { %v3122_v6 = vpop.f32.mrf.mxu0 }
 0x65f   :  { %v1847_v25 = vpop.f32.mrf.mxu1 }
 0x660   :  { %2157 = vrot.lane.b32.xlu1 %v1847_v25, %s3301_s15 }
 0x661   :  { %v3115_v29 = vpop.f32.mrf.mxu1 }
 0x663   :  { %v1850_v30 = vpop.f32.mrf.mxu1 }
 0x665   :  { %v3116_v28 = vpop.f32.mrf.mxu1 }
 0x667   :  { %v1945_v18 = vpop.f32.mrf.mxu1 }
 0x668   :  { %2161 = vrot.lane.b32.xlu1 %v1945_v18, %s3301_s15  ;;  %v3288_v18 = vld [vmem:[%s4152_s0] sm:$0xff] }
 0x669   :  { %v3127_v35 = vpop.f32.mrf.mxu1 }
 0x66b   :  { %v1948_v26 = vpop.f32.mrf.mxu1 }
 0x66d   :  { %v3128_v5 = vpop.f32.mrf.mxu1 }
 0x677   :  { %v1994_v31 = vpop.f32.mrf.mxu0 }
 0x678   :  { %2163 = vrot.lane.b32.xlu0 %v1994_v31, %s3301_s15 }
 0x679   :  { %v3133_v63 = vpop.f32.mrf.mxu0 }
 0x67a   :  { %v3289_v63 = vld [vmem:[%s4152_s0 + $0x18] sm:$0xff] }
 0x67b   :  { %v1997_v40 = vpop.f32.mrf.mxu0 }
 0x67d   :  { %v3134_v21 = vpop.f32.mrf.mxu0 }
 0x67e   :  { %v3290_v21 = vld [vmem:[%s4152_s0 + $0x8] sm:$0xff] }
 0x696   :  { %v2092_v38 = vpop.f32.mrf.mxu0 }
 0x697   :  { %2167 = vrot.lane.b32.xlu0 %v2092_v38, %s3301_s15 }
 0x698   :  { %v3145_v42 = vpop.f32.mrf.mxu0 }
 0x69a   :  { %v2095_v61 = vpop.f32.mrf.mxu0 }
 0x69b   :  { %2308 = vperm.xlu0 %3184, %v2298_v23  }
 0x69c   :  { %v2043_v44 = vpop.f32.mrf.mxu1  ;;  %v3146_v45 = vpop.f32.mrf.mxu0 }
 0x69d   :  { %2165 = vrot.lane.b32.xlu1 %v2043_v44, %s3301_s15  ;;  %v3291_v44 = vld [vmem:[%s4152_s0 + $0x10] sm:$0xff] }
 0x69e   :  { %v3139_v54 = vpop.f32.mrf.mxu1 }
 0x69f   :  { %2323 = vperm.xlu0 %3184, %v2301_v0  }
 0x6a0   :  { %v2046_v34 = vpop.f32.mrf.mxu1 }
 0x6a2   :  { %v3140_v55 = vpop.f32.mrf.mxu1 }
 0x6a3   :  { %2333 = vperm.xlu0 %3184, %v2303_v3  }
 0x6a4   :  { %v2141_v11 = vpop.f32.mrf.mxu1 }
 0x6a5   :  { %2169 = vrot.lane.b32.xlu1 %v2141_v11, %s3301_s15 }
 0x6a6   :  { %v3151_v58 = vpop.f32.mrf.mxu1 }
 0x6a7   :  { %2343 = vperm.xlu0 %3184, %v2305_v37   ;;  %v3292_v37 = vld [vmem:[%s4152_s0 + $0x20] sm:$0xff] }
 0x6a8   :  { %v2144_v2 = vpop.f32.mrf.mxu1 }
 0x6a9   :  { %2313 = vperm.xlu1 %3185, %v2299_v1  }
 0x6aa   :  { %v3152_v10 = vpop.f32.mrf.mxu1 }
 0x6ad   :  { %v2156_v36 = vpop.permute.xlu0 %2155  ;;  %2318 = vperm.xlu1 %3185, %v2300_v62  }
 0x6ae   :  { %2180 = vst.msk [vmem:[#allocation2] sm:$0xff] %vm2179_vm5, %v2156_v36 }
 0x6b1   :  { %2328 = vperm.xlu1 %3185, %v2302_v15  }
 0x6b5   :  { %v2160_v16 = vpop.permute.xlu0 %2159  ;;  %2338 = vperm.xlu1 %3185, %v2304_v53   ;;  %v2188_v43 = vld [vmem:[#allocation2] sm:$0xff] }
 0x6b6   :  { %2182 = vst.msk [vmem:[#allocation2 + $0x10] sm:$0xff] %vm2179_vm5, %v2160_v16 }
 0x6bd   :  { %v2190_v13 = vld [vmem:[#allocation2 + $0x10] sm:$0xff] }
 0x6d2   :  { %v2158_v39 = vpop.permute.xlu1 %2157 }
 0x6d3   :  { %2181 = vst.msk [vmem:[#allocation2 + $0x8] sm:$0xff] %vm2179_vm5, %v2158_v39 }
 0x6da   :  { %v2189_v47 = vld [vmem:[#allocation2 + $0x8] sm:$0xff]  ;;  %v2162_v41 = vpop.permute.xlu1 %2161 }
 0x6db   :  { %v2196_v17 = vpack.c.bf16 %v2189_v47, %v2188_v43  ;;  %2183 = vst.msk [vmem:[#allocation2 + $0x18] sm:$0xff] %vm2179_vm5, %v2162_v41  ;;  %v3293_v47 = vld [vmem:[%s4152_s0 + $0x30] sm:$0xff] }
 0x6dd   :  { %3157 = vmatprep.mubr.msk.bf16.mxu0 %vm62_vm0, %v2196_v17  ;;  %v3294_v17 = vld [vmem:[%s4152_s0 + $0x28] sm:$0xff] }
 0x6e2   :  { %v2191_v8 = vld [vmem:[#allocation2 + $0x18] sm:$0xff] }
 0x6e3   :  { %v2197_v9 = vpack.c.bf16 %v2191_v8, %v2190_v13 }
 0x6e5   :  { %3158 = vmatmul.mubr.msk.bf16.vlgmr.msra.gmra.mxu0 %vm62_vm0, %v2197_v9 }
 0x6ea   :  { %v2164_v27 = vpop.permute.xlu0 %2163 }
 0x6eb   :  { %2184 = vst.msk [vmem:[#allocation2 + $0x20] sm:$0xff] %vm2179_vm5, %v2164_v27  ;;  %v3295_v27 = vld [vmem:[%s4152_s0 + $0x38] sm:$0xff] }
 0x6f2   :  { %v2192_v52 = vld [vmem:[#allocation2 + $0x20] sm:$0xff] }
 0x709   :  { %v2168_v14 = vpop.permute.xlu0 %2167 }
 0x70a   :  { %2186 = vst.msk [vmem:[#allocation2 + $0x30] sm:$0xff] %vm2179_vm5, %v2168_v14 }
 0x70f   :  { %v2166_v50 = vpop.permute.xlu1 %2165 }
 0x710   :  { %2185 = vst.msk [vmem:[#allocation2 + $0x28] sm:$0xff] %vm2179_vm5, %v2166_v50 }
 0x711   :  { %v2194_v59 = vld [vmem:[#allocation2 + $0x30] sm:$0xff] }
 0x716   :  { %v2309_v24 = vpop.permute.xlu0 %2308 }
 0x717   :  { %v2170_v51 = vpop.permute.xlu1 %2169  ;;  %v2193_v49 = vld [vmem:[#allocation2 + $0x28] sm:$0xff] }
 0x718   :  { %2187 = vst.msk [vmem:[#allocation2 + $0x38] sm:$0xff] %vm2179_vm5, %v2170_v51  ;;  %v2198_v32 = vpack.c.bf16 %v2193_v49, %v2192_v52 }
 0x71a   :  { %3161 = vmatprep.mubr.msk.bf16.mxu0 %vm62_vm0, %v2198_v32  ;;  %v2324_v7 = vpop.permute.xlu0 %2323 }
 0x71e   :  { %v2334_v23 = vpop.permute.xlu0 %2333 }
 0x71f   :  { %v2195_v60 = vld [vmem:[#allocation2 + $0x38] sm:$0xff] }
 0x720   :  { %v2199_v57 = vpack.c.bf16 %v2195_v60, %v2194_v59 }
 0x722   :  { %3162 = vmatmul.mubr.msk.bf16.gmra.mxu0 %vm62_vm0, %v2199_v57  ;;  %v2344_v53 = vpop.permute.xlu0 %2343 }
 0x724   :  { %v2314_v48 = vpop.permute.xlu1 %2313 }
 0x728   :  { %v2319_v25 = vpop.permute.xlu1 %2318 }
 0x72c   :  { %v2329_v34 = vpop.permute.xlu1 %2328 }
 0x730   :  { %v2339_v58 = vpop.permute.xlu1 %2338 }
 0x7a5   :  { %v3159_v19 = vpop.f32.mrf.mxu0 }
 0x7a6   :  { %v2276_v6 = vadd.f32 %v3159_v19, %v2809_v22 }
 0x7a7   :  { %v2267_v33 = vpop.f32.mrf.mxu0 }
 0x7a8   :  { %v2268_v4 = vadd.f32 %v2809_v22, %v2267_v33  ;;  %v2348_v26 = vmul.f32 %v2319_v25, %v2276_v6 }
 0x7a9   :  { %v3160_v46 = vpop.f32.mrf.mxu0 }
 0x7aa   :  { %v2346_v20 = vmul.f32 %v2309_v24, %v2268_v4  ;;  %v2279_v12 = vadd.f32 %v3160_v46, %v2809_v22  ;;  %v2356_v45 = vadd.f32 %v3291_v44, %v2348_v26 }
 0x7ab   :  { %v2270_v29 = vpop.f32.mrf.mxu0 }
 0x7ac   :  { %v2349_v30 = vmul.f32 %v2324_v7, %v2279_v12  ;;  %v2271_v28 = vadd.f32 %v2809_v22, %v2270_v29  ;;  %v2354_v35 = vadd.f32 %v3288_v18, %v2346_v20  ;;  %v2370_v54 = vsel %vm62_vm0, %v2356_v45, 0.0 }
 0x7ae   :  { %v2347_v5 = vmul.f32 %v2314_v48, %v2271_v28  ;;  %v2364_v31 = vsel %vm62_vm0, %v2354_v35, 0.0  ;;  %v2357_v40 = vadd.f32 %v3289_v63, %v2349_v30  ;;  %v3190_v30 = vld [vmem:[%s4155_s5 + $0x18] sm:$0xff]   ;;  %v3191_v28 = vld [vmem:[%s4155_s5 + $0x10] sm:$0xff]  }
 0x7af   :  { %2365 = vadd.xlane.f32.xlu1 %v2364_v31  ;;  %3165 = vmatprep.subr.bf16.mxu1 %v3190_v30 }
 0x7b0   :  { %v2355_v38 = vadd.f32 %v3290_v21, %v2347_v5  ;;  %v2373_v42 = vsel %vm62_vm0, %v2357_v40, 0.0  ;;  %3166 = vmatpush3.bf16.msra.mxu1 %v3190_v30 }
 0x7b1   :  { %3167 = vmatprep.subr.bf16.mxu1 %v3191_v28 }
 0x7b2   :  { %v2367_v61 = vsel %vm62_vm0, %v2355_v38, 0.0 }
 0x7b3   :  { %2374 = vadd.xlane.f32.xlu1 %v2373_v42  ;;  %2368 = vadd.xlane.f32.xlu0 %v2367_v61 }
 0x7b4   :  { %3168 = vmatpush3.bf16.msra.mxu1 %v3191_v28 }
 0x7b7   :  { %2371 = vadd.xlane.f32.xlu0 %v2370_v54 }
 0x7e2   :  { %v3163_v55 = vpop.f32.mrf.mxu0 }
 0x7e3   :  { %v2292_v56 = vadd.f32 %v3163_v55, %v2809_v22 }
 0x7e4   :  { %v2283_v11 = vpop.f32.mrf.mxu0 }
 0x7e5   :  { %v2284_v0 = vadd.f32 %v2809_v22, %v2283_v11  ;;  %v2352_v3 = vmul.f32 %v2339_v58, %v2292_v56 }
 0x7e6   :  { %v3164_v1 = vpop.f32.mrf.mxu0 }
 0x7e7   :  { %v2350_v2 = vmul.f32 %v2329_v34, %v2284_v0  ;;  %v2295_v10 = vadd.f32 %v3164_v1, %v2809_v22  ;;  %v2360_v41 = vadd.f32 %v3293_v47, %v2352_v3 }
 0x7e8   :  { %v2286_v62 = vpop.f32.mrf.mxu0 }
 0x7e9   :  { %v2287_v36 = vadd.f32 %v2809_v22, %v2286_v62  ;;  %v2358_v15 = vadd.f32 %v3292_v37, %v2350_v2  ;;  %v2353_v16 = vmul.f32 %v2344_v53, %v2295_v10  ;;  %v2382_v9 = vsel %vm62_vm0, %v2360_v41, 0.0 }
 0x7eb   :  { %v2351_v39 = vmul.f32 %v2334_v23, %v2287_v36  ;;  %v2376_v43 = vsel %vm62_vm0, %v2358_v15, 0.0  ;;  %v2361_v14 = vadd.f32 %v3295_v27, %v2353_v16 }
 0x7ec   :  { %2377 = vadd.xlane.f32.xlu0 %v2376_v43 }
 0x7ed   :  { %v2359_v13 = vadd.f32 %v3294_v17, %v2351_v39  ;;  %v2385_v50 = vsel %vm62_vm0, %v2361_v14, 0.0 }
 0x7ef   :  { %v2379_v8 = vsel %vm62_vm0, %v2359_v13, 0.0 }
 0x7f0   :  { %2380 = vadd.xlane.f32.xlu1 %v2379_v8  ;;  %2383 = vadd.xlane.f32.xlu0 %v2382_v9  ;;  %v2817_v9 = vld [vmem:[%s4157_s6 + $0x3] ss:$0 sm:$0xff] }
 0x7f4   :  { %2386 = vadd.xlane.f32.xlu1 %v2385_v50 }
 0x838   :  { %v2366_v51 = vpop.xlane.xlu1 %2365 }
 0x839   :  { %v2389_v52 = vmul.f32 0.03125, %v2366_v51 }
 0x83b   :  { %v3986_v49 = vsub.f32 %v2354_v35, %v2389_v52 }
 0x83c   :  { %v2369_v32 = vpop.xlane.xlu0 %2368  ;;  %v2375_v59 = vpop.xlane.xlu1 %2374 }
 0x83d   :  { %v2390_v60 = vmul.f32 0.03125, %v2369_v32  ;;  %v2392_v57 = vmul.f32 0.03125, %v2375_v59  ;;  %v2405_v24 = vmul.f32 %v3986_v49, %v3986_v49 }
 0x83f   :  { %v3990_v48 = vsub.f32 %v2355_v38, %v2390_v60  ;;  %v3992_v19 = vsub.f32 %v2357_v40, %v2392_v57  ;;  %v2413_v22 = vsel %vm62_vm0, %v2405_v24, 0.0 }
 0x840   :  { %v2372_v33 = vpop.xlane.xlu0 %2371  ;;  %2414 = vadd.xlane.f32.xlu0 %v2413_v22 }
 0x841   :  { %v2391_v4 = vmul.f32 0.03125, %v2372_v33  ;;  %v2406_v46 = vmul.f32 %v3990_v48, %v3990_v48  ;;  %v2408_v20 = vmul.f32 %v3992_v19, %v3992_v19 }
 0x843   :  { %v3997_v7 = vsub.f32 %v2356_v45, %v2391_v4  ;;  %v2416_v6 = vsel %vm62_vm0, %v2406_v46, 0.0  ;;  %v2422_v29 = vsel %vm62_vm0, %v2408_v20, 0.0 }
 0x844   :  { %2417 = vadd.xlane.f32.xlu1 %v2416_v6 }
 0x845   :  { %v2407_v12 = vmul.f32 %v3997_v7, %v3997_v7 }
 0x847   :  { %v2419_v25 = vsel %vm62_vm0, %v2407_v12, 0.0 }
 0x848   :  { %2420 = vadd.xlane.f32.xlu0 %v2419_v25  ;;  %2423 = vadd.xlane.f32.xlu1 %v2422_v29 }
 0x875   :  { %v2378_v18 = vpop.xlane.xlu0 %2377 }
 0x876   :  { %v2393_v35 = vmul.f32 0.03125, %v2378_v18 }
 0x878   :  { %v4012_v26 = vsub.f32 %v2358_v15, %v2393_v35 }
 0x879   :  { %v2384_v5 = vpop.xlane.xlu0 %2383  ;;  %v2381_v31 = vpop.xlane.xlu1 %2380 }
 0x87a   :  { %v2395_v63 = vmul.f32 0.03125, %v2384_v5  ;;  %v2394_v40 = vmul.f32 0.03125, %v2381_v31  ;;  %v2409_v21 = vmul.f32 %v4012_v26, %v4012_v26 }
 0x87c   :  { %v4016_v38 = vsub.f32 %v2360_v41, %v2395_v63  ;;  %v4018_v42 = vsub.f32 %v2359_v13, %v2394_v40  ;;  %v2425_v61 = vsel %vm62_vm0, %v2409_v21, 0.0  ;;  %v2816_v41 = vld [vmem:[%s4157_s6 + $0x2] ss:$0 sm:$0xff] }
 0x87d   :  { %2426 = vadd.xlane.f32.xlu0 %v2425_v61  ;;  %v2387_v44 = vpop.xlane.xlu1 %2386 }
 0x87e   :  { %v2396_v45 = vmul.f32 0.03125, %v2387_v44  ;;  %v2411_v54 = vmul.f32 %v4016_v38, %v4016_v38  ;;  %v2410_v34 = vmul.f32 %v4018_v42, %v4018_v42 }
 0x880   :  { %v4025_v55 = vsub.f32 %v2361_v14, %v2396_v45  ;;  %v2431_v56 = vsel %vm62_vm0, %v2411_v54, 0.0  ;;  %v2428_v23 = vsel %vm62_vm0, %v2410_v34, 0.0 }
 0x881   :  { %2432 = vadd.xlane.f32.xlu0 %v2431_v56  ;;  %2429 = vadd.xlane.f32.xlu1 %v2428_v23 }
 0x882   :  { %v2412_v11 = vmul.f32 %v4025_v55, %v4025_v55 }
 0x884   :  { %v2434_v0 = vsel %vm62_vm0, %v2412_v11, 0.0 }
 0x885   :  { %2435 = vadd.xlane.f32.xlu1 %v2434_v0 }
 0x8c9   :  { %v2415_v58 = vpop.xlane.xlu0 %2414 }
 0x8ca   :  { %v2437_v1 = vmul.f32 0.03125, %v2415_v58 }
 0x8cc   :  { %v2445_v2 = vadd.f32 1e-05, %v2437_v1 }
 0x8cd   :  { %v2418_v3 = vpop.xlane.xlu1 %2417 }
 0x8ce   :  { %3256 = vrsqrt.f32 %v2445_v2  ;;  %v2438_v10 = vmul.f32 0.03125, %v2418_v3 }
 0x8d0   :  { %v2446_v62 = vadd.f32 1e-05, %v2438_v10 }
 0x8d1   :  { %v2421_v36 = vpop.xlane.xlu0 %2420  ;;  %v2424_v37 = vpop.xlane.xlu1 %2423 }
 0x8d2   :  { %3258 = vrsqrt.f32 %v2446_v62  ;;  %v2439_v15 = vmul.f32 0.03125, %v2421_v36  ;;  %v2440_v53 = vmul.f32 0.03125, %v2424_v37 }
 0x8d4   :  { %v2447_v16 = vadd.f32 1e-05, %v2439_v15  ;;  %v2448_v39 = vadd.f32 1e-05, %v2440_v53 }
 0x8d6   :  { %3260 = vrsqrt.f32 %v2447_v16 }
 0x8d7   :  { %3262 = vrsqrt.f32 %v2448_v39 }
 0x8db   :  { %v3257_v43 = vpop.eup %3256 }
 0x8dc   :  { %v2461_v47 = vmul.f32 %v3257_v43, %v3986_v49 }
 0x8de   :  { %v2473_v8 = vmul.f32 %v2816_v41, %v2461_v47 }
 0x8df   :  { %v3259_v17 = vpop.eup %3258 }
 0x8e0   :  { %v2462_v13 = vmul.f32 %v3259_v17, %v3990_v48  ;;  %v2485_v52 = vadd.f32 %v2817_v9, %v2473_v8 }
 0x8e2   :  { %v2474_v27 = vmul.f32 %v2816_v41, %v2462_v13 }
 0x8e3   :  { %v3261_v14 = vpop.eup %3260 }
 0x8e4   :  { %v3263_v50 = vpop.eup %3262  ;;  %v2463_v51 = vmul.f32 %v3261_v14, %v3997_v7  ;;  %v4041_v32 = vadd.f32 %v2817_v9, %v2474_v27 }
 0x8e5   :  { %v2464_v49 = vmul.f32 %v3263_v50, %v3992_v19 }
 0x8e6   :  { %v2493_v59 = vpack.c.bf16 %v4041_v32, %v2485_v52  ;;  %v2475_v60 = vmul.f32 %v2816_v41, %v2463_v51 }
 0x8e7   :  { %v2476_v57 = vmul.f32 %v2816_v41, %v2464_v49 }
 0x8e8   :  { %3169 = vmatprep.mubr.msk.bf16.mxu1 %vm62_vm0, %v2493_v59  ;;  %v2487_v24 = vadd.f32 %v2817_v9, %v2475_v60 }
 0x8e9   :  { %v2488_v48 = vadd.f32 %v2817_v9, %v2476_v57 }
 0x8eb   :  { %v2494_v22 = vpack.c.bf16 %v2488_v48, %v2487_v24 }
 0x8ed   :  { %3170 = vmatmul.mubr.msk.bf16.vlgmr.msra.gmra.mxu1 %vm62_vm0, %v2494_v22 }
 0x906   :  { %v2427_v33 = vpop.xlane.xlu0 %2426 }
 0x907   :  { %v2441_v4 = vmul.f32 0.03125, %v2427_v33 }
 0x909   :  { %v2449_v46 = vadd.f32 1e-05, %v2441_v4 }
 0x90a   :  { %v2433_v7 = vpop.xlane.xlu0 %2432  ;;  %v2430_v6 = vpop.xlane.xlu1 %2429 }
 0x90b   :  { %3264 = vrsqrt.f32 %v2449_v46  ;;  %v2443_v20 = vmul.f32 0.03125, %v2433_v7  ;;  %v2442_v12 = vmul.f32 0.03125, %v2430_v6 }
 0x90d   :  { %v2451_v19 = vadd.f32 1e-05, %v2443_v20  ;;  %v2450_v25 = vadd.f32 1e-05, %v2442_v12 }
 0x90e   :  { %v2436_v29 = vpop.xlane.xlu1 %2435 }
 0x90f   :  { %3266 = vrsqrt.f32 %v2451_v19  ;;  %v2444_v30 = vmul.f32 0.03125, %v2436_v29 }
 0x910   :  { %3268 = vrsqrt.f32 %v2450_v25 }
 0x911   :  { %v2452_v28 = vadd.f32 1e-05, %v2444_v30 }
 0x913   :  { %3270 = vrsqrt.f32 %v2452_v28 }
 0x918   :  { %v3265_v18 = vpop.eup %3264 }
 0x919   :  { %v2465_v35 = vmul.f32 %v3265_v18, %v4012_v26 }
 0x91b   :  { %v2477_v21 = vmul.f32 %v2816_v41, %v2465_v35 }
 0x91c   :  { %v3267_v5 = vpop.eup %3266 }
 0x91d   :  { %v3269_v31 = vpop.eup %3268  ;;  %v2467_v63 = vmul.f32 %v3267_v5, %v4016_v38  ;;  %v2489_v34 = vadd.f32 %v2817_v9, %v2477_v21  ;;  %v2822_v38 = vld [vmem:[%s4157_s6 + $0x1] ss:$0 sm:$0xff] }
 0x91e   :  { %v2466_v40 = vmul.f32 %v3269_v31, %v4018_v42 }
 0x91f   :  { %v2479_v54 = vmul.f32 %v2816_v41, %v2467_v63 }
 0x920   :  { %v3271_v61 = vpop.eup %3270  ;;  %v2478_v44 = vmul.f32 %v2816_v41, %v2466_v40 }
 0x921   :  { %v2468_v45 = vmul.f32 %v3271_v61, %v4025_v55  ;;  %v2491_v0 = vadd.f32 %v2817_v9, %v2479_v54 }
 0x922   :  { %v2490_v56 = vadd.f32 %v2817_v9, %v2478_v44 }
 0x923   :  { %v2480_v23 = vmul.f32 %v2816_v41, %v2468_v45 }
 0x924   :  { %v2495_v11 = vpack.c.bf16 %v2490_v56, %v2489_v34 }
 0x925   :  { %v2492_v58 = vadd.f32 %v2817_v9, %v2480_v23 }
 0x926   :  { %3173 = vmatprep.mubr.msk.bf16.mxu1 %vm62_vm0, %v2495_v11 }
 0x927   :  { %v2496_v26 = vpack.c.bf16 %v2492_v58, %v2491_v0 }
 0x929   :  { %3174 = vmatmul.mubr.msk.bf16.gmra.mxu1 %vm62_vm0, %v2496_v26 }
 0x9ad   :  { %v3171_v42 = vpop.f32.mrf.mxu1 }
 0x9ae   :  { %v2574_v1 = vadd.f32 %v3171_v42, %v2822_v38 }
 0x9af   :  { %v2565_v2 = vpop.f32.mrf.mxu1 }
 0x9b0   :  { %v2598_v55 = vmax.f32 %v2574_v1, 0.0  ;;  %v2566_v3 = vadd.f32 %v2822_v38, %v2565_v2 }
 0x9b1   :  { %v3172_v10 = vpop.f32.mrf.mxu1 }
 0x9b2   :  { %v2596_v62 = vmax.f32 %v2566_v3, 0.0  ;;  %v2577_v36 = vadd.f32 %v3172_v10, %v2822_v38  ;;  %v2606_v37 = vadd.f32 %v2598_v55, %v2487_v24 }
 0x9b3   :  { %v2568_v15 = vpop.f32.mrf.mxu1 }
 0x9b4   :  { %v2599_v53 = vmax.f32 %v2577_v36, 0.0  ;;  %v2569_v16 = vadd.f32 %v2822_v38, %v2568_v15  ;;  %v2620_v39 = vsel %vm62_vm0, %v2606_v37, 0.0  ;;  %v2604_v43 = vadd.f32 %v2596_v62, %v2485_v52 }
 0x9b5   :  { %2621 = vadd.xlane.f32.xlu0 %v2620_v39 }
 0x9b6   :  { %v2597_v47 = vmax.f32 %v2569_v16, 0.0  ;;  %v2607_v41 = vadd.f32 %v2599_v53, %v2488_v48  ;;  %v2614_v13 = vsel %vm62_vm0, %v2604_v43, 0.0 }
 0x9b8   :  { %v2623_v17 = vsel %vm62_vm0, %v2607_v41, 0.0  ;;  %v2605_v8 = vadd.f32 %v2597_v47, %v4041_v32 }
 0x9b9   :  { %2624 = vadd.xlane.f32.xlu1 %v2623_v17  ;;  %2615 = vadd.xlane.f32.xlu0 %v2614_v13 }
 0x9ba   :  { %v2617_v9 = vsel %vm62_vm0, %v2605_v8, 0.0 }
 0x9bd   :  { %2618 = vadd.xlane.f32.xlu1 %v2617_v9 }
 0x9e9   :  { %v3175_v27 = vpop.f32.mrf.mxu1 }
 0x9ea   :  { %v2590_v14 = vadd.f32 %v3175_v27, %v2822_v38 }
 0x9eb   :  { %v2581_v50 = vpop.f32.mrf.mxu1 }
 0x9ec   :  { %v2582_v51 = vadd.f32 %v2822_v38, %v2581_v50  ;;  %v2602_v52 = vmax.f32 %v2590_v14, 0.0 }
 0x9ed   :  { %v3176_v49 = vpop.f32.mrf.mxu1 }
 0x9ee   :  { %v2600_v59 = vmax.f32 %v2582_v51, 0.0  ;;  %v2593_v60 = vadd.f32 %v3176_v49, %v2822_v38  ;;  %v2610_v22 = vadd.f32 %v2602_v52, %v2491_v0 }
 0x9ef   :  { %v2584_v57 = vpop.f32.mrf.mxu1 }
 0x9f0   :  { %v2608_v24 = vadd.f32 %v2600_v59, %v2489_v34  ;;  %v2585_v48 = vadd.f32 %v2822_v38, %v2584_v57  ;;  %v2603_v33 = vmax.f32 %v2593_v60, 0.0  ;;  %v2632_v20 = vsel %vm62_vm0, %v2610_v22, 0.0 }
 0x9f2   :  { %v2601_v4 = vmax.f32 %v2585_v48, 0.0  ;;  %v2626_v32 = vsel %vm62_vm0, %v2608_v24, 0.0  ;;  %v2611_v7 = vadd.f32 %v2603_v33, %v2492_v58 }
 0x9f3   :  { %2627 = vadd.xlane.f32.xlu0 %v2626_v32 }
 0x9f4   :  { %v2609_v46 = vadd.f32 %v2601_v4, %v2490_v56  ;;  %v2635_v12 = vsel %vm62_vm0, %v2611_v7, 0.0 }
 0x9f6   :  { %v2629_v6 = vsel %vm62_vm0, %v2609_v46, 0.0 }
 0x9f7   :  { %2630 = vadd.xlane.f32.xlu1 %v2629_v6  ;;  %2633 = vadd.xlane.f32.xlu0 %v2632_v20 }
 0x9fb   :  { %2636 = vadd.xlane.f32.xlu1 %v2635_v12 }
 0xa3e   :  { %v2622_v19 = vpop.xlane.xlu0 %2621 }
 0xa3f   :  { %v2640_v25 = vmul.f32 0.03125, %v2622_v19 }
 0xa41   :  { %v4065_v29 = vsub.f32 %v2606_v37, %v2640_v25 }
 0xa42   :  { %v2625_v30 = vpop.xlane.xlu1 %2624  ;;  %v2616_v28 = vpop.xlane.xlu0 %2615 }
 0xa43   :  { %v2641_v18 = vmul.f32 0.03125, %v2625_v30  ;;  %v2638_v35 = vmul.f32 0.03125, %v2616_v28  ;;  %v2656_v5 = vmul.f32 %v4065_v29, %v4065_v29 }
 0xa45   :  { %v4069_v31 = vsub.f32 %v2607_v41, %v2641_v18  ;;  %v4071_v63 = vsub.f32 %v2604_v43, %v2638_v35  ;;  %v2668_v40 = vsel %vm62_vm0, %v2656_v5, 0.0 }
 0xa46   :  { %v2619_v21 = vpop.xlane.xlu1 %2618  ;;  %2669 = vadd.xlane.f32.xlu0 %v2668_v40 }
 0xa47   :  { %v2639_v61 = vmul.f32 0.03125, %v2619_v21  ;;  %v2657_v44 = vmul.f32 %v4069_v31, %v4069_v31  ;;  %v2654_v45 = vmul.f32 %v4071_v63, %v4071_v63 }
 0xa49   :  { %v4078_v54 = vsub.f32 %v2605_v8, %v2639_v61  ;;  %v2671_v34 = vsel %vm62_vm0, %v2657_v44, 0.0  ;;  %v2662_v56 = vsel %vm62_vm0, %v2654_v45, 0.0 }
 0xa4a   :  { %2672 = vadd.xlane.f32.xlu1 %v2671_v34  ;;  %2663 = vadd.xlane.f32.xlu0 %v2662_v56 }
 0xa4b   :  { %v2655_v23 = vmul.f32 %v4078_v54, %v4078_v54 }
 0xa4d   :  { %v2665_v11 = vsel %vm62_vm0, %v2655_v23, 0.0 }
 0xa4e   :  { %2666 = vadd.xlane.f32.xlu1 %v2665_v11 }
 0xa7c   :  { %v2628_v0 = vpop.xlane.xlu0 %2627 }
 0xa7d   :  { %v2642_v58 = vmul.f32 0.03125, %v2628_v0 }
 0xa7f   :  { %v4085_v26 = vsub.f32 %v2608_v24, %v2642_v58  ;;  %v2829_v24 = vld [vmem:[%s4157_s6 + $0x4] ss:$0 sm:$0xff] }
 0xa80   :  { %v2631_v38 = vpop.xlane.xlu1 %2630  ;;  %v2634_v42 = vpop.xlane.xlu0 %2633 }
 0xa81   :  { %v2643_v1 = vmul.f32 0.03125, %v2631_v38  ;;  %v2644_v2 = vmul.f32 0.03125, %v2634_v42  ;;  %v2658_v55 = vmul.f32 %v4085_v26, %v4085_v26 }
 0xa83   :  { %v4089_v3 = vsub.f32 %v2609_v46, %v2643_v1  ;;  %v4091_v10 = vsub.f32 %v2610_v22, %v2644_v2  ;;  %v2674_v62 = vsel %vm62_vm0, %v2658_v55, 0.0  ;;  %v2830_v22 = vld [vmem:[%s4157_s6 + $0x5] ss:$0 sm:$0xff] }
 0xa84   :  { %v2637_v36 = vpop.xlane.xlu1 %2636  ;;  %2675 = vadd.xlane.f32.xlu0 %v2674_v62 }
 0xa85   :  { %v2645_v37 = vmul.f32 0.03125, %v2637_v36  ;;  %v2659_v15 = vmul.f32 %v4089_v3, %v4089_v3  ;;  %v2660_v53 = vmul.f32 %v4091_v10, %v4091_v10 }
 0xa87   :  { %v4098_v16 = vsub.f32 %v2611_v7, %v2645_v37  ;;  %v2677_v39 = vsel %vm62_vm0, %v2659_v15, 0.0  ;;  %v2680_v43 = vsel %vm62_vm0, %v2660_v53, 0.0 }
 0xa88   :  { %2678 = vadd.xlane.f32.xlu1 %v2677_v39  ;;  %2681 = vadd.xlane.f32.xlu0 %v2680_v43 }
 0xa89   :  { %v2661_v47 = vmul.f32 %v4098_v16, %v4098_v16 }
 0xa8b   :  { %v2683_v41 = vsel %vm62_vm0, %v2661_v47, 0.0 }
 0xa8c   :  { %2684 = vadd.xlane.f32.xlu1 %v2683_v41 }
 0xacf   :  { %v2670_v17 = vpop.xlane.xlu0 %2669 }
 0xad0   :  { %v2688_v13 = vmul.f32 0.03125, %v2670_v17 }
 0xad2   :  { %v2696_v8 = vadd.f32 1e-05, %v2688_v13 }
 0xad3   :  { %v2673_v9 = vpop.xlane.xlu1 %2672  ;;  %v2664_v27 = vpop.xlane.xlu0 %2663 }
 0xad4   :  { %3272 = vrsqrt.f32 %v2696_v8  ;;  %v2689_v14 = vmul.f32 0.03125, %v2673_v9  ;;  %v2686_v50 = vmul.f32 0.03125, %v2664_v27 }
 0xad6   :  { %v2697_v51 = vadd.f32 1e-05, %v2689_v14  ;;  %v2694_v49 = vadd.f32 1e-05, %v2686_v50 }
 0xad7   :  { %v2667_v52 = vpop.xlane.xlu1 %2666 }
 0xad8   :  { %3274 = vrsqrt.f32 %v2697_v51  ;;  %v2687_v59 = vmul.f32 0.03125, %v2667_v52 }
 0xad9   :  { %3276 = vrsqrt.f32 %v2694_v49 }
 0xada   :  { %v2695_v60 = vadd.f32 1e-05, %v2687_v59 }
 0xadc   :  { %3278 = vrsqrt.f32 %v2695_v60 }
 0xae1   :  { %v3273_v57 = vpop.eup %3272 }
 0xae2   :  { %v2712_v48 = vmul.f32 %v3273_v57, %v4065_v29 }
 0xae4   :  { %v2724_v33 = vmul.f32 %v2829_v24, %v2712_v48 }
 0xae5   :  { %v3275_v4 = vpop.eup %3274 }
 0xae6   :  { %v3277_v32 = vpop.eup %3276  ;;  %v2736_v46 = vadd.f32 %v2830_v22, %v2724_v33  ;;  %v2713_v7 = vmul.f32 %v3275_v4, %v4069_v31 }
 0xae7   :  { %v2710_v6 = vmul.f32 %v3277_v32, %v4071_v63 }
 0xae8   :  { %2744 = vst.msk [vmem:[%s4158_s7 + $0x10] sm:$0xff] %vm62_vm0, %v2736_v46  ;;  %v2725_v20 = vmul.f32 %v2829_v24, %v2713_v7 }
 0xae9   :  { %v3279_v12 = vpop.eup %3278  ;;  %v2722_v19 = vmul.f32 %v2829_v24, %v2710_v6 }
 0xaea   :  { %v2737_v25 = vadd.f32 %v2830_v22, %v2725_v20  ;;  %v2711_v29 = vmul.f32 %v3279_v12, %v4078_v54 }
 0xaeb   :  { %v2734_v30 = vadd.f32 %v2830_v22, %v2722_v19 }
 0xaec   :  { %2745 = vst.msk [vmem:[%s4158_s7 + $0x18] sm:$0xff] %vm62_vm0, %v2737_v25  ;;  %v2723_v28 = vmul.f32 %v2829_v24, %v2711_v29 }
 0xaed   :  { %2742 = vst.msk [vmem:[%s4158_s7] sm:$0xff] %vm62_vm0, %v2734_v30 }
 0xaee   :  { %v2735_v18 = vadd.f32 %v2830_v22, %v2723_v28 }
 0xaf0   :  { %2743 = vst.msk [vmem:[%s4158_s7 + $0x8] sm:$0xff] %vm62_vm0, %v2735_v18 }
 0xb0d   :  { %v2676_v35 = vpop.xlane.xlu0 %2675 }
 0xb0e   :  { %v2690_v5 = vmul.f32 0.03125, %v2676_v35 }
 0xb10   :  { %v2698_v31 = vadd.f32 1e-05, %v2690_v5 }
 0xb11   :  { %v2679_v63 = vpop.xlane.xlu1 %2678  ;;  %v2682_v40 = vpop.xlane.xlu0 %2681 }
 0xb12   :  { %3280 = vrsqrt.f32 %v2698_v31  ;;  %v2691_v21 = vmul.f32 0.03125, %v2679_v63  ;;  %v2692_v61 = vmul.f32 0.03125, %v2682_v40 }
 0xb14   :  { %v2699_v44 = vadd.f32 1e-05, %v2691_v21  ;;  %v2700_v45 = vadd.f32 1e-05, %v2692_v61 }
 0xb15   :  { %v2685_v54 = vpop.xlane.xlu1 %2684 }
 0xb16   :  { %3282 = vrsqrt.f32 %v2699_v44  ;;  %v2693_v34 = vmul.f32 0.03125, %v2685_v54 }
 0xb17   :  { %3284 = vrsqrt.f32 %v2700_v45 }
 0xb18   :  { %v2701_v56 = vadd.f32 1e-05, %v2693_v34 }
 0xb1a   :  { %3286 = vrsqrt.f32 %v2701_v56 }
 0xb1f   :  { %v3281_v23 = vpop.eup %3280 }
 0xb20   :  { %v2714_v11 = vmul.f32 %v3281_v23, %v4085_v26 }
 0xb22   :  { %v2726_v0 = vmul.f32 %v2829_v24, %v2714_v11 }
 0xb23   :  { %v3283_v58 = vpop.eup %3282 }
 0xb24   :  { %v3285_v38 = vpop.eup %3284  ;;  %v2738_v42 = vadd.f32 %v2830_v22, %v2726_v0  ;;  %v2715_v1 = vmul.f32 %v3283_v58, %v4089_v3 }
 0xb25   :  { %v2716_v2 = vmul.f32 %v3285_v38, %v4091_v10 }
 0xb26   :  { %2746 = vst.msk [vmem:[%s4158_s7 + $0x20] sm:$0xff] %vm62_vm0, %v2738_v42  ;;  %v2727_v55 = vmul.f32 %v2829_v24, %v2715_v1 }
 0xb27   :  { %v3287_v62 = vpop.eup %3286  ;;  %v2728_v36 = vmul.f32 %v2829_v24, %v2716_v2 }
 0xb28   :  { %v2739_v37 = vadd.f32 %v2830_v22, %v2727_v55  ;;  %v2717_v15 = vmul.f32 %v3287_v62, %v4098_v16 }
 0xb29   :  { %v2740_v26 = vadd.f32 %v2830_v22, %v2728_v36 }
 0xb2a   :  { %2747 = vst.msk [vmem:[%s4158_s7 + $0x28] sm:$0xff] %vm62_vm0, %v2739_v37  ;;  %v2729_v3 = vmul.f32 %v2829_v24, %v2717_v15 }
 0xb2b   :  { %2748 = vst.msk [vmem:[%s4158_s7 + $0x30] sm:$0xff] %vm62_vm0, %v2740_v26 }
 0xb2c   :  { %v2741_v10 = vadd.f32 %v2830_v22, %v2729_v3 }
 0xb2e   :  { %2749 = vst.msk [vmem:[%s4158_s7 + $0x38] sm:$0xff] %vm62_vm0, %v2741_v10 }

// kernel: metabolism_processor_forward.16
= control target key start
LH: loop header
LB: loop body
LE: loop exit
PB: predicated region body
PF: predicated region fallthrough
CT: control target
= control target key end

     0   :  { %vm83_vm0 = vcmask 261120   ;;  %s3468_s12 = smov 96   ;;  %s3469_s17 = smov 64   ;;  %v3470_v62 = vmov 0.0   ;;  %vm3471_vm1 = vmmov 0   ;;  %vm465_vm2 = vcmask 130048   ;;  %s4366_s4 = inlined_call_operand.vmem [shape: bf16[32,32], index: 4, kind: input, shape index: {}]   ;;  %s4367_s1 = inlined_call_operand.vmem [shape: f32[64,32], index: 1, kind: input, shape index: {}]   ;;  %s4368_s6 = inlined_call_operand.vmem [shape: bf16[32,96], index: 6, kind: input, shape index: {}]   ;;  %s4369_s0 = inlined_call_operand.vmem [shape: f32[64,32], index: 0, kind: input, shape index: {}]   ;;  %s4370_s7 = inlined_call_operand.vmem [shape: f32[1,96], index: 7, kind: input, shape index: {}]   ;;  %s4371_s5 = inlined_call_operand.vmem [shape: f32[1,32], index: 5, kind: input, shape index: {}]   ;;  %s4372_s2 = inlined_call_operand.vmem [shape: f32[8,1,8], index: 2, kind: input, shape index: {}]   ;;  %s4373_s8 = inlined_call_operand.vmem [shape: bf16[2,32,32], index: 8, kind: input, shape index: {}]   ;;  %s4374_s3 = inlined_call_operand.vmem [shape: f32[64,1], index: 3, kind: input, shape index: {}]   ;;  %s4375_s9 = inlined_call_operand.vmem [shape: f32[6,32], index: 9, kind: input, shape index: {}]   ;;  %s4376_s10 = inlined_call_operand.vmem [shape: f32[64,32], index: 10, kind: output, shape index: {}]  }
   0x1   :  { %v3356_v0 = vld [vmem:[%s4366_s4 + $0x8] sm:$0xff]   ;;  %v3357_v1 = vld [vmem:[%s4366_s4] sm:$0xff]   ;;  %v50_v5 = vld [vmem:[%s4367_s1 + $0x10] sm:$0xff]  ;;  %vm898_vm3 = vcmask 64512   ;;  %vm998_vm4 = vcmask 1043456   ;;  %vm2324_vm5 = vcmask 261248  }
   0x2   :  { %3083 = vmatprep.subr.bf16.mxu0 %v3356_v0  ;;  %v48_v2 = vld [vmem:[%s4367_s1] sm:$0xff]  ;;  %v49_v3 = vld [vmem:[%s4367_s1 + $0x8] sm:$0xff]  ;;  %v51_v6 = vld [vmem:[%s4367_s1 + $0x18] sm:$0xff] }
   0x3   :  { %3084 = vmatpush3.bf16.msra.mxu0 %v3356_v0  ;;  %v56_v4 = vpack.c.bf16 %v49_v3, %v48_v2  ;;  %v52_v7 = vld [vmem:[%s4367_s1 + $0x20] sm:$0xff]  ;;  %v53_v8 = vld [vmem:[%s4367_s1 + $0x28] sm:$0xff]  ;;  %v57_v10 = vpack.c.bf16 %v51_v6, %v50_v5  ;;  %v38_v16 = vld [vmem:[%s4369_s0 + $0x10] sm:$0xff] }
   0x4   :  { %3085 = vmatprep.subr.bf16.mxu0 %v3357_v1  ;;  %v3358_v9 = vld [vmem:[%s4368_s6 + $0x8] sm:$0xff]   ;;  %v36_v11 = vld [vmem:[%s4369_s0] sm:$0xff]  ;;  %v58_v12 = vpack.c.bf16 %v53_v8, %v52_v7  ;;  %v39_v17 = vld [vmem:[%s4369_s0 + $0x18] sm:$0xff] }
   0x5   :  { %3087 = vmatprep.mubr.msk.bf16.mxu0 %vm83_vm0, %v56_v4  ;;  %275 = vrot.lane.b32.xlu0 %v3358_v9, %s3468_s12  ;;  %v3359_v13 = vld [vmem:[%s4368_s6] sm:$0xff]   ;;  %v37_v14 = vld [vmem:[%s4369_s0 + $0x8] sm:$0xff]  ;;  %v54_v18 = vld [vmem:[%s4367_s1 + $0x30] sm:$0xff]  ;;  %v45_v20 = vpack.c.bf16 %v39_v17, %v38_v16 }
   0x6   :  { %361 = vrot.lane.b32.xlu1 %v3358_v9, %s3469_s17  ;;  %3095 = vmatprep.subr.bf16.mxu1 %v3358_v9  ;;  %v44_v15 = vpack.c.bf16 %v37_v14, %v36_v11  ;;  %v55_v19 = vld [vmem:[%s4367_s1 + $0x38] sm:$0xff]  ;;  %v40_v22 = vld [vmem:[%s4369_s0 + $0x20] sm:$0xff]  ;;  %v41_v23 = vld [vmem:[%s4369_s0 + $0x28] sm:$0xff] }
   0x7   :  { %3086 = vmatpush3.bf16.msra.mxu0 %v3357_v1  ;;  %3096 = vmatpush3.bf16.msra.mxu1 %v3358_v9  ;;  %v59_v21 = vpack.c.bf16 %v55_v19, %v54_v18  ;;  %v46_v24 = vpack.c.bf16 %v41_v23, %v40_v22  ;;  %v42_v25 = vld [vmem:[%s4369_s0 + $0x30] sm:$0xff]  ;;  %v43_v26 = vld [vmem:[%s4369_s0 + $0x38] sm:$0xff]  ;;  %v3605_v28 = vld [vmem:[%s4370_s7] ss:$0 sm:$0xff] }
   0x8   :  { %3097 = vmatprep.subr.bf16.mxu1 %v3359_v13  ;;  %3099 = vmatprep.mubr.msk.bf16.mxu1 %vm83_vm0, %v44_v15  ;;  %v47_v27 = vpack.c.bf16 %v43_v26, %v42_v25  ;;  %v2899_v35 = vld [vmem:[%s4371_s5] ss:$0 sm:$0xff] }
   0x9   :  { %273 = vrot.lane.b32.xlu0 %v3359_v13, %s3468_s12 }
   0xa   :  { %3088 = vmatmul.mubr.msk.bf16.vlgmr.msra.gmra.mxu0 %vm83_vm0, %v57_v10  ;;  %359 = vrot.lane.b32.xlu1 %v3359_v13, %s3469_s17 }
   0xb   :  { %3091 = vmatprep.mubr.msk.bf16.mxu0 %vm83_vm0, %v58_v12  ;;  %3098 = vmatpush3.bf16.msra.mxu1 %v3359_v13 }
   0xd   :  { %279 = vrot.lane.b32.xlu0 %v3605_v28, %s3468_s12 }
   0xe   :  { %3100 = vmatmul.mubr.msk.bf16.vlgmr.msra.gmra.mxu1 %vm83_vm0, %v45_v20 }
   0xf   :  { %3103 = vmatprep.mubr.msk.bf16.mxu1 %vm83_vm0, %v46_v24 }
  0x12   :  { %3092 = vmatmul.mubr.msk.bf16.gmra.mxu0 %vm83_vm0, %v59_v21 }
  0x16   :  { %3104 = vmatmul.mubr.msk.bf16.gmra.mxu1 %vm83_vm0, %v47_v27 }
  0x77   :  { %v276_v29 = vpop.permute.xlu0 %275 }
  0x78   :  { %v362_v30 = vpop.permute.xlu1 %361  ;;  %3107 = vmatprep.subr.bf16.mxu0 %v276_v29 }
  0x79   :  { %3108 = vmatpush3.bf16.msra.mxu0 %v276_v29  ;;  %3119 = vmatprep.subr.bf16.mxu1 %v362_v30 }
  0x7a   :  { %3120 = vmatpush3.bf16.msra.mxu1 %v362_v30 }
  0x7b   :  { %v274_v31 = vpop.permute.xlu0 %273 }
  0x7c   :  { %v360_v32 = vpop.permute.xlu1 %359  ;;  %3109 = vmatprep.subr.bf16.mxu0 %v274_v31 }
  0x7d   :  { %3110 = vmatpush3.bf16.msra.mxu0 %v274_v31  ;;  %3121 = vmatprep.subr.bf16.mxu1 %v360_v32 }
  0x7e   :  { %3122 = vmatpush3.bf16.msra.mxu1 %v360_v32  ;;  %3131 = vmatprep.subr.bf16.mxu0 %v3470_v62 }
  0x7f   :  { %3137 = vmatprep.subr.bf16.mxu1 %v3470_v62  ;;  %v280_v2 = vpop.permute.xlu0 %279 }
  0xca   :  { %v3089_v33 = vpop.f32.mrf.mxu0 }
  0xcb   :  { %v139_v39 = vadd.f32 %v3089_v33, %v2899_v35 }
  0xcc   :  { %v130_v34 = vpop.f32.mrf.mxu0 }
  0xcd   :  { %v131_v37 = vadd.f32 %v2899_v35, %v130_v34  ;;  %v163_v46 = vmax.f32 %v139_v39, 0.0 }
  0xce   :  { %v3090_v36 = vpop.f32.mrf.mxu0  ;;  %v3101_v63 = vpop.f32.mrf.mxu1 }
  0xcf   :  { %v142_v38 = vadd.f32 %v3090_v36, %v2899_v35  ;;  %v161_v44 = vmax.f32 %v131_v37, 0.0  ;;  %v251_v29 = vadd.f32 %v3101_v63, %v3605_v28 }
  0xd0   :  { %v133_v40 = vpop.f32.mrf.mxu0  ;;  %v242_v1 = vpop.f32.mrf.mxu1 }
  0xd1   :  { %v134_v41 = vadd.f32 %v2899_v35, %v133_v40  ;;  %v164_v42 = vmax.f32 %v142_v38, 0.0  ;;  %v243_v13 = vadd.f32 %v3605_v28, %v242_v1 }
  0xd2   :  { %v3093_v43 = vpop.f32.mrf.mxu0  ;;  %v3102_v7 = vpop.f32.mrf.mxu1 }
  0xd3   :  { %v162_v45 = vmax.f32 %v134_v41, 0.0  ;;  %v155_v47 = vadd.f32 %v3093_v43, %v2899_v35  ;;  %v170_v51 = vpack.c.bf16 %v164_v42, %v163_v46  ;;  %v3638_v21 = vpack.c.bf16 %v243_v13, %v243_v13 }
  0xd4   :  { %v146_v48 = vpop.f32.mrf.mxu0  ;;  %v245_v15 = vpop.f32.mrf.mxu1  ;;  %v254_v36 = vadd.f32 %v3102_v7, %v3605_v28 }
  0xd5   :  { %v169_v49 = vpack.c.bf16 %v162_v45, %v161_v44  ;;  %v147_v50 = vadd.f32 %v2899_v35, %v146_v48  ;;  %v167_v54 = vmax.f32 %v155_v47, 0.0  ;;  %v246_v22 = vadd.f32 %v3605_v28, %v245_v15 }
  0xd6   :  { %v3094_v52 = vpop.f32.mrf.mxu0  ;;  %v3105_v23 = vpop.f32.mrf.mxu1  ;;  %v3675_v42 = vpack.c.bf16 %v254_v36, %v254_v36 }
  0xd7   :  { %v158_v53 = vadd.f32 %v3094_v52, %v2899_v35  ;;  %3111 = vmatprep.mubr.msk.bf16.mxu0 %vm83_vm0, %v169_v49  ;;  %3123 = vmatprep.mubr.msk.bf16.mxu1 %vm83_vm0, %v169_v49  ;;  %v165_v56 = vmax.f32 %v147_v50, 0.0  ;;  %v3651_v30 = vpack.c.bf16 %v246_v22, %v246_v22  ;;  %v267_v49 = vadd.f32 %v3105_v23, %v3605_v28 }
  0xd8   :  { %v149_v55 = vpop.f32.mrf.mxu0  ;;  %3112 = vmatmul.mubr.msk.bf16.vlgmr.msra.gmra.mxu0 %vm83_vm0, %v170_v51  ;;  %3124 = vmatmul.mubr.msk.bf16.vlgmr.msra.gmra.mxu1 %vm83_vm0, %v170_v51  ;;  %v258_v31 = vpop.f32.mrf.mxu1 }
  0xd9   :  { %v168_v57 = vmax.f32 %v158_v53, 0.0  ;;  %v150_v58 = vadd.f32 %v2899_v35, %v149_v55  ;;  %v3662_v35 = vpack.c.bf16 %v251_v29, %v251_v29  ;;  %v259_v37 = vadd.f32 %v3605_v28, %v258_v31 }
  0xda   :  { %v3106_v38 = vpop.f32.mrf.mxu1  ;;  %v3702_v53 = vpack.c.bf16 %v267_v49, %v267_v49 }
  0xdb   :  { %v166_v59 = vmax.f32 %v150_v58, 0.0  ;;  %v172_v60 = vpack.c.bf16 %v168_v57, %v167_v54  ;;  %v3678_v43 = vpack.c.bf16 %v259_v37, %v259_v37  ;;  %v270_v54 = vadd.f32 %v3106_v38, %v3605_v28 }
  0xdc   :  { %v261_v44 = vpop.f32.mrf.mxu1 }
  0xdd   :  { %v171_v61 = vpack.c.bf16 %v166_v59, %v165_v56  ;;  %v262_v45 = vadd.f32 %v3605_v28, %v261_v44  ;;  %v3712_v56 = vpack.c.bf16 %v270_v54, %v270_v54 }
  0xdf   :  { %3115 = vmatprep.mubr.msk.bf16.mxu0 %vm83_vm0, %v171_v61  ;;  %3127 = vmatprep.mubr.msk.bf16.mxu1 %vm83_vm0, %v171_v61  ;;  %v3691_v50 = vpack.c.bf16 %v262_v45, %v262_v45  ;;  %v3774_v45 = vld [vmem:[%s4372_s2 + $0x4] ss:$0 sm:$0xff] }
  0xe0   :  { %3116 = vmatmul.mubr.msk.bf16.gmra.mxu0 %vm83_vm0, %v172_v60  ;;  %3128 = vmatmul.mubr.msk.bf16.gmra.mxu1 %vm83_vm0, %v172_v60 }
  0xe1   :  { %3133 = vmatprep.mubr.msk.bf16.mxu0 %vm3471_vm1, %v3470_v62  ;;  %3139 = vmatprep.mubr.msk.bf16.mxu1 %vm3471_vm1, %v3470_v62 }
 0x198   :  { %v3113_v0 = vpop.f32.mrf.mxu0  ;;  %v3722_v57 = vpop.f32.mrf.mxu1 }
 0x199   :  { %v337_v9 = vadd.f32 %v3113_v0, %v280_v2 }
 0x19a   :  { %v328_v3 = vpop.f32.mrf.mxu0  ;;  %v3724_v58 = vpop.f32.mrf.mxu1 }
 0x19b   :  { %v329_v4 = vadd.f32 %v328_v3, %v280_v2  ;;  %v3634_v17 = vpack.c.bf16 %v337_v9, %v337_v9 }
 0x19c   :  { %v3114_v5 = vpop.f32.mrf.mxu0  ;;  %v3726_v59 = vpop.f32.mrf.mxu1 }
 0x19d   :  { %v3626_v6 = vpack.c.bf16 %v329_v4, %v329_v4  ;;  %v340_v18 = vadd.f32 %v3114_v5, %v280_v2  ;;  %v562_v24 = vsel %vm465_vm2, %v3634_v17, 0 }
 0x19e   :  { %v331_v8 = vpop.f32.mrf.mxu0  ;;  %v3728_v60 = vpop.f32.mrf.mxu1 }
 0x19f   :  { %v470_v10 = vsel %vm465_vm2, %v3626_v6, 0  ;;  %v332_v11 = vadd.f32 %v331_v8, %v280_v2  ;;  %v3644_v25 = vpack.c.bf16 %v340_v18, %v340_v18 }
 0x1a0   :  { %v3117_v12 = vpop.f32.mrf.mxu0  ;;  %3132 = vmatpush3.bf16.xpose.msra.mxu0 %v470_v10  ;;  %v3730_v61 = vpop.f32.mrf.mxu1  ;;  %v3749_v10 = vld [vmem:[%s4372_s2 + $0x1] ss:$0 sm:$0xff] }
 0x1a1   :  { %v3631_v14 = vpack.c.bf16 %v332_v11, %v332_v11  ;;  %3143 = vmatprep.subr.bf16.mxu0 %v3470_v62  ;;  %v608_v32 = vsel %vm465_vm2, %v3644_v25, 0  ;;  %v353_v39 = vadd.f32 %v3117_v12, %v280_v2 }
 0x1a2   :  { %v344_v16 = vpop.f32.mrf.mxu0  ;;  %v3732_v63 = vpop.f32.mrf.mxu1 }
 0x1a3   :  { %v516_v19 = vsel %vm465_vm2, %v3631_v14, 0  ;;  %v345_v26 = vadd.f32 %v344_v16, %v280_v2  ;;  %v3681_v46 = vpack.c.bf16 %v353_v39, %v353_v39 }
 0x1a4   :  { %v3118_v20 = vpop.f32.mrf.mxu0  ;;  %3138 = vmatpush3.bf16.xpose.msra.mxu1 %v516_v19  ;;  %v3734_v0 = vpop.f32.mrf.mxu1 }
 0x1a5   :  { %3149 = vmatprep.subr.bf16.mxu1 %v3470_v62  ;;  %v3656_v33 = vpack.c.bf16 %v345_v26, %v345_v26  ;;  %v356_v47 = vadd.f32 %v3118_v20, %v280_v2  ;;  %v746_v51 = vsel %vm465_vm2, %v3681_v46, 0  ;;  %v3759_v20 = vld [vmem:[%s4372_s2 + $0x2] ss:$0 sm:$0xff] }
 0x1a6   :  { %v347_v27 = vpop.f32.mrf.mxu0  ;;  %v3741_v4 = vpop.f32.mrf.mxu1 }
 0x1a7   :  { %3134 = vmatmul.mubr.msk.bf16.vlgmr.msra.gmra.mxu0 %vm465_vm2, %v3638_v21  ;;  %v348_v34 = vadd.f32 %v347_v27, %v280_v2  ;;  %v654_v40 = vsel %vm465_vm2, %v3656_v33, 0  ;;  %v3695_v52 = vpack.c.bf16 %v356_v47, %v356_v47  ;;  %v3739_v2 = vld [vmem:[%s4372_s2] ss:$0 sm:$0xff] }
 0x1a8   :  { %3144 = vmatpush3.bf16.xpose.msra.mxu0 %v562_v24  ;;  %3145 = vmatprep.mubr.msk.bf16.mxu0 %vm3471_vm1, %v3470_v62 }
 0x1a9   :  { %3155 = vmatprep.subr.bf16.mxu0 %v3470_v62  ;;  %v3669_v41 = vpack.c.bf16 %v348_v34, %v348_v34  ;;  %v792_v55 = vsel %vm465_vm2, %v3695_v52, 0 }
 0x1ab   :  { %3140 = vmatmul.mubr.msk.bf16.vlgmr.msra.gmra.mxu1 %vm465_vm2, %v3651_v30  ;;  %v700_v48 = vsel %vm465_vm2, %v3669_v41, 0 }
 0x1ac   :  { %3150 = vmatpush3.bf16.xpose.msra.mxu1 %v608_v32  ;;  %3151 = vmatprep.mubr.msk.bf16.mxu1 %vm3471_vm1, %v3470_v62  ;;  %v3767_v32 = vld [vmem:[%s4372_s2 + $0x3] ss:$0 sm:$0xff] }
 0x1ad   :  { %3161 = vmatprep.subr.bf16.mxu1 %v3470_v62 }
 0x1af   :  { %3146 = vmatmul.mubr.msk.bf16.vlgmr.msra.gmra.mxu0 %vm465_vm2, %v3662_v35 }
 0x1b0   :  { %3156 = vmatpush3.bf16.xpose.msra.mxu0 %v654_v40  ;;  %3157 = vmatprep.mubr.msk.bf16.mxu0 %vm3471_vm1, %v3470_v62 }
 0x1b1   :  { %3167 = vmatprep.subr.bf16.mxu0 %v3470_v62 }
 0x1b3   :  { %3152 = vmatmul.mubr.msk.bf16.vlgmr.msra.gmra.mxu1 %vm465_vm2, %v3675_v42 }
 0x1b4   :  { %3162 = vmatpush3.bf16.xpose.msra.mxu1 %v700_v48  ;;  %3163 = vmatprep.mubr.msk.bf16.mxu1 %vm3471_vm1, %v3470_v62 }
 0x1b5   :  { %3173 = vmatprep.subr.bf16.mxu1 %v3470_v62 }
 0x1b7   :  { %3158 = vmatmul.mubr.msk.bf16.vlgmr.msra.gmra.mxu0 %vm465_vm2, %v3678_v43 }
 0x1b8   :  { %3168 = vmatpush3.bf16.xpose.msra.mxu0 %v746_v51  ;;  %3169 = vmatprep.mubr.msk.bf16.mxu0 %vm3471_vm1, %v3470_v62 }
 0x1b9   :  { %3179 = vmatprep.subr.bf16.mxu0 %v3470_v62 }
 0x1bb   :  { %3164 = vmatmul.mubr.msk.bf16.vlgmr.msra.gmra.mxu1 %vm465_vm2, %v3691_v50 }
 0x1bc   :  { %3174 = vmatpush3.bf16.xpose.msra.mxu1 %v792_v55  ;;  %3175 = vmatprep.mubr.msk.bf16.mxu1 %vm3471_vm1, %v3470_v62 }
 0x1bd   :  { %3185 = vmatprep.subr.bf16.mxu1 %v3470_v62 }
 0x1bf   :  { %3170 = vmatmul.mubr.msk.bf16.vlgmr.msra.gmra.mxu0 %vm465_vm2, %v3702_v53 }
 0x1c0   :  { %3181 = vmatprep.mubr.msk.bf16.mxu0 %vm3471_vm1, %v3470_v62 }
 0x1c3   :  { %3176 = vmatmul.mubr.msk.bf16.vlgmr.msra.gmra.mxu1 %vm465_vm2, %v3712_v56 }
 0x1c4   :  { %3187 = vmatprep.mubr.msk.bf16.mxu1 %vm3471_vm1, %v3470_v62 }
 0x267   :  { %v506_v1 = vpop.f32.mrf.mxu0 }
 0x268   :  { %v834_v3 = vmul.f32 0.25, %v506_v1 }
 0x269   :  { %v3135_v5 = vpop.f32.mrf.mxu0 }
 0x26a   :  { %v3744_v7 = vadd.f32 %v3739_v2, %v834_v3  ;;  %v3781_v3 = vld [vmem:[%s4372_s2 + $0x5] ss:$0 sm:$0xff] }
 0x26b   :  { %v509_v8 = vpop.f32.mrf.mxu0  ;;  %v552_v9 = vpop.f32.mrf.mxu1 }
 0x26c   :  { %v835_v11 = vmul.f32 0.25, %v552_v9  ;;  %v899_v12 = vsel %vm898_vm3, %v3744_v7, -inf }
 0x26d   :  { %v3141_v13 = vpop.f32.mrf.mxu1  ;;  %900 = vmax.xlane.f32.xlu1 %v899_v12  ;;  %v3136_v15 = vpop.f32.mrf.mxu0 }
 0x26e   :  { %v3754_v16 = vadd.f32 %v3749_v10, %v835_v11 }
 0x26f   :  { %v555_v18 = vpop.f32.mrf.mxu1  ;;  %v598_v19 = vpop.f32.mrf.mxu0 }
 0x270   :  { %v836_v22 = vmul.f32 0.25, %v598_v19  ;;  %v902_v23 = vsel %vm898_vm3, %v3754_v16, -inf  ;;  %v3790_v18 = vld [vmem:[%s4372_s2 + $0x6] ss:$0 sm:$0xff] }
 0x271   :  { %903 = vmax.xlane.f32.xlu0 %v902_v23  ;;  %v3142_v24 = vpop.f32.mrf.mxu1  ;;  %v3147_v26 = vpop.f32.mrf.mxu0 }
 0x272   :  { %v892_v27 = vadd.f32 %v3759_v20, %v836_v22 }
 0x273   :  { %v601_v29 = vpop.f32.mrf.mxu0  ;;  %v644_v31 = vpop.f32.mrf.mxu1 }
 0x274   :  { %v837_v34 = vmul.f32 0.25, %v644_v31  ;;  %v905_v36 = vsel %vm898_vm3, %v892_v27, -inf  ;;  %v3798_v31 = vld [vmem:[%s4372_s2 + $0x7] ss:$0 sm:$0xff]  ;;  %s3472_s2 = smov 112  }
 0x275   :  { %v3153_v37 = vpop.f32.mrf.mxu1  ;;  %906 = vmax.xlane.f32.xlu0 %v905_v36  ;;  %v3148_v38 = vpop.f32.mrf.mxu0 }
 0x276   :  { %v893_v39 = vadd.f32 %v3767_v32, %v837_v34 }
 0x277   :  { %v647_v40 = vpop.f32.mrf.mxu1  ;;  %v690_v44 = vpop.f32.mrf.mxu0 }
 0x278   :  { %v838_v47 = vmul.f32 0.25, %v690_v44  ;;  %v908_v48 = vsel %vm898_vm3, %v893_v39, -inf }
 0x279   :  { %v3154_v49 = vpop.f32.mrf.mxu1  ;;  %909 = vmax.xlane.f32.xlu1 %v908_v48  ;;  %v3159_v51 = vpop.f32.mrf.mxu0 }
 0x27a   :  { %v894_v54 = vadd.f32 %v3774_v45, %v838_v47 }
 0x27b   :  { %v693_v55 = vpop.f32.mrf.mxu0  ;;  %v736_v1 = vpop.f32.mrf.mxu1 }
 0x27c   :  { %v839_v5 = vmul.f32 0.25, %v736_v1  ;;  %v911_v8 = vsel %vm898_vm3, %v894_v54, -inf }
 0x27d   :  { %v3165_v9 = vpop.f32.mrf.mxu1  ;;  %912 = vmax.xlane.f32.xlu0 %v911_v8  ;;  %v3160_v11 = vpop.f32.mrf.mxu0 }
 0x27e   :  { %v3785_v12 = vadd.f32 %v3781_v3, %v839_v5 }
 0x27f   :  { %v739_v13 = vpop.f32.mrf.mxu1  ;;  %v782_v15 = vpop.f32.mrf.mxu0 }
 0x280   :  { %v840_v19 = vmul.f32 0.25, %v782_v15  ;;  %v914_v22 = vsel %vm898_vm3, %v3785_v12, -inf }
 0x281   :  { %v3166_v23 = vpop.f32.mrf.mxu1  ;;  %915 = vmax.xlane.f32.xlu1 %v914_v22  ;;  %v3171_v24 = vpop.f32.mrf.mxu0 }
 0x282   :  { %v896_v26 = vadd.f32 %v3790_v18, %v840_v19 }
 0x283   :  { %v828_v29 = vpop.f32.mrf.mxu1  ;;  %v785_v34 = vpop.f32.mrf.mxu0 }
 0x284   :  { %v841_v36 = vmul.f32 0.25, %v828_v29  ;;  %v917_v37 = vsel %vm898_vm3, %v896_v26, -inf }
 0x285   :  { %918 = vmax.xlane.f32.xlu0 %v917_v37  ;;  %v3177_v38 = vpop.f32.mrf.mxu1  ;;  %v3172_v40 = vpop.f32.mrf.mxu0 }
 0x286   :  { %v897_v44 = vadd.f32 %v3798_v31, %v841_v36 }
 0x287   :  { %v831_v47 = vpop.f32.mrf.mxu1 }
 0x288   :  { %v920_v48 = vsel %vm898_vm3, %v897_v44, -inf }
 0x289   :  { %921 = vmax.xlane.f32.xlu1 %v920_v48  ;;  %v3178_v49 = vpop.f32.mrf.mxu1 }
 0x2f6   :  { %v901_v51 = vpop.xlane.xlu1 %900 }
 0x2f7   :  { %v923_v55 = vsub.f32 %v3744_v7, %v901_v51 }
 0x2f9   :  { %v931_v1 = vmul.f32 1.442695, %v923_v55 }
 0x2fa   :  { %v904_v5 = vpop.xlane.xlu0 %903 }
 0x2fb   :  { %3364 = vpow2.f32 %v931_v1  ;;  %v924_v8 = vsub.f32 %v3754_v16, %v904_v5 }
 0x2fd   :  { %v933_v9 = vmul.f32 1.442695, %v924_v8 }
 0x2fe   :  { %v907_v11 = vpop.xlane.xlu0 %906 }
 0x2ff   :  { %3366 = vpow2.f32 %v933_v9  ;;  %v925_v13 = vsub.f32 %v892_v27, %v907_v11 }
 0x301   :  { %v935_v15 = vmul.f32 1.442695, %v925_v13 }
 0x302   :  { %v910_v19 = vpop.xlane.xlu1 %909 }
 0x303   :  { %3368 = vpow2.f32 %v935_v15  ;;  %v926_v22 = vsub.f32 %v893_v39, %v910_v19 }
 0x305   :  { %v937_v23 = vmul.f32 1.442695, %v926_v22 }
 0x306   :  { %v913_v24 = vpop.xlane.xlu0 %912 }
 0x307   :  { %3370 = vpow2.f32 %v937_v23  ;;  %v927_v29 = vsub.f32 %v894_v54, %v913_v24 }
 0x308   :  { %v3805_v34 = vpop.eup %3364 }
 0x309   :  { %v939_v7 = vmul.f32 1.442695, %v927_v29  ;;  %v947_v36 = vsel %vm898_vm3, %v3805_v34, 0.0 }
 0x30a   :  { %948 = vadd.xlane.f32.xlu0 %v947_v36  ;;  %v916_v48 = vpop.xlane.xlu1 %915 }
 0x30b   :  { %3372 = vpow2.f32 %v939_v7  ;;  %v928_v49 = vsub.f32 %v3785_v12, %v916_v48 }
 0x30c   :  { %v3809_v16 = vpop.eup %3366 }
 0x30d   :  { %v950_v27 = vsel %vm898_vm3, %v3809_v16, 0.0  ;;  %v941_v55 = vmul.f32 1.442695, %v928_v49 }
 0x30e   :  { %951 = vadd.xlane.f32.xlu1 %v950_v27  ;;  %v919_v51 = vpop.xlane.xlu0 %918 }
 0x30f   :  { %v929_v1 = vsub.f32 %v896_v26, %v919_v51  ;;  %3374 = vpow2.f32 %v941_v55 }
 0x310   :  { %v3813_v37 = vpop.eup %3368 }
 0x311   :  { %v953_v39 = vsel %vm898_vm3, %v3813_v37, 0.0  ;;  %v943_v8 = vmul.f32 1.442695, %v929_v1 }
 0x312   :  { %954 = vadd.xlane.f32.xlu0 %v953_v39  ;;  %v922_v5 = vpop.xlane.xlu1 %921 }
 0x313   :  { %v930_v9 = vsub.f32 %v897_v44, %v922_v5  ;;  %3376 = vpow2.f32 %v943_v8 }
 0x314   :  { %v3817_v54 = vpop.eup %3370 }
 0x315   :  { %v956_v38 = vsel %vm898_vm3, %v3817_v54, 0.0 }
 0x316   :  { %957 = vadd.xlane.f32.xlu1 %v956_v38 }
 0x318   :  { %v3821_v40 = vpop.eup %3372 }
 0x319   :  { %v959_v47 = vsel %vm898_vm3, %v3821_v40, 0.0 }
 0x31a   :  { %960 = vadd.xlane.f32.xlu0 %v959_v47 }
 0x327   :  { %1376 = vrot.lane.b32.xlu1 %v3626_v6, %s3472_s2  ;;  %v3840_v6 = vpop.eup %3374 }
 0x330   :  { %365 = vrot.lane.b32.xlu0 %v3605_v28, %s3469_s17  ;;  %v945_v28 = vmul.f32 1.442695, %v930_v9  ;;  %s3473_s17 = smov 16  }
 0x332   :  { %3378 = vpow2.f32 %v945_v28 }
 0x334   :  { %1428 = vrot.lane.b32.xlu0 %v3631_v14, %s3472_s2  ;;  %v962_v14 = vsel %vm898_vm3, %v3840_v6, 0.0 }
 0x338   :  { %1373 = vrot.lane.b32.xlu0 %v3638_v21, %s3472_s2  ;;  %v3846_v21 = vpop.eup %3376 }
 0x33c   :  { %1480 = vrot.lane.b32.xlu0 %v3634_v17, %s3472_s2  ;;  %v965_v17 = vsel %vm898_vm3, %v3846_v21, 0.0 }
 0x340   :  { %1477 = vrot.lane.b32.xlu0 %v3662_v35, %s3472_s2  ;;  %v3852_v35 = vpop.eup %3378 }
 0x344   :  { %1584 = vrot.lane.b32.xlu0 %v3656_v33, %s3472_s2  ;;  %v968_v33 = vsel %vm898_vm3, %v3852_v35, 0.0 }
 0x348   :  { %1581 = vrot.lane.b32.xlu0 %v3678_v43, %s3472_s2 }
 0x34b   :  { %963 = vadd.xlane.f32.xlu1 %v962_v14 }
 0x34c   :  { %1688 = vrot.lane.b32.xlu0 %v3681_v46, %s3472_s2 }
 0x34f   :  { %966 = vadd.xlane.f32.xlu1 %v965_v17 }
 0x350   :  { %1685 = vrot.lane.b32.xlu0 %v3702_v53, %s3472_s2 }
 0x353   :  { %969 = vadd.xlane.f32.xlu1 %v968_v33 }
 0x364   :  { %1425 = vrot.lane.b32.xlu1 %v3651_v30, %s3472_s2 }
 0x368   :  { %1532 = vrot.lane.b32.xlu1 %v3644_v25, %s3472_s2 }
 0x36c   :  { %1529 = vrot.lane.b32.xlu1 %v3675_v42, %s3472_s2 }
 0x370   :  { %1636 = vrot.lane.b32.xlu1 %v3669_v41, %s3472_s2 }
 0x374   :  { %1633 = vrot.lane.b32.xlu1 %v3691_v50, %s3472_s2 }
 0x378   :  { %1740 = vrot.lane.b32.xlu1 %v3695_v52, %s3472_s2 }
 0x37c   :  { %1737 = vrot.lane.b32.xlu1 %v3712_v56, %s3472_s2 }
 0x393   :  { %v949_v43 = vpop.xlane.xlu0 %948 }
 0x394   :  { %3380 = vrcp.f32 %v949_v43 }
 0x397   :  { %v952_v30 = vpop.xlane.xlu1 %951 }
 0x398   :  { %3382 = vrcp.f32 %v952_v30 }
 0x39b   :  { %v955_v25 = vpop.xlane.xlu0 %954 }
 0x39c   :  { %3384 = vrcp.f32 %v955_v25 }
 0x39f   :  { %v958_v46 = vpop.xlane.xlu1 %957 }
 0x3a0   :  { %3386 = vrcp.f32 %v958_v46 }
 0x3a1   :  { %v3381_v53 = vpop.eup %3380 }
 0x3a2   :  { %v979_v26 = vmul.f32 %v3381_v53, %v3805_v34 }
 0x3a3   :  { %v961_v42 = vpop.xlane.xlu0 %960 }
 0x3a4   :  { %3388 = vrcp.f32 %v961_v42  ;;  %v987_v22 = vpack.c.bf16 %v979_v26, %v979_v26 }
 0x3a5   :  { %v3383_v41 = vpop.eup %3382 }
 0x3a6   :  { %v980_v15 = vmul.f32 %v3383_v41, %v3809_v16 }
 0x3a7   :  { %v3872_v12 = vpop.permute.xlu0 %365 }
 0x3a8   :  { %v403_v50 = vadd.f32 %v3724_v58, %v3872_v12  ;;  %v406_v52 = vadd.f32 %v3728_v60, %v3872_v12  ;;  %v411_v56 = vadd.f32 %v3722_v57, %v3872_v12  ;;  %v414_v44 = vadd.f32 %v3726_v59, %v3872_v12 }
 0x3a9   :  { %v3385_v59 = vpop.eup %3384  ;;  %v988_v23 = vpack.c.bf16 %v980_v15, %v980_v15  ;;  %v419_v7 = vadd.f32 %v3732_v63, %v3872_v12  ;;  %v422_v36 = vadd.f32 %v3741_v4, %v3872_v12  ;;  %v427_v48 = vadd.f32 %v3730_v61, %v3872_v12 }
 0x3aa   :  { %v449_v11 = vpack.c.bf16 %v403_v50, %v403_v50  ;;  %v3883_v13 = vpack.c.bf16 %v406_v52, %v406_v52  ;;  %v3890_v57 = vpack.c.bf16 %v411_v56, %v411_v56  ;;  %v3892_v19 = vpack.c.bf16 %v414_v44, %v414_v44 }
 0x3ab   :  { %v981_v16 = vmul.f32 %v3385_v59, %v3813_v37  ;;  %v3914_v63 = vpack.c.bf16 %v419_v7, %v419_v7  ;;  %v3916_v39 = vpack.c.bf16 %v422_v36, %v422_v36  ;;  %v3933_v51 = vpack.c.bf16 %v427_v48, %v427_v48  ;;  %v1429_v8 = vpop.permute.xlu0 %1428 }
 0x3ac   :  { %1901 = vrot.lane.b32.xlu1 %v449_v11, %s3472_s2  ;;  %v1000_v58 = vsel %vm998_vm4, %v449_v11, 0  ;;  %v1046_v60 = vsel %vm998_vm4, %v3883_v13, 0  ;;  %v1092_v29 = vsel %vm998_vm4, %v3890_v57, 0  ;;  %v1138_v34 = vsel %vm998_vm4, %v3892_v19, 0 }
 0x3ad   :  { %3180 = vmatpush3.bf16.msra.mxu0 %v1000_v58  ;;  %3186 = vmatpush3.bf16.msra.mxu1 %v1046_v60  ;;  %v3387_v24 = vpop.eup %3386  ;;  %v989_v4 = vpack.c.bf16 %v981_v16, %v981_v16  ;;  %v1184_v37 = vsel %vm998_vm4, %v3914_v63, 0  ;;  %v1276_v61 = vsel %vm998_vm4, %v3933_v51, 0  ;;  %v430_v28 = vadd.f32 %v3734_v0, %v3872_v12 }
 0x3ae   :  { %3191 = vmatprep.subr.bf16.mxu0 %v3470_v62  ;;  %3197 = vmatprep.subr.bf16.mxu1 %v3470_v62  ;;  %v982_v27 = vmul.f32 %v3387_v24, %v3817_v54  ;;  %v1230_v54 = vsel %vm998_vm4, %v3916_v39, 0  ;;  %v1434_v26 = vsel %vm465_vm2, %v1429_v8, 0 }
 0x3af   :  { %v1374_v17 = vpop.permute.xlu0 %1373  ;;  %v3944_v43 = vpack.c.bf16 %v430_v28, %v430_v28 }
 0x3b0   :  { %3182 = vmatmul.mubr.msk.bf16.vlgmr.msra.gmra.mxu0 %vm898_vm3, %v987_v22  ;;  %3188 = vmatmul.mubr.msk.bf16.vlgmr.msra.gmra.mxu1 %vm898_vm3, %v988_v23  ;;  %v990_v38 = vpack.c.bf16 %v982_v27, %v982_v27 }
 0x3b1   :  { %3192 = vmatpush3.bf16.msra.mxu0 %v1092_v29  ;;  %3198 = vmatpush3.bf16.msra.mxu1 %v1138_v34  ;;  %v3389_v47 = vpop.eup %3388  ;;  %v1322_v42 = vsel %vm998_vm4, %v3944_v43, 0 }
 0x3b2   :  { %3193 = vmatprep.mubr.msk.bf16.mxu0 %vm3471_vm1, %v3470_v62  ;;  %3199 = vmatprep.mubr.msk.bf16.mxu1 %vm3471_vm1, %v3470_v62  ;;  %v983_v49 = vmul.f32 %v3389_v47, %v3821_v40  ;;  %v1377_v40 = vpop.permute.xlu1 %1376 }
 0x3b3   :  { %3203 = vmatprep.subr.bf16.mxu0 %v3470_v62  ;;  %3209 = vmatprep.subr.bf16.mxu1 %v3470_v62  ;;  %v1481_v41 = vpop.permute.xlu0 %1480  ;;  %v1382_v12 = vsel %vm465_vm2, %v1377_v40, 0 }
 0x3b4   :  { %v991_v55 = vpack.c.bf16 %v983_v49, %v983_v49  ;;  %v1486_v44 = vsel %vm465_vm2, %v1481_v41, 0 }
 0x3b7   :  { %v1478_v56 = vpop.permute.xlu0 %1477 }
 0x3b8   :  { %3194 = vmatmul.mubr.msk.bf16.vlgmr.msra.gmra.mxu0 %vm898_vm3, %v989_v4  ;;  %3200 = vmatmul.mubr.msk.bf16.vlgmr.msra.gmra.mxu1 %vm898_vm3, %v990_v38 }
 0x3b9   :  { %3204 = vmatpush3.bf16.msra.mxu0 %v1184_v37  ;;  %3210 = vmatpush3.bf16.msra.mxu1 %v1230_v54 }
 0x3ba   :  { %3205 = vmatprep.mubr.msk.bf16.mxu0 %vm3471_vm1, %v3470_v62  ;;  %3215 = vmatprep.subr.bf16.mxu0 %v3470_v62 }
 0x3bb   :  { %3211 = vmatprep.mubr.msk.bf16.mxu1 %vm3471_vm1, %v3470_v62  ;;  %3221 = vmatprep.subr.bf16.mxu1 %v3470_v62  ;;  %v1585_v11 = vpop.permute.xlu0 %1584 }
 0x3bc   :  { %v1590_v59 = vsel %vm465_vm2, %v1585_v11, 0 }
 0x3bf   :  { %v1582_v60 = vpop.permute.xlu0 %1581 }
 0x3c0   :  { %3206 = vmatmul.mubr.msk.bf16.vlgmr.msra.gmra.mxu0 %vm898_vm3, %v991_v55 }
 0x3c1   :  { %3216 = vmatpush3.bf16.msra.mxu0 %v1276_v61  ;;  %3217 = vmatprep.mubr.msk.bf16.mxu0 %vm3471_vm1, %v3470_v62 }
 0x3c2   :  { %3227 = vmatprep.subr.bf16.mxu0 %v3470_v62 }
 0x3c3   :  { %v1689_v24 = vpop.permute.xlu0 %1688 }
 0x3c4   :  { %v1694_v29 = vsel %vm465_vm2, %v1689_v24, 0 }
 0x3c7   :  { %v1686_v36 = vpop.permute.xlu0 %1685 }
 0x3d4   :  { %v964_v1 = vpop.xlane.xlu1 %963 }
 0x3d5   :  { %3390 = vrcp.f32 %v964_v1 }
 0x3d8   :  { %v967_v5 = vpop.xlane.xlu1 %966 }
 0x3d9   :  { %3392 = vrcp.f32 %v967_v5 }
 0x3dc   :  { %v970_v9 = vpop.xlane.xlu1 %969 }
 0x3dd   :  { %3394 = vrcp.f32 %v970_v9 }
 0x3e0   :  { %v1426_v46 = vpop.permute.xlu1 %1425 }
 0x3e2   :  { %v3391_v14 = vpop.eup %3390 }
 0x3e3   :  { %v984_v33 = vmul.f32 %v3391_v14, %v3840_v6 }
 0x3e4   :  { %v1533_v52 = vpop.permute.xlu1 %1532 }
 0x3e5   :  { %v992_v30 = vpack.c.bf16 %v984_v33, %v984_v33  ;;  %v1538_v15 = vsel %vm465_vm2, %v1533_v52, 0 }
 0x3e6   :  { %v3393_v25 = vpop.eup %3392 }
 0x3e7   :  { %3212 = vmatmul.mubr.msk.bf16.vlgmr.msra.gmra.mxu1 %vm898_vm3, %v992_v30  ;;  %v985_v53 = vmul.f32 %v3393_v25, %v3846_v21 }
 0x3e8   :  { %3222 = vmatpush3.bf16.msra.mxu1 %v1322_v42  ;;  %3223 = vmatprep.mubr.msk.bf16.mxu1 %vm3471_vm1, %v3470_v62 }
 0x3e9   :  { %v993_v0 = vpack.c.bf16 %v985_v53, %v985_v53  ;;  %3233 = vmatprep.subr.bf16.mxu1 %v3470_v62 }
 0x3ea   :  { %v3395_v6 = vpop.eup %3394 }
 0x3eb   :  { %3218 = vmatmul.mubr.msk.bf16.vlgmr.msra.gmra.mxu0 %vm898_vm3, %v993_v0  ;;  %v986_v50 = vmul.f32 %v3395_v6, %v3852_v35  ;;  %v1530_v35 = vpop.permute.xlu1 %1529 }
 0x3ec   :  { %3228 = vmatpush3.bf16.xpose.msra.mxu0 %v1382_v12  ;;  %3229 = vmatprep.mubr.msk.bf16.mxu0 %vm3471_vm1, %v3470_v62 }
 0x3ed   :  { %v994_v21 = vpack.c.bf16 %v986_v50, %v986_v50  ;;  %3239 = vmatprep.subr.bf16.mxu0 %v3470_v62 }
 0x3ef   :  { %3224 = vmatmul.mubr.msk.bf16.vlgmr.msra.gmra.mxu1 %vm898_vm3, %v994_v21  ;;  %v1637_v58 = vpop.permute.xlu1 %1636 }
 0x3f0   :  { %3234 = vmatpush3.bf16.xpose.msra.mxu1 %v1434_v26  ;;  %3235 = vmatprep.mubr.msk.bf16.mxu1 %vm3471_vm1, %v3470_v62  ;;  %v1642_v23 = vsel %vm465_vm2, %v1637_v58, 0 }
 0x3f1   :  { %3245 = vmatprep.subr.bf16.mxu1 %v3470_v62 }
 0x3f3   :  { %3230 = vmatmul.mubr.msk.bf16.vlgmr.msra.gmra.mxu0 %vm465_vm2, %v1374_v17  ;;  %v1634_v22 = vpop.permute.xlu1 %1633 }
 0x3f4   :  { %3240 = vmatpush3.bf16.xpose.msra.mxu0 %v1486_v44  ;;  %3241 = vmatprep.mubr.msk.bf16.mxu0 %vm3471_vm1, %v3470_v62 }
 0x3f5   :  { %3251 = vmatprep.subr.bf16.mxu0 %v3470_v62 }
 0x3f7   :  { %3236 = vmatmul.mubr.msk.bf16.vlgmr.msra.gmra.mxu1 %vm465_vm2, %v1426_v46  ;;  %v1741_v34 = vpop.permute.xlu1 %1740 }
 0x3f8   :  { %3246 = vmatpush3.bf16.xpose.msra.mxu1 %v1538_v15  ;;  %3247 = vmatprep.mubr.msk.bf16.mxu1 %vm3471_vm1, %v3470_v62  ;;  %v1746_v7 = vsel %vm465_vm2, %v1741_v34, 0 }
 0x3f9   :  { %3257 = vmatprep.subr.bf16.mxu1 %v3470_v62 }
 0x3fb   :  { %3242 = vmatmul.mubr.msk.bf16.vlgmr.msra.gmra.mxu0 %vm465_vm2, %v1478_v56  ;;  %v1738_v16 = vpop.permute.xlu1 %1737 }
 0x3fc   :  { %3252 = vmatpush3.bf16.xpose.msra.mxu0 %v1590_v59  ;;  %3253 = vmatprep.mubr.msk.bf16.mxu0 %vm3471_vm1, %v3470_v62 }
 0x3fd   :  { %3263 = vmatprep.subr.bf16.mxu0 %v3470_v62 }
 0x3ff   :  { %3248 = vmatmul.mubr.msk.bf16.vlgmr.msra.gmra.mxu1 %vm465_vm2, %v1530_v35 }
 0x400   :  { %3258 = vmatpush3.bf16.xpose.msra.mxu1 %v1642_v23  ;;  %3259 = vmatprep.mubr.msk.bf16.mxu1 %vm3471_vm1, %v3470_v62 }
 0x401   :  { %3269 = vmatprep.subr.bf16.mxu1 %v3470_v62 }
 0x403   :  { %3254 = vmatmul.mubr.msk.bf16.vlgmr.msra.gmra.mxu0 %vm465_vm2, %v1582_v60 }
 0x404   :  { %3264 = vmatpush3.bf16.xpose.msra.mxu0 %v1694_v29  ;;  %3265 = vmatprep.mubr.msk.bf16.mxu0 %vm3471_vm1, %v3470_v62 }
 0x405   :  { %3275 = vmatprep.subr.bf16.mxu0 %v3470_v62 }
 0x407   :  { %3260 = vmatmul.mubr.msk.bf16.vlgmr.msra.gmra.mxu1 %vm465_vm2, %v1634_v22 }
 0x408   :  { %3270 = vmatpush3.bf16.xpose.msra.mxu1 %v1746_v7  ;;  %3271 = vmatprep.mubr.msk.bf16.mxu1 %vm3471_vm1, %v3470_v62 }
 0x409   :  { %3281 = vmatprep.subr.bf16.mxu1 %v3470_v62 }
 0x40b   :  { %3266 = vmatmul.mubr.msk.bf16.vlgmr.msra.gmra.mxu0 %vm465_vm2, %v1686_v36 }
 0x40c   :  { %3277 = vmatprep.mubr.msk.bf16.mxu0 %vm3471_vm1, %v3470_v62 }
 0x40f   :  { %3272 = vmatmul.mubr.msk.bf16.vlgmr.msra.gmra.mxu1 %vm465_vm2, %v1738_v16 }
 0x410   :  { %3283 = vmatprep.mubr.msk.bf16.mxu1 %vm3471_vm1, %v3470_v62 }
 0x41e   :  { %v1902_v27 = vpop.permute.xlu1 %1901 }
 0x41f   :  { %v1907_v4 = vsel %vm998_vm4, %v1902_v27, 0 }
 0x420   :  { %3276 = vmatpush3.bf16.msra.mxu0 %v1907_v4 }
 0x421   :  { %3287 = vmatprep.subr.bf16.mxu0 %v3470_v62 }
 0x470   :  { %v1036_v38 = vpop.f32.mrf.mxu0  ;;  %v1082_v47 = vpop.f32.mrf.mxu1 }
 0x471   :  { %1364 = vst.msk [vmem:[#allocation2] sm:$0xff] %vm465_vm2, %v1036_v38  ;;  %1365 = vst.msk [vmem:[#allocation2 + $0x8] sm:$0xff] %vm465_vm2, %v1082_v47 }
 0x472   :  { %v3183_v37 = vpop.f32.mrf.mxu0  ;;  %v3189_v54 = vpop.f32.mrf.mxu1 }
 0x474   :  { %v1039_v48 = vpop.f32.mrf.mxu0  ;;  %v1085_v49 = vpop.f32.mrf.mxu1 }
 0x476   :  { %v3184_v55 = vpop.f32.mrf.mxu0  ;;  %v3190_v61 = vpop.f32.mrf.mxu1 }
 0x478   :  { %v1128_v40 = vpop.f32.mrf.mxu0  ;;  %v1174_v1 = vpop.f32.mrf.mxu1 }
 0x479   :  { %1366 = vst.msk [vmem:[#allocation2 + $0x10] sm:$0xff] %vm465_vm2, %v1128_v40  ;;  %1367 = vst.msk [vmem:[#allocation2 + $0x18] sm:$0xff] %vm465_vm2, %v1174_v1 }
 0x47a   :  { %v3195_v5 = vpop.f32.mrf.mxu0  ;;  %v3201_v8 = vpop.f32.mrf.mxu1 }
 0x47c   :  { %v1131_v9 = vpop.f32.mrf.mxu0  ;;  %v1177_v28 = vpop.f32.mrf.mxu1 }
 0x47e   :  { %v3196_v14 = vpop.f32.mrf.mxu0  ;;  %v3202_v17 = vpop.f32.mrf.mxu1 }
 0x480   :  { %v1220_v33 = vpop.f32.mrf.mxu0 }
 0x481   :  { %1368 = vst.msk [vmem:[#allocation2 + $0x20] sm:$0xff] %vm465_vm2, %v1220_v33 }
 0x482   :  { %v3207_v30 = vpop.f32.mrf.mxu0 }
 0x484   :  { %v1223_v25 = vpop.f32.mrf.mxu0 }
 0x486   :  { %v3208_v46 = vpop.f32.mrf.mxu0 }
 0x4a7   :  { %v1266_v42 = vpop.f32.mrf.mxu1 }
 0x4a8   :  { %1369 = vst.msk [vmem:[#allocation2 + $0x28] sm:$0xff] %vm465_vm2, %v1266_v42 }
 0x4a9   :  { %v3213_v53 = vpop.f32.mrf.mxu1 }
 0x4ab   :  { %v1269_v41 = vpop.f32.mrf.mxu1  ;;  %v1312_v0 = vpop.f32.mrf.mxu0 }
 0x4ac   :  { %1370 = vst.msk [vmem:[#allocation2 + $0x30] sm:$0xff] %vm465_vm2, %v1312_v0 }
 0x4ad   :  { %v3214_v6 = vpop.f32.mrf.mxu1  ;;  %v3219_v12 = vpop.f32.mrf.mxu0 }
 0x4af   :  { %v1315_v50 = vpop.f32.mrf.mxu0  ;;  %v1358_v52 = vpop.f32.mrf.mxu1 }
 0x4b0   :  { %1371 = vst.msk [vmem:[#allocation2 + $0x38] sm:$0xff] %vm465_vm2, %v1358_v52 }
 0x4b1   :  { %v3220_v21 = vpop.f32.mrf.mxu0  ;;  %v3225_v56 = vpop.f32.mrf.mxu1 }
 0x4b3   :  { %v1361_v26 = vpop.f32.mrf.mxu1  ;;  %v1418_v35 = vpop.f32.mrf.mxu0 }
 0x4b4   :  { %v1788_v44 = vmul.f32 0.25, %v1418_v35 }
 0x4b5   :  { %v3226_v11 = vpop.f32.mrf.mxu1  ;;  %v3231_v15 = vpop.f32.mrf.mxu0 }
 0x4b6   :  { %v4011_v58 = vadd.f32 %v3739_v2, %v1788_v44 }
 0x4b7   :  { %v1421_v60 = vpop.f32.mrf.mxu0  ;;  %v1470_v59 = vpop.f32.mrf.mxu1 }
 0x4b8   :  { %v1789_v22 = vmul.f32 0.25, %v1470_v59  ;;  %v1804_v23 = vsel %vm898_vm3, %v4011_v58, -inf }
 0x4b9   :  { %v3237_v24 = vpop.f32.mrf.mxu1  ;;  %1805 = vmax.xlane.f32.xlu0 %v1804_v23  ;;  %v3232_v29 = vpop.f32.mrf.mxu0 }
 0x4ba   :  { %v1797_v34 = vadd.f32 %v3749_v10, %v1789_v22 }
 0x4bb   :  { %v1473_v7 = vpop.f32.mrf.mxu1  ;;  %v1522_v36 = vpop.f32.mrf.mxu0 }
 0x4bc   :  { %v1790_v16 = vmul.f32 0.25, %v1522_v36  ;;  %v1807_v27 = vsel %vm898_vm3, %v1797_v34, -inf }
 0x4bd   :  { %1808 = vmax.xlane.f32.xlu1 %v1807_v27  ;;  %v3238_v4 = vpop.f32.mrf.mxu1  ;;  %v3243_v2 = vpop.f32.mrf.mxu0 }
 0x4be   :  { %v1798_v38 = vadd.f32 %v3759_v20, %v1790_v16 }
 0x4bf   :  { %v1525_v47 = vpop.f32.mrf.mxu0  ;;  %v1574_v37 = vpop.f32.mrf.mxu1 }
 0x4c0   :  { %v1791_v54 = vmul.f32 0.25, %v1574_v37  ;;  %v1810_v48 = vsel %vm898_vm3, %v1798_v38, -inf }
 0x4c1   :  { %v3249_v49 = vpop.f32.mrf.mxu1  ;;  %1811 = vmax.xlane.f32.xlu0 %v1810_v48  ;;  %v3244_v55 = vpop.f32.mrf.mxu0 }
 0x4c2   :  { %v1799_v10 = vadd.f32 %v3767_v32, %v1791_v54 }
 0x4c3   :  { %v1577_v61 = vpop.f32.mrf.mxu1  ;;  %v1626_v40 = vpop.f32.mrf.mxu0 }
 0x4c4   :  { %v1792_v1 = vmul.f32 0.25, %v1626_v40  ;;  %v1813_v5 = vsel %vm898_vm3, %v1799_v10, -inf }
 0x4c5   :  { %v3250_v8 = vpop.f32.mrf.mxu1  ;;  %1814 = vmax.xlane.f32.xlu0 %v1813_v5  ;;  %v3255_v9 = vpop.f32.mrf.mxu0 }
 0x4c6   :  { %v4022_v20 = vadd.f32 %v3774_v45, %v1792_v1 }
 0x4c7   :  { %v1629_v28 = vpop.f32.mrf.mxu0  ;;  %v1678_v14 = vpop.f32.mrf.mxu1 }
 0x4c8   :  { %v1793_v17 = vmul.f32 0.25, %v1678_v14  ;;  %v1816_v33 = vsel %vm898_vm3, %v4022_v20, -inf }
 0x4c9   :  { %v3261_v30 = vpop.f32.mrf.mxu1  ;;  %1817 = vmax.xlane.f32.xlu1 %v1816_v33  ;;  %v3256_v32 = vpop.f32.mrf.mxu0 }
 0x4ca   :  { %v4027_v25 = vadd.f32 %v3781_v3, %v1793_v17 }
 0x4cb   :  { %v1681_v46 = vpop.f32.mrf.mxu1  ;;  %v1730_v42 = vpop.f32.mrf.mxu0 }
 0x4cc   :  { %v1794_v53 = vmul.f32 0.25, %v1730_v42  ;;  %v1819_v41 = vsel %vm898_vm3, %v4027_v25, -inf }
 0x4cd   :  { %v3262_v45 = vpop.f32.mrf.mxu1  ;;  %1820 = vmax.xlane.f32.xlu0 %v1819_v41  ;;  %v3267_v0 = vpop.f32.mrf.mxu0 }
 0x4ce   :  { %v1802_v6 = vadd.f32 %v3790_v18, %v1794_v53 }
 0x4cf   :  { %v1733_v12 = vpop.f32.mrf.mxu0  ;;  %v1782_v50 = vpop.f32.mrf.mxu1 }
 0x4d0   :  { %v1795_v52 = vmul.f32 0.25, %v1782_v50  ;;  %v1822_v21 = vsel %vm898_vm3, %v1802_v6, -inf }
 0x4d1   :  { %v3273_v56 = vpop.f32.mrf.mxu1  ;;  %1823 = vmax.xlane.f32.xlu1 %v1822_v21  ;;  %v3268_v3 = vpop.f32.mrf.mxu0 }
 0x4d2   :  { %v1803_v26 = vadd.f32 %v3798_v31, %v1795_v52 }
 0x4d3   :  { %v1785_v35 = vpop.f32.mrf.mxu1 }
 0x4d4   :  { %v1825_v44 = vsel %vm898_vm3, %v1803_v26, -inf }
 0x4d5   :  { %v3274_v11 = vpop.f32.mrf.mxu1  ;;  %1826 = vmax.xlane.f32.xlu0 %v1825_v44 }
 0x4e2   :  { %1999 = vrot.lane.b32.xlu1 %v3890_v57, %s3472_s2 }
 0x4e6   :  { %2048 = vrot.lane.b32.xlu1 %v3892_v19, %s3472_s2 }
 0x4eb   :  { %1950 = vrot.lane.b32.xlu0 %v3883_v13, %s3472_s2 }
 0x542   :  { %v1806_v18 = vpop.xlane.xlu0 %1805 }
 0x543   :  { %v1828_v15 = vsub.f32 %v4011_v58, %v1806_v18 }
 0x545   :  { %v1836_v60 = vmul.f32 1.442695, %v1828_v15 }
 0x546   :  { %v1809_v59 = vpop.xlane.xlu1 %1808 }
 0x547   :  { %3396 = vpow2.f32 %v1836_v60  ;;  %v1829_v31 = vsub.f32 %v1797_v34, %v1809_v59 }
 0x549   :  { %v1838_v22 = vmul.f32 1.442695, %v1829_v31 }
 0x54a   :  { %v1812_v23 = vpop.xlane.xlu0 %1811 }
 0x54b   :  { %3398 = vpow2.f32 %v1838_v22  ;;  %v1830_v24 = vsub.f32 %v1798_v38, %v1812_v23 }
 0x54d   :  { %v1840_v29 = vmul.f32 1.442695, %v1830_v24 }
 0x54e   :  { %v1815_v7 = vpop.xlane.xlu0 %1814 }
 0x54f   :  { %3400 = vpow2.f32 %v1840_v29  ;;  %v1831_v57 = vsub.f32 %v1799_v10, %v1815_v7 }
 0x551   :  { %v1842_v36 = vmul.f32 1.442695, %v1831_v57 }
 0x552   :  { %v1818_v48 = vpop.xlane.xlu1 %1817 }
 0x553   :  { %3402 = vpow2.f32 %v1842_v36  ;;  %v1832_v49 = vsub.f32 %v4022_v20, %v1818_v48  ;;  %v3360_v48 = vld [vmem:[%s4373_s8 + $0x8] sm:$0xff]  }
 0x554   :  { %v3397_v19 = vpop.eup %3396 }
 0x555   :  { %v1852_v13 = vsel %vm898_vm3, %v3397_v19, 0.0  ;;  %v1844_v61 = vmul.f32 1.442695, %v1832_v49 }
 0x556   :  { %1853 = vadd.xlane.f32.xlu1 %v1852_v13  ;;  %v1821_v27 = vpop.xlane.xlu0 %1820 }
 0x557   :  { %v1833_v10 = vsub.f32 %v4027_v25, %v1821_v27  ;;  %3404 = vpow2.f32 %v1844_v61 }
 0x558   :  { %v3399_v16 = vpop.eup %3398 }
 0x559   :  { %v1855_v58 = vsel %vm898_vm3, %v3399_v16, 0.0  ;;  %v1846_v1 = vmul.f32 1.442695, %v1833_v10 }
 0x55a   :  { %1856 = vadd.xlane.f32.xlu0 %v1855_v58  ;;  %v1824_v55 = vpop.xlane.xlu1 %1823 }
 0x55b   :  { %v1834_v40 = vsub.f32 %v1802_v6, %v1824_v55  ;;  %3406 = vpow2.f32 %v1846_v1 }
 0x55c   :  { %v4044_v34 = vpop.eup %3400 }
 0x55d   :  { %v1858_v4 = vsel %vm898_vm3, %v4044_v34, 0.0  ;;  %v1848_v5 = vmul.f32 1.442695, %v1834_v40 }
 0x55e   :  { %v1827_v2 = vpop.xlane.xlu0 %1826  ;;  %1859 = vadd.xlane.f32.xlu1 %v1858_v4  ;;  %v2000_v32 = vpop.permute.xlu1 %1999 }
 0x55f   :  { %v1835_v8 = vsub.f32 %v1803_v26, %v1827_v2  ;;  %3408 = vpow2.f32 %v1848_v5  ;;  %v2005_v50 = vsel %vm998_vm4, %v2000_v32, 0 }
 0x560   :  { %v4048_v38 = vpop.eup %3402 }
 0x561   :  { %v1861_v47 = vsel %vm898_vm3, %v4048_v38, 0.0  ;;  %v1850_v9 = vmul.f32 1.442695, %v1835_v8 }
 0x562   :  { %1862 = vadd.xlane.f32.xlu0 %v1861_v47  ;;  %v1951_v37 = vpop.permute.xlu0 %1950  ;;  %v2049_v25 = vpop.permute.xlu1 %2048 }
 0x563   :  { %v1956_v54 = vsel %vm998_vm4, %v1951_v37, 0  ;;  %3410 = vpow2.f32 %v1850_v9  ;;  %v2054_v21 = vsel %vm998_vm4, %v2049_v25, 0 }
 0x564   :  { %3282 = vmatpush3.bf16.msra.mxu1 %v1956_v54 }
 0x565   :  { %3293 = vmatprep.subr.bf16.mxu1 %v3470_v62 }
 0x56f   :  { %2146 = vrot.lane.b32.xlu1 %v3916_v39, %s3472_s2  ;;  %v4060_v39 = vpop.eup %3404 }
 0x570   :  { %v4062_v28 = vpop.eup %3406 }
 0x571   :  { %v4066_v20 = vpop.eup %3408  ;;  %v1867_v14 = vsel %vm898_vm3, %v4062_v28, 0.0 }
 0x572   :  { %v1870_v17 = vsel %vm898_vm3, %v4066_v20, 0.0  ;;  %v4072_v33 = vpop.eup %3410 }
 0x573   :  { %v1873_v30 = vsel %vm898_vm3, %v4072_v33, 0.0 }
 0x578   :  { %2097 = vrot.lane.b32.xlu0 %v3914_v63, %s3472_s2  ;;  %v1864_v63 = vsel %vm898_vm3, %v4060_v39, 0.0 }
 0x593   :  { %1865 = vadd.xlane.f32.xlu1 %v1864_v63 }
 0x597   :  { %1868 = vadd.xlane.f32.xlu0 %v1867_v14  ;;  %1871 = vadd.xlane.f32.xlu1 %v1870_v17 }
 0x59b   :  { %1874 = vadd.xlane.f32.xlu0 %v1873_v30 }
 0x5a8   :  { %2244 = vrot.lane.b32.xlu1 %v3944_v43, %s3472_s2 }
 0x5b1   :  { %2195 = vrot.lane.b32.xlu0 %v3933_v51, %s3472_s2 }
 0x5df   :  { %v1854_v46 = vpop.xlane.xlu1 %1853 }
 0x5e0   :  { %3412 = vrcp.f32 %v1854_v46 }
 0x5e3   :  { %v1857_v42 = vpop.xlane.xlu0 %1856 }
 0x5e4   :  { %3414 = vrcp.f32 %v1857_v42 }
 0x5e7   :  { %v1860_v53 = vpop.xlane.xlu1 %1859 }
 0x5e8   :  { %3416 = vrcp.f32 %v1860_v53 }
 0x5eb   :  { %v1863_v41 = vpop.xlane.xlu0 %1862  ;;  %v2147_v18 = vpop.permute.xlu1 %2146 }
 0x5ec   :  { %3418 = vrcp.f32 %v1863_v41  ;;  %v2152_v60 = vsel %vm998_vm4, %v2147_v18, 0  ;;  %v2450_v18 = vld [vmem:[%s4374_s3 + $0x38] sm:$0xff] }
 0x5ed   :  { %v3413_v45 = vpop.eup %3412 }
 0x5ee   :  { %v1884_v0 = vmul.f32 %v3413_v45, %v3397_v19 }
 0x5ef   :  { %v2098_v3 = vpop.permute.xlu0 %2097 }
 0x5f0   :  { %v1892_v6 = vpack.c.bf16 %v1884_v0, %v1884_v0  ;;  %v2103_v44 = vsel %vm998_vm4, %v2098_v3, 0 }
 0x5f1   :  { %v3415_v12 = vpop.eup %3414 }
 0x5f2   :  { %3278 = vmatmul.mubr.msk.bf16.vlgmr.msra.gmra.mxu0 %vm898_vm3, %v1892_v6  ;;  %v1885_v43 = vmul.f32 %v3415_v12, %v3399_v16  ;;  %v3474_v6 = vmov 0   ;;  %v2443_v12 = vld [vmem:[%s4374_s3] sm:$0xff] }
 0x5f3   :  { %3288 = vmatpush3.bf16.msra.mxu0 %v2005_v50  ;;  %3289 = vmatprep.mubr.msk.bf16.mxu0 %vm3471_vm1, %v3470_v62 }
 0x5f4   :  { %v1893_v51 = vpack.c.bf16 %v1885_v43, %v1885_v43  ;;  %3299 = vmatprep.subr.bf16.mxu0 %v3470_v62  ;;  %3355 = vset.pattern.permute.xlu1 %v3474_v6 }
 0x5f5   :  { %v3417_v52 = vpop.eup %3416  ;;  %3354 = vset.pattern.permute.xlu0 %v3474_v6 }
 0x5f6   :  { %3284 = vmatmul.mubr.msk.bf16.vlgmr.msra.gmra.mxu1 %vm898_vm3, %v1893_v51  ;;  %v1886_v56 = vmul.f32 %v3417_v52, %v4044_v34 }
 0x5f7   :  { %3294 = vmatpush3.bf16.msra.mxu1 %v2054_v21  ;;  %3295 = vmatprep.mubr.msk.bf16.mxu1 %vm3471_vm1, %v3470_v62  ;;  %v2444_v21 = vld [vmem:[%s4374_s3 + $0x8] sm:$0xff] }
 0x5f8   :  { %v1894_v26 = vpack.c.bf16 %v1886_v56, %v1886_v56  ;;  %3305 = vmatprep.subr.bf16.mxu1 %v3470_v62  ;;  %v2446_v56 = vld [vmem:[%s4374_s3 + $0x18] sm:$0xff] }
 0x5f9   :  { %v3419_v35 = vpop.eup %3418 }
 0x5fa   :  { %3290 = vmatmul.mubr.msk.bf16.vlgmr.msra.gmra.mxu0 %vm898_vm3, %v1894_v26  ;;  %v1887_v11 = vmul.f32 %v3419_v35, %v4048_v38  ;;  %v2445_v35 = vld [vmem:[%s4374_s3 + $0x10] sm:$0xff] }
 0x5fb   :  { %3300 = vmatpush3.bf16.msra.mxu0 %v2103_v44  ;;  %3301 = vmatprep.mubr.msk.bf16.mxu0 %vm3471_vm1, %v3470_v62  ;;  %v2448_v44 = vld [vmem:[%s4374_s3 + $0x28] sm:$0xff] }
 0x5fc   :  { %v1895_v15 = vpack.c.bf16 %v1887_v11, %v1887_v11  ;;  %3311 = vmatprep.subr.bf16.mxu0 %v3470_v62  ;;  %v2447_v11 = vld [vmem:[%s4374_s3 + $0x20] sm:$0xff] }
 0x5fe   :  { %3296 = vmatmul.mubr.msk.bf16.vlgmr.msra.gmra.mxu1 %vm898_vm3, %v1895_v15  ;;  %v2449_v15 = vld [vmem:[%s4374_s3 + $0x30] sm:$0xff] }
 0x5ff   :  { %3306 = vmatpush3.bf16.msra.mxu1 %v2152_v60  ;;  %3307 = vmatprep.mubr.msk.bf16.mxu1 %vm3471_vm1, %v3470_v62 }
 0x600   :  { %3317 = vmatprep.subr.bf16.mxu1 %v3470_v62 }
 0x61c   :  { %v1866_v59 = vpop.xlane.xlu1 %1865 }
 0x61d   :  { %3420 = vrcp.f32 %v1866_v59 }
 0x620   :  { %v1869_v31 = vpop.xlane.xlu0 %1868  ;;  %v1872_v22 = vpop.xlane.xlu1 %1871 }
 0x621   :  { %3422 = vrcp.f32 %v1869_v31 }
 0x622   :  { %3424 = vrcp.f32 %v1872_v22 }
 0x624   :  { %v1875_v23 = vpop.xlane.xlu0 %1874  ;;  %v2245_v58 = vpop.permute.xlu1 %2244 }
 0x625   :  { %3426 = vrcp.f32 %v1875_v23  ;;  %v2250_v2 = vsel %vm998_vm4, %v2245_v58, 0 }
 0x628   :  { %v2196_v7 = vpop.permute.xlu0 %2195 }
 0x629   :  { %v2201_v13 = vsel %vm998_vm4, %v2196_v7, 0 }
 0x62a   :  { %v3421_v24 = vpop.eup %3420 }
 0x62b   :  { %v1888_v29 = vmul.f32 %v3421_v24, %v4060_v39 }
 0x62d   :  { %v1896_v57 = vpack.c.bf16 %v1888_v29, %v1888_v29 }
 0x62e   :  { %v3423_v36 = vpop.eup %3422 }
 0x62f   :  { %v3425_v19 = vpop.eup %3424  ;;  %3302 = vmatmul.mubr.msk.bf16.vlgmr.msra.gmra.mxu0 %vm898_vm3, %v1896_v57  ;;  %v1889_v16 = vmul.f32 %v3423_v36, %v4062_v28 }
 0x630   :  { %3312 = vmatpush3.bf16.msra.mxu0 %v2201_v13  ;;  %3313 = vmatprep.mubr.msk.bf16.mxu0 %vm3471_vm1, %v3470_v62  ;;  %v1890_v34 = vmul.f32 %v3425_v19, %v4066_v20 }
 0x631   :  { %v1897_v27 = vpack.c.bf16 %v1889_v16, %v1889_v16  ;;  %3323 = vmatprep.subr.bf16.mxu0 %v3360_v48 }
 0x632   :  { %v3427_v4 = vpop.eup %3426  ;;  %v1898_v38 = vpack.c.bf16 %v1890_v34, %v1890_v34 }
 0x633   :  { %3308 = vmatmul.mubr.msk.bf16.vlgmr.msra.gmra.mxu1 %vm898_vm3, %v1897_v27  ;;  %v1891_v47 = vmul.f32 %v3427_v4, %v4072_v33 }
 0x634   :  { %3318 = vmatpush3.bf16.msra.mxu1 %v2250_v2  ;;  %3319 = vmatprep.mubr.msk.bf16.mxu1 %vm3471_vm1, %v3470_v62  ;;  %v3361_v62 = vld [vmem:[%s4373_s8] sm:$0xff]  }
 0x635   :  { %v1899_v37 = vpack.c.bf16 %v1891_v47, %v1891_v47 }
 0x637   :  { %3314 = vmatmul.mubr.msk.bf16.vlgmr.msra.gmra.mxu0 %vm898_vm3, %v1898_v38 }
 0x638   :  { %3324 = vmatpush3.bf16.msra.mxu0 %v3360_v48 }
 0x639   :  { %3325 = vmatprep.subr.bf16.mxu0 %v3361_v62 }
 0x63b   :  { %3320 = vmatmul.mubr.msk.bf16.vlgmr.msra.gmra.mxu1 %vm898_vm3, %v1899_v37 }
 0x63c   :  { %3326 = vmatpush3.bf16.msra.mxu0 %v3361_v62 }
 0x6b2   :  { %v1943_v54 = vpop.f32.mrf.mxu0 }
 0x6b3   :  { %2300 = vrot.lane.b32.xlu0 %v1943_v54, %s3473_s17 }
 0x6b4   :  { %v3279_v49 = vpop.f32.mrf.mxu0 }
 0x6b5   :  { %v2961_v49 = vld [vmem:[%s4375_s9] ss:$0 sm:$0xff] }
 0x6b6   :  { %v1946_v55 = vpop.f32.mrf.mxu0  ;;  %v1992_v10 = vpop.f32.mrf.mxu1 }
 0x6b7   :  { %2302 = vrot.lane.b32.xlu1 %v1992_v10, %s3473_s17 }
 0x6b8   :  { %v3280_v61 = vpop.f32.mrf.mxu0  ;;  %v3285_v40 = vpop.f32.mrf.mxu1 }
 0x6ba   :  { %v1995_v1 = vpop.f32.mrf.mxu1  ;;  %v2041_v5 = vpop.f32.mrf.mxu0 }
 0x6bb   :  { %2304 = vrot.lane.b32.xlu0 %v2041_v5, %s3473_s17 }
 0x6bc   :  { %v3286_v8 = vpop.f32.mrf.mxu1  ;;  %v3291_v9 = vpop.f32.mrf.mxu0 }
 0x6be   :  { %v2044_v39 = vpop.f32.mrf.mxu0  ;;  %v2090_v28 = vpop.f32.mrf.mxu1 }
 0x6bf   :  { %2306 = vrot.lane.b32.xlu1 %v2090_v28, %s3473_s17 }
 0x6c0   :  { %v3292_v63 = vpop.f32.mrf.mxu0  ;;  %v3297_v20 = vpop.f32.mrf.mxu1 }
 0x6c1   :  { %v3460_v63 = vld [vmem:[%s4369_s0] sm:$0xff] }
 0x6c2   :  { %v2093_v14 = vpop.f32.mrf.mxu1 }
 0x6c4   :  { %v3298_v17 = vpop.f32.mrf.mxu1 }
 0x6ef   :  { %v2139_v33 = vpop.f32.mrf.mxu0 }
 0x6f0   :  { %2308 = vrot.lane.b32.xlu0 %v2139_v33, %s3473_s17 }
 0x6f1   :  { %v3303_v30 = vpop.f32.mrf.mxu0 }
 0x6f2   :  { %v3461_v30 = vld [vmem:[%s4369_s0 + $0x18] sm:$0xff] }
 0x6f3   :  { %v2142_v32 = vpop.f32.mrf.mxu0  ;;  %v2188_v25 = vpop.f32.mrf.mxu1 }
 0x6f4   :  { %2310 = vrot.lane.b32.xlu1 %v2188_v25, %s3473_s17  ;;  %v3462_v25 = vld [vmem:[%s4369_s0 + $0x8] sm:$0xff] }
 0x6f5   :  { %v3304_v46 = vpop.f32.mrf.mxu0  ;;  %v3309_v42 = vpop.f32.mrf.mxu1 }
 0x6f7   :  { %v2191_v53 = vpop.f32.mrf.mxu1  ;;  %v2237_v41 = vpop.f32.mrf.mxu0 }
 0x6f8   :  { %2312 = vrot.lane.b32.xlu0 %v2237_v41, %s3473_s17  ;;  %v3463_v41 = vld [vmem:[%s4369_s0 + $0x10] sm:$0xff] }
 0x6f9   :  { %v3310_v45 = vpop.f32.mrf.mxu1  ;;  %v3315_v0 = vpop.f32.mrf.mxu0 }
 0x6fb   :  { %v2240_v50 = vpop.f32.mrf.mxu0  ;;  %v2286_v43 = vpop.f32.mrf.mxu1 }
 0x6fc   :  { %2314 = vrot.lane.b32.xlu1 %v2286_v43, %s3473_s17  ;;  %2453 = vperm.xlu0 %3354, %v2443_v12  }
 0x6fd   :  { %v3316_v51 = vpop.f32.mrf.mxu0  ;;  %v3321_v52 = vpop.f32.mrf.mxu1 }
 0x6ff   :  { %v2289_v3 = vpop.f32.mrf.mxu1 }
 0x700   :  { %2458 = vperm.xlu1 %3355, %v2444_v21   ;;  %2468 = vperm.xlu0 %3354, %v2446_v56  }
 0x701   :  { %v3322_v26 = vpop.f32.mrf.mxu1 }
 0x704   :  { %2463 = vperm.xlu1 %3355, %v2445_v35   ;;  %2478 = vperm.xlu0 %3354, %v2448_v44  }
 0x708   :  { %2473 = vperm.xlu1 %3355, %v2447_v11   ;;  %2488 = vperm.xlu0 %3354, %v2450_v18   ;;  %v3464_v18 = vld [vmem:[%s4369_s0 + $0x20] sm:$0xff] }
 0x70c   :  { %2483 = vperm.xlu1 %3355, %v2449_v15  }
 0x725   :  { %v2301_v60 = vpop.permute.xlu0 %2300 }
 0x726   :  { %2325 = vst.msk [vmem:[#allocation2] sm:$0xff] %vm2324_vm5, %v2301_v60 }
 0x729   :  { %v2303_v59 = vpop.permute.xlu1 %2302 }
 0x72a   :  { %2326 = vst.msk [vmem:[#allocation2 + $0x8] sm:$0xff] %vm2324_vm5, %v2303_v59 }
 0x72d   :  { %v2305_v31 = vpop.permute.xlu0 %2304  ;;  %v2333_v23 = vld [vmem:[#allocation2] sm:$0xff] }
 0x72e   :  { %2327 = vst.msk [vmem:[#allocation2 + $0x10] sm:$0xff] %vm2324_vm5, %v2305_v31 }
 0x731   :  { %v2307_v22 = vpop.permute.xlu1 %2306  ;;  %v2334_v24 = vld [vmem:[#allocation2 + $0x8] sm:$0xff] }
 0x732   :  { %2328 = vst.msk [vmem:[#allocation2 + $0x18] sm:$0xff] %vm2324_vm5, %v2307_v22  ;;  %v2341_v29 = vpack.c.bf16 %v2334_v24, %v2333_v23  ;;  %v3465_v23 = vld [vmem:[%s4369_s0 + $0x30] sm:$0xff] }
 0x734   :  { %3327 = vmatprep.mubr.msk.bf16.mxu0 %vm83_vm0, %v2341_v29  ;;  %v3466_v29 = vld [vmem:[%s4369_s0 + $0x28] sm:$0xff] }
 0x735   :  { %v2335_v7 = vld [vmem:[#allocation2 + $0x10] sm:$0xff] }
 0x739   :  { %v2336_v57 = vld [vmem:[#allocation2 + $0x18] sm:$0xff] }
 0x73a   :  { %v2342_v36 = vpack.c.bf16 %v2336_v57, %v2335_v7 }
 0x73c   :  { %3328 = vmatmul.mubr.msk.bf16.vlgmr.msra.gmra.mxu0 %vm83_vm0, %v2342_v36 }
 0x762   :  { %v2309_v19 = vpop.permute.xlu0 %2308 }
 0x763   :  { %2329 = vst.msk [vmem:[#allocation2 + $0x20] sm:$0xff] %vm2324_vm5, %v2309_v19  ;;  %v3467_v19 = vld [vmem:[%s4369_s0 + $0x38] sm:$0xff] }
 0x766   :  { %v2311_v13 = vpop.permute.xlu1 %2310 }
 0x767   :  { %2330 = vst.msk [vmem:[#allocation2 + $0x28] sm:$0xff] %vm2324_vm5, %v2311_v13 }
 0x76a   :  { %v2313_v16 = vpop.permute.xlu0 %2312  ;;  %v2337_v27 = vld [vmem:[#allocation2 + $0x20] sm:$0xff] }
 0x76b   :  { %2331 = vst.msk [vmem:[#allocation2 + $0x30] sm:$0xff] %vm2324_vm5, %v2313_v16 }
 0x76e   :  { %v2315_v58 = vpop.permute.xlu1 %2314  ;;  %v2338_v34 = vld [vmem:[#allocation2 + $0x28] sm:$0xff] }
 0x76f   :  { %2332 = vst.msk [vmem:[#allocation2 + $0x38] sm:$0xff] %vm2324_vm5, %v2315_v58  ;;  %v2343_v4 = vpack.c.bf16 %v2338_v34, %v2337_v27 }
 0x771   :  { %3331 = vmatprep.mubr.msk.bf16.mxu0 %vm83_vm0, %v2343_v4 }
 0x772   :  { %v2339_v2 = vld [vmem:[#allocation2 + $0x30] sm:$0xff] }
 0x776   :  { %v2340_v38 = vld [vmem:[#allocation2 + $0x38] sm:$0xff] }
 0x777   :  { %v2344_v47 = vpack.c.bf16 %v2340_v38, %v2339_v2  ;;  %v2454_v37 = vpop.permute.xlu0 %2453 }
 0x779   :  { %3332 = vmatmul.mubr.msk.bf16.gmra.mxu0 %vm83_vm0, %v2344_v47 }
 0x77b   :  { %v2459_v54 = vpop.permute.xlu1 %2458  ;;  %v2469_v61 = vpop.permute.xlu0 %2468 }
 0x77f   :  { %v2464_v8 = vpop.permute.xlu1 %2463  ;;  %v2479_v43 = vpop.permute.xlu0 %2478 }
 0x783   :  { %v2474_v6 = vpop.permute.xlu1 %2473  ;;  %v2489_v60 = vpop.permute.xlu0 %2488 }
 0x787   :  { %v2484_v21 = vpop.permute.xlu1 %2483 }
 0x7fc   :  { %v3329_v48 = vpop.f32.mrf.mxu0 }
 0x7fd   :  { %v2421_v40 = vadd.f32 %v3329_v48, %v2961_v49 }
 0x7fe   :  { %v2412_v62 = vpop.f32.mrf.mxu0 }
 0x7ff   :  { %v2413_v55 = vadd.f32 %v2961_v49, %v2412_v62  ;;  %v2493_v14 = vmul.f32 %v2464_v8, %v2421_v40 }
 0x800   :  { %v3330_v10 = vpop.f32.mrf.mxu0 }
 0x801   :  { %v2491_v1 = vmul.f32 %v2454_v37, %v2413_v55  ;;  %v2424_v5 = vadd.f32 %v3330_v10, %v2961_v49  ;;  %v2501_v45 = vadd.f32 %v3463_v41, %v2493_v14 }
 0x802   :  { %v2415_v9 = vpop.f32.mrf.mxu0 }
 0x803   :  { %v2494_v39 = vmul.f32 %v2469_v61, %v2424_v5  ;;  %v2416_v28 = vadd.f32 %v2961_v49, %v2415_v9  ;;  %v2499_v20 = vadd.f32 %v3460_v63, %v2491_v1  ;;  %v2515_v0 = vsel %vm83_vm0, %v2501_v45, 0.0 }
 0x805   :  { %v2492_v17 = vmul.f32 %v2459_v54, %v2416_v28  ;;  %v2509_v33 = vsel %vm83_vm0, %v2499_v20, 0.0  ;;  %v2502_v32 = vadd.f32 %v3461_v30, %v2494_v39  ;;  %v3362_v39 = vld [vmem:[%s4373_s8 + $0x18] sm:$0xff]   ;;  %v3363_v28 = vld [vmem:[%s4373_s8 + $0x10] sm:$0xff]  }
 0x806   :  { %2510 = vadd.xlane.f32.xlu1 %v2509_v33  ;;  %3335 = vmatprep.subr.bf16.mxu1 %v3362_v39 }
 0x807   :  { %v2500_v46 = vadd.f32 %v3462_v25, %v2492_v17  ;;  %v2518_v53 = vsel %vm83_vm0, %v2502_v32, 0.0  ;;  %3336 = vmatpush3.bf16.msra.mxu1 %v3362_v39 }
 0x808   :  { %3337 = vmatprep.subr.bf16.mxu1 %v3363_v28 }
 0x809   :  { %v2512_v42 = vsel %vm83_vm0, %v2500_v46, 0.0 }
 0x80a   :  { %2513 = vadd.xlane.f32.xlu0 %v2512_v42  ;;  %2519 = vadd.xlane.f32.xlu1 %v2518_v53 }
 0x80b   :  { %3338 = vmatpush3.bf16.msra.mxu1 %v3363_v28 }
 0x80e   :  { %2516 = vadd.xlane.f32.xlu0 %v2515_v0 }
 0x839   :  { %v3333_v12 = vpop.f32.mrf.mxu0 }
 0x83a   :  { %v2437_v50 = vadd.f32 %v3333_v12, %v2961_v49 }
 0x83b   :  { %v2428_v51 = vpop.f32.mrf.mxu0 }
 0x83c   :  { %v2429_v52 = vadd.f32 %v2961_v49, %v2428_v51  ;;  %v2497_v3 = vmul.f32 %v2484_v21, %v2437_v50 }
 0x83d   :  { %v3334_v56 = vpop.f32.mrf.mxu0 }
 0x83e   :  { %v2495_v26 = vmul.f32 %v2474_v6, %v2429_v52  ;;  %v2440_v35 = vadd.f32 %v3334_v56, %v2961_v49  ;;  %v2505_v24 = vadd.f32 %v3465_v23, %v2497_v3 }
 0x83f   :  { %v2431_v44 = vpop.f32.mrf.mxu0 }
 0x840   :  { %v2432_v11 = vadd.f32 %v2961_v49, %v2431_v44  ;;  %v2503_v15 = vadd.f32 %v3464_v18, %v2495_v26  ;;  %v2498_v59 = vmul.f32 %v2489_v60, %v2440_v35  ;;  %v2527_v57 = vsel %vm83_vm0, %v2505_v24, 0.0 }
 0x842   :  { %v2496_v31 = vmul.f32 %v2479_v43, %v2432_v11  ;;  %v2521_v22 = vsel %vm83_vm0, %v2503_v15, 0.0  ;;  %v2506_v13 = vadd.f32 %v3467_v19, %v2498_v59 }
 0x843   :  { %2522 = vadd.xlane.f32.xlu0 %v2521_v22 }
 0x844   :  { %v2504_v7 = vadd.f32 %v3466_v29, %v2496_v31  ;;  %v2530_v16 = vsel %vm83_vm0, %v2506_v13, 0.0 }
 0x846   :  { %v2524_v36 = vsel %vm83_vm0, %v2504_v7, 0.0 }
 0x847   :  { %2528 = vadd.xlane.f32.xlu0 %v2527_v57  ;;  %2525 = vadd.xlane.f32.xlu1 %v2524_v36  ;;  %v2969_v36 = vld [vmem:[%s4375_s9 + $0x3] ss:$0 sm:$0xff] }
 0x84b   :  { %2531 = vadd.xlane.f32.xlu1 %v2530_v16 }
 0x88f   :  { %v2511_v58 = vpop.xlane.xlu1 %2510 }
 0x890   :  { %v2534_v27 = vmul.f32 0.03125, %v2511_v58 }
 0x892   :  { %v4201_v34 = vsub.f32 %v2499_v20, %v2534_v27 }
 0x893   :  { %v2514_v4 = vpop.xlane.xlu0 %2513  ;;  %v2520_v2 = vpop.xlane.xlu1 %2519 }
 0x894   :  { %v2535_v38 = vmul.f32 0.03125, %v2514_v4  ;;  %v2537_v47 = vmul.f32 0.03125, %v2520_v2  ;;  %v2550_v37 = vmul.f32 %v4201_v34, %v4201_v34 }
 0x896   :  { %v4205_v54 = vsub.f32 %v2500_v46, %v2535_v38  ;;  %v4207_v48 = vsub.f32 %v2502_v32, %v2537_v47  ;;  %v2558_v49 = vsel %vm83_vm0, %v2550_v37, 0.0 }
 0x897   :  { %v2517_v62 = vpop.xlane.xlu0 %2516  ;;  %2559 = vadd.xlane.f32.xlu0 %v2558_v49 }
 0x898   :  { %v2536_v55 = vmul.f32 0.03125, %v2517_v62  ;;  %v2551_v10 = vmul.f32 %v4205_v54, %v4205_v54  ;;  %v2553_v1 = vmul.f32 %v4207_v48, %v4207_v48 }
 0x89a   :  { %v4212_v61 = vsub.f32 %v2501_v45, %v2536_v55  ;;  %v2561_v40 = vsel %vm83_vm0, %v2551_v10, 0.0  ;;  %v2567_v9 = vsel %vm83_vm0, %v2553_v1, 0.0 }
 0x89b   :  { %2562 = vadd.xlane.f32.xlu1 %v2561_v40 }
 0x89c   :  { %v2552_v5 = vmul.f32 %v4212_v61, %v4212_v61 }
 0x89e   :  { %v2564_v8 = vsel %vm83_vm0, %v2552_v5, 0.0 }
 0x89f   :  { %2565 = vadd.xlane.f32.xlu0 %v2564_v8  ;;  %2568 = vadd.xlane.f32.xlu1 %v2567_v9 }
 0x8cc   :  { %v2523_v63 = vpop.xlane.xlu0 %2522 }
 0x8cd   :  { %v2538_v20 = vmul.f32 0.03125, %v2523_v63 }
 0x8cf   :  { %v4227_v14 = vsub.f32 %v2503_v15, %v2538_v20 }
 0x8d0   :  { %v2529_v17 = vpop.xlane.xlu0 %2528  ;;  %v2526_v33 = vpop.xlane.xlu1 %2525 }
 0x8d1   :  { %v2540_v30 = vmul.f32 0.03125, %v2529_v17  ;;  %v2539_v32 = vmul.f32 0.03125, %v2526_v33  ;;  %v2554_v25 = vmul.f32 %v4227_v14, %v4227_v14 }
 0x8d3   :  { %v4231_v46 = vsub.f32 %v2505_v24, %v2540_v30  ;;  %v4233_v42 = vsub.f32 %v2504_v7, %v2539_v32  ;;  %v2570_v53 = vsel %vm83_vm0, %v2554_v25, 0.0  ;;  %v2968_v24 = vld [vmem:[%s4375_s9 + $0x2] ss:$0 sm:$0xff] }
 0x8d4   :  { %2571 = vadd.xlane.f32.xlu0 %v2570_v53  ;;  %v2532_v41 = vpop.xlane.xlu1 %2531 }
 0x8d5   :  { %v2541_v45 = vmul.f32 0.03125, %v2532_v41  ;;  %v2556_v0 = vmul.f32 %v4231_v46, %v4231_v46  ;;  %v2555_v6 = vmul.f32 %v4233_v42, %v4233_v42 }
 0x8d7   :  { %v4240_v12 = vsub.f32 %v2506_v13, %v2541_v45  ;;  %v2576_v50 = vsel %vm83_vm0, %v2556_v0, 0.0  ;;  %v2573_v43 = vsel %vm83_vm0, %v2555_v6, 0.0 }
 0x8d8   :  { %2577 = vadd.xlane.f32.xlu0 %v2576_v50  ;;  %2574 = vadd.xlane.f32.xlu1 %v2573_v43 }
 0x8d9   :  { %v2557_v51 = vmul.f32 %v4240_v12, %v4240_v12 }
 0x8db   :  { %v2579_v52 = vsel %vm83_vm0, %v2557_v51, 0.0 }
 0x8dc   :  { %2580 = vadd.xlane.f32.xlu1 %v2579_v52 }
 0x920   :  { %v2560_v21 = vpop.xlane.xlu0 %2559 }
 0x921   :  { %v2582_v56 = vmul.f32 0.03125, %v2560_v21 }
 0x923   :  { %v2590_v3 = vadd.f32 1e-05, %v2582_v56 }
 0x924   :  { %v2563_v26 = vpop.xlane.xlu1 %2562 }
 0x925   :  { %3428 = vrsqrt.f32 %v2590_v3  ;;  %v2583_v35 = vmul.f32 0.03125, %v2563_v26 }
 0x927   :  { %v2591_v44 = vadd.f32 1e-05, %v2583_v35 }
 0x928   :  { %v2566_v11 = vpop.xlane.xlu0 %2565  ;;  %v2569_v18 = vpop.xlane.xlu1 %2568 }
 0x929   :  { %3430 = vrsqrt.f32 %v2591_v44  ;;  %v2584_v15 = vmul.f32 0.03125, %v2566_v11  ;;  %v2585_v60 = vmul.f32 0.03125, %v2569_v18 }
 0x92b   :  { %v2592_v59 = vadd.f32 1e-05, %v2584_v15  ;;  %v2593_v31 = vadd.f32 1e-05, %v2585_v60 }
 0x92d   :  { %3432 = vrsqrt.f32 %v2592_v59 }
 0x92e   :  { %3434 = vrsqrt.f32 %v2593_v31 }
 0x932   :  { %v3429_v22 = vpop.eup %3428 }
 0x933   :  { %v2606_v23 = vmul.f32 %v3429_v22, %v4201_v34 }
 0x935   :  { %v2618_v57 = vmul.f32 %v2968_v24, %v2606_v23 }
 0x936   :  { %v3431_v29 = vpop.eup %3430 }
 0x937   :  { %v2607_v7 = vmul.f32 %v3431_v29, %v4205_v54  ;;  %v2630_v27 = vadd.f32 %v2969_v36, %v2618_v57 }
 0x939   :  { %v2619_v19 = vmul.f32 %v2968_v24, %v2607_v7 }
 0x93a   :  { %v3433_v13 = vpop.eup %3432 }
 0x93b   :  { %v3435_v16 = vpop.eup %3434  ;;  %v2608_v58 = vmul.f32 %v3433_v13, %v4212_v61  ;;  %v4256_v4 = vadd.f32 %v2969_v36, %v2619_v19 }
 0x93c   :  { %v2609_v34 = vmul.f32 %v3435_v16, %v4207_v48 }
 0x93d   :  { %v2638_v2 = vpack.c.bf16 %v4256_v4, %v2630_v27  ;;  %v2620_v38 = vmul.f32 %v2968_v24, %v2608_v58 }
 0x93e   :  { %v2621_v47 = vmul.f32 %v2968_v24, %v2609_v34 }
 0x93f   :  { %3339 = vmatprep.mubr.msk.bf16.mxu1 %vm83_vm0, %v2638_v2  ;;  %v2632_v37 = vadd.f32 %v2969_v36, %v2620_v38 }
 0x940   :  { %v2633_v54 = vadd.f32 %v2969_v36, %v2621_v47 }
 0x942   :  { %v2639_v49 = vpack.c.bf16 %v2633_v54, %v2632_v37 }
 0x944   :  { %3340 = vmatmul.mubr.msk.bf16.vlgmr.msra.gmra.mxu1 %vm83_vm0, %v2639_v49 }
 0x95d   :  { %v2572_v62 = vpop.xlane.xlu0 %2571 }
 0x95e   :  { %v2586_v55 = vmul.f32 0.03125, %v2572_v62 }
 0x960   :  { %v2594_v10 = vadd.f32 1e-05, %v2586_v55 }
 0x961   :  { %v2578_v61 = vpop.xlane.xlu0 %2577  ;;  %v2575_v40 = vpop.xlane.xlu1 %2574 }
 0x962   :  { %3436 = vrsqrt.f32 %v2594_v10  ;;  %v2588_v1 = vmul.f32 0.03125, %v2578_v61  ;;  %v2587_v5 = vmul.f32 0.03125, %v2575_v40 }
 0x964   :  { %v2596_v48 = vadd.f32 1e-05, %v2588_v1  ;;  %v2595_v8 = vadd.f32 1e-05, %v2587_v5 }
 0x965   :  { %v2581_v9 = vpop.xlane.xlu1 %2580 }
 0x966   :  { %3438 = vrsqrt.f32 %v2596_v48  ;;  %v2589_v39 = vmul.f32 0.03125, %v2581_v9 }
 0x967   :  { %3440 = vrsqrt.f32 %v2595_v8 }
 0x968   :  { %v2597_v28 = vadd.f32 1e-05, %v2589_v39 }
 0x96a   :  { %3442 = vrsqrt.f32 %v2597_v28 }
 0x96f   :  { %v3437_v63 = vpop.eup %3436 }
 0x970   :  { %v2610_v20 = vmul.f32 %v3437_v63, %v4227_v14 }
 0x972   :  { %v2622_v25 = vmul.f32 %v2968_v24, %v2610_v20 }
 0x973   :  { %v3439_v17 = vpop.eup %3438 }
 0x974   :  { %v3441_v33 = vpop.eup %3440  ;;  %v2612_v30 = vmul.f32 %v3439_v17, %v4231_v46  ;;  %v2634_v6 = vadd.f32 %v2969_v36, %v2622_v25  ;;  %v2974_v46 = vld [vmem:[%s4375_s9 + $0x1] ss:$0 sm:$0xff] }
 0x975   :  { %v2611_v32 = vmul.f32 %v3441_v33, %v4233_v42 }
 0x976   :  { %v2624_v0 = vmul.f32 %v2968_v24, %v2612_v30 }
 0x977   :  { %v3443_v53 = vpop.eup %3442  ;;  %v2623_v41 = vmul.f32 %v2968_v24, %v2611_v32 }
 0x978   :  { %v2613_v45 = vmul.f32 %v3443_v53, %v4240_v12  ;;  %v2636_v52 = vadd.f32 %v2969_v36, %v2624_v0 }
 0x979   :  { %v2635_v50 = vadd.f32 %v2969_v36, %v2623_v41 }
 0x97a   :  { %v2625_v43 = vmul.f32 %v2968_v24, %v2613_v45 }
 0x97b   :  { %v2640_v51 = vpack.c.bf16 %v2635_v50, %v2634_v6 }
 0x97c   :  { %v2637_v21 = vadd.f32 %v2969_v36, %v2625_v43 }
 0x97d   :  { %3343 = vmatprep.mubr.msk.bf16.mxu1 %vm83_vm0, %v2640_v51 }
 0x97e   :  { %v2641_v14 = vpack.c.bf16 %v2637_v21, %v2636_v52 }
 0x980   :  { %3344 = vmatmul.mubr.msk.bf16.gmra.mxu1 %vm83_vm0, %v2641_v14 }
 0xa04   :  { %v3341_v42 = vpop.f32.mrf.mxu1 }
 0xa05   :  { %v2719_v56 = vadd.f32 %v3341_v42, %v2974_v46 }
 0xa06   :  { %v2710_v3 = vpop.f32.mrf.mxu1 }
 0xa07   :  { %v2743_v12 = vmax.f32 %v2719_v56, 0.0  ;;  %v2711_v26 = vadd.f32 %v2974_v46, %v2710_v3 }
 0xa08   :  { %v3342_v35 = vpop.f32.mrf.mxu1 }
 0xa09   :  { %v2741_v44 = vmax.f32 %v2711_v26, 0.0  ;;  %v2722_v11 = vadd.f32 %v3342_v35, %v2974_v46  ;;  %v2751_v18 = vadd.f32 %v2743_v12, %v2632_v37 }
 0xa0a   :  { %v2713_v15 = vpop.f32.mrf.mxu1 }
 0xa0b   :  { %v2744_v60 = vmax.f32 %v2722_v11, 0.0  ;;  %v2714_v59 = vadd.f32 %v2974_v46, %v2713_v15  ;;  %v2765_v31 = vsel %vm83_vm0, %v2751_v18, 0.0  ;;  %v2749_v22 = vadd.f32 %v2741_v44, %v2630_v27 }
 0xa0c   :  { %2766 = vadd.xlane.f32.xlu0 %v2765_v31 }
 0xa0d   :  { %v2742_v23 = vmax.f32 %v2714_v59, 0.0  ;;  %v2752_v24 = vadd.f32 %v2744_v60, %v2633_v54  ;;  %v2759_v7 = vsel %vm83_vm0, %v2749_v22, 0.0 }
 0xa0f   :  { %v2768_v29 = vsel %vm83_vm0, %v2752_v24, 0.0  ;;  %v2750_v57 = vadd.f32 %v2742_v23, %v4256_v4 }
 0xa10   :  { %2769 = vadd.xlane.f32.xlu1 %v2768_v29  ;;  %2760 = vadd.xlane.f32.xlu0 %v2759_v7 }
 0xa11   :  { %v2762_v36 = vsel %vm83_vm0, %v2750_v57, 0.0 }
 0xa14   :  { %2763 = vadd.xlane.f32.xlu1 %v2762_v36 }
 0xa40   :  { %v3345_v19 = vpop.f32.mrf.mxu1 }
 0xa41   :  { %v2735_v13 = vadd.f32 %v3345_v19, %v2974_v46 }
 0xa42   :  { %v2726_v16 = vpop.f32.mrf.mxu1 }
 0xa43   :  { %v2727_v58 = vadd.f32 %v2974_v46, %v2726_v16  ;;  %v2747_v27 = vmax.f32 %v2735_v13, 0.0 }
 0xa44   :  { %v3346_v34 = vpop.f32.mrf.mxu1 }
 0xa45   :  { %v2745_v2 = vmax.f32 %v2727_v58, 0.0  ;;  %v2738_v38 = vadd.f32 %v3346_v34, %v2974_v46  ;;  %v2755_v49 = vadd.f32 %v2747_v27, %v2636_v52 }
 0xa46   :  { %v2729_v47 = vpop.f32.mrf.mxu1 }
 0xa47   :  { %v2753_v37 = vadd.f32 %v2745_v2, %v2634_v6  ;;  %v2730_v54 = vadd.f32 %v2974_v46, %v2729_v47  ;;  %v2748_v62 = vmax.f32 %v2738_v38, 0.0  ;;  %v2777_v1 = vsel %vm83_vm0, %v2755_v49, 0.0 }
 0xa49   :  { %v2746_v55 = vmax.f32 %v2730_v54, 0.0  ;;  %v2771_v4 = vsel %vm83_vm0, %v2753_v37, 0.0  ;;  %v2756_v61 = vadd.f32 %v2748_v62, %v2637_v21 }
 0xa4a   :  { %2772 = vadd.xlane.f32.xlu0 %v2771_v4 }
 0xa4b   :  { %v2754_v10 = vadd.f32 %v2746_v55, %v2635_v50  ;;  %v2780_v5 = vsel %vm83_vm0, %v2756_v61, 0.0 }
 0xa4d   :  { %v2774_v40 = vsel %vm83_vm0, %v2754_v10, 0.0 }
 0xa4e   :  { %2775 = vadd.xlane.f32.xlu1 %v2774_v40  ;;  %2778 = vadd.xlane.f32.xlu0 %v2777_v1 }
 0xa52   :  { %2781 = vadd.xlane.f32.xlu1 %v2780_v5 }
 0xa95   :  { %v2767_v48 = vpop.xlane.xlu0 %2766 }
 0xa96   :  { %v2785_v8 = vmul.f32 0.03125, %v2767_v48 }
 0xa98   :  { %v4280_v9 = vsub.f32 %v2751_v18, %v2785_v8 }
 0xa99   :  { %v2761_v39 = vpop.xlane.xlu0 %2760  ;;  %v2770_v28 = vpop.xlane.xlu1 %2769 }
 0xa9a   :  { %v2783_v63 = vmul.f32 0.03125, %v2761_v39  ;;  %v2786_v20 = vmul.f32 0.03125, %v2770_v28  ;;  %v2801_v17 = vmul.f32 %v4280_v9, %v4280_v9 }
 0xa9c   :  { %v4284_v33 = vsub.f32 %v2749_v22, %v2783_v63  ;;  %v4286_v30 = vsub.f32 %v2752_v24, %v2786_v20  ;;  %v2813_v32 = vsel %vm83_vm0, %v2801_v17, 0.0 }
 0xa9d   :  { %2814 = vadd.xlane.f32.xlu0 %v2813_v32  ;;  %v2764_v25 = vpop.xlane.xlu1 %2763 }
 0xa9e   :  { %v2784_v53 = vmul.f32 0.03125, %v2764_v25  ;;  %v2799_v41 = vmul.f32 %v4284_v33, %v4284_v33  ;;  %v2802_v45 = vmul.f32 %v4286_v30, %v4286_v30 }
 0xaa0   :  { %v4293_v0 = vsub.f32 %v2750_v57, %v2784_v53  ;;  %v2807_v6 = vsel %vm83_vm0, %v2799_v41, 0.0  ;;  %v2816_v50 = vsel %vm83_vm0, %v2802_v45, 0.0 }
 0xaa1   :  { %2808 = vadd.xlane.f32.xlu0 %v2807_v6  ;;  %2817 = vadd.xlane.f32.xlu1 %v2816_v50 }
 0xaa2   :  { %v2800_v43 = vmul.f32 %v4293_v0, %v4293_v0 }
 0xaa4   :  { %v2810_v51 = vsel %vm83_vm0, %v2800_v43, 0.0 }
 0xaa5   :  { %2811 = vadd.xlane.f32.xlu1 %v2810_v51 }
 0xad3   :  { %v2773_v52 = vpop.xlane.xlu0 %2772 }
 0xad4   :  { %v2787_v21 = vmul.f32 0.03125, %v2773_v52 }
 0xad6   :  { %v4300_v14 = vsub.f32 %v2753_v37, %v2787_v21  ;;  %v2981_v37 = vld [vmem:[%s4375_s9 + $0x4] ss:$0 sm:$0xff] }
 0xad7   :  { %v2779_v46 = vpop.xlane.xlu0 %2778  ;;  %v2776_v42 = vpop.xlane.xlu1 %2775 }
 0xad8   :  { %v2789_v56 = vmul.f32 0.03125, %v2779_v46  ;;  %v2788_v3 = vmul.f32 0.03125, %v2776_v42  ;;  %v2803_v12 = vmul.f32 %v4300_v14, %v4300_v14 }
 0xada   :  { %v4304_v26 = vsub.f32 %v2755_v49, %v2789_v56  ;;  %v4306_v35 = vsub.f32 %v2754_v10, %v2788_v3  ;;  %v2819_v44 = vsel %vm83_vm0, %v2803_v12, 0.0  ;;  %v2982_v49 = vld [vmem:[%s4375_s9 + $0x5] ss:$0 sm:$0xff] }
 0xadb   :  { %2820 = vadd.xlane.f32.xlu0 %v2819_v44  ;;  %v2782_v11 = vpop.xlane.xlu1 %2781 }
 0xadc   :  { %v2790_v18 = vmul.f32 0.03125, %v2782_v11  ;;  %v2805_v15 = vmul.f32 %v4304_v26, %v4304_v26  ;;  %v2804_v60 = vmul.f32 %v4306_v35, %v4306_v35 }
 0xade   :  { %v4313_v59 = vsub.f32 %v2756_v61, %v2790_v18  ;;  %v2825_v31 = vsel %vm83_vm0, %v2805_v15, 0.0  ;;  %v2822_v22 = vsel %vm83_vm0, %v2804_v60, 0.0 }
 0xadf   :  { %2826 = vadd.xlane.f32.xlu0 %v2825_v31  ;;  %2823 = vadd.xlane.f32.xlu1 %v2822_v22 }
 0xae0   :  { %v2806_v23 = vmul.f32 %v4313_v59, %v4313_v59 }
 0xae2   :  { %v2828_v24 = vsel %vm83_vm0, %v2806_v23, 0.0 }
 0xae3   :  { %2829 = vadd.xlane.f32.xlu1 %v2828_v24 }
 0xb26   :  { %v2815_v29 = vpop.xlane.xlu0 %2814 }
 0xb27   :  { %v2833_v7 = vmul.f32 0.03125, %v2815_v29 }
 0xb29   :  { %v2841_v57 = vadd.f32 1e-05, %v2833_v7 }
 0xb2a   :  { %v2809_v36 = vpop.xlane.xlu0 %2808  ;;  %v2818_v19 = vpop.xlane.xlu1 %2817 }
 0xb2b   :  { %3444 = vrsqrt.f32 %v2841_v57  ;;  %v2831_v13 = vmul.f32 0.03125, %v2809_v36  ;;  %v2834_v16 = vmul.f32 0.03125, %v2818_v19 }
 0xb2d   :  { %v2839_v58 = vadd.f32 1e-05, %v2831_v13  ;;  %v2842_v34 = vadd.f32 1e-05, %v2834_v16 }
 0xb2e   :  { %v2812_v27 = vpop.xlane.xlu1 %2811 }
 0xb2f   :  { %3446 = vrsqrt.f32 %v2839_v58  ;;  %v2832_v2 = vmul.f32 0.03125, %v2812_v27 }
 0xb30   :  { %3448 = vrsqrt.f32 %v2842_v34 }
 0xb31   :  { %v2840_v38 = vadd.f32 1e-05, %v2832_v2 }
 0xb33   :  { %3450 = vrsqrt.f32 %v2840_v38 }
 0xb38   :  { %v3445_v47 = vpop.eup %3444 }
 0xb39   :  { %v2857_v54 = vmul.f32 %v3445_v47, %v4280_v9 }
 0xb3b   :  { %v2869_v62 = vmul.f32 %v2981_v37, %v2857_v54 }
 0xb3c   :  { %v3447_v55 = vpop.eup %3446 }
 0xb3d   :  { %v3449_v4 = vpop.eup %3448  ;;  %v2881_v10 = vadd.f32 %v2982_v49, %v2869_v62  ;;  %v2855_v61 = vmul.f32 %v3447_v55, %v4284_v33 }
 0xb3e   :  { %v2858_v40 = vmul.f32 %v3449_v4, %v4286_v30 }
 0xb3f   :  { %2889 = vst.msk [vmem:[%s4376_s10 + $0x10] sm:$0xff] %vm83_vm0, %v2881_v10  ;;  %v2867_v1 = vmul.f32 %v2981_v37, %v2855_v61 }
 0xb40   :  { %v3451_v5 = vpop.eup %3450  ;;  %v2870_v48 = vmul.f32 %v2981_v37, %v2858_v40 }
 0xb41   :  { %v2879_v8 = vadd.f32 %v2982_v49, %v2867_v1  ;;  %v2856_v9 = vmul.f32 %v3451_v5, %v4293_v0 }
 0xb42   :  { %v2882_v39 = vadd.f32 %v2982_v49, %v2870_v48 }
 0xb43   :  { %2887 = vst.msk [vmem:[%s4376_s10] sm:$0xff] %vm83_vm0, %v2879_v8  ;;  %v2868_v28 = vmul.f32 %v2981_v37, %v2856_v9 }
 0xb44   :  { %2890 = vst.msk [vmem:[%s4376_s10 + $0x18] sm:$0xff] %vm83_vm0, %v2882_v39 }
 0xb45   :  { %v2880_v63 = vadd.f32 %v2982_v49, %v2868_v28 }
 0xb47   :  { %2888 = vst.msk [vmem:[%s4376_s10 + $0x8] sm:$0xff] %vm83_vm0, %v2880_v63 }
 0xb64   :  { %v2821_v20 = vpop.xlane.xlu0 %2820 }
 0xb65   :  { %v2835_v17 = vmul.f32 0.03125, %v2821_v20 }
 0xb67   :  { %v2843_v33 = vadd.f32 1e-05, %v2835_v17 }
 0xb68   :  { %v2827_v30 = vpop.xlane.xlu0 %2826  ;;  %v2824_v32 = vpop.xlane.xlu1 %2823 }
 0xb69   :  { %3452 = vrsqrt.f32 %v2843_v33  ;;  %v2837_v25 = vmul.f32 0.03125, %v2827_v30  ;;  %v2836_v53 = vmul.f32 0.03125, %v2824_v32 }
 0xb6b   :  { %v2845_v41 = vadd.f32 1e-05, %v2837_v25  ;;  %v2844_v45 = vadd.f32 1e-05, %v2836_v53 }
 0xb6c   :  { %v2830_v0 = vpop.xlane.xlu1 %2829 }
 0xb6d   :  { %3454 = vrsqrt.f32 %v2845_v41  ;;  %v2838_v6 = vmul.f32 0.03125, %v2830_v0 }
 0xb6e   :  { %3456 = vrsqrt.f32 %v2844_v45 }
 0xb6f   :  { %v2846_v50 = vadd.f32 1e-05, %v2838_v6 }
 0xb71   :  { %3458 = vrsqrt.f32 %v2846_v50 }
 0xb76   :  { %v3453_v43 = vpop.eup %3452 }
 0xb77   :  { %v2859_v51 = vmul.f32 %v3453_v43, %v4300_v14 }
 0xb79   :  { %v2871_v52 = vmul.f32 %v2981_v37, %v2859_v51 }
 0xb7a   :  { %v3455_v21 = vpop.eup %3454 }
 0xb7b   :  { %v3457_v46 = vpop.eup %3456  ;;  %v2883_v42 = vadd.f32 %v2982_v49, %v2871_v52  ;;  %v2861_v56 = vmul.f32 %v3455_v21, %v4304_v26 }
 0xb7c   :  { %v2860_v3 = vmul.f32 %v3457_v46, %v4306_v35 }
 0xb7d   :  { %2891 = vst.msk [vmem:[%s4376_s10 + $0x20] sm:$0xff] %vm83_vm0, %v2883_v42  ;;  %v2873_v12 = vmul.f32 %v2981_v37, %v2861_v56 }
 0xb7e   :  { %v3459_v44 = vpop.eup %3458  ;;  %v2872_v11 = vmul.f32 %v2981_v37, %v2860_v3 }
 0xb7f   :  { %v2885_v18 = vadd.f32 %v2982_v49, %v2873_v12  ;;  %v2862_v15 = vmul.f32 %v3459_v44, %v4313_v59 }
 0xb80   :  { %v2884_v14 = vadd.f32 %v2982_v49, %v2872_v11 }
 0xb81   :  { %2893 = vst.msk [vmem:[%s4376_s10 + $0x30] sm:$0xff] %vm83_vm0, %v2885_v18  ;;  %v2874_v26 = vmul.f32 %v2981_v37, %v2862_v15 }
 0xb82   :  { %2892 = vst.msk [vmem:[%s4376_s10 + $0x28] sm:$0xff] %vm83_vm0, %v2884_v14 }
 0xb83   :  { %v2886_v35 = vadd.f32 %v2982_v49, %v2874_v26 }
 0xb85   :  { %2894 = vst.msk [vmem:[%s4376_s10 + $0x38] sm:$0xff] %vm83_vm0, %v2886_v35 }

</bundles_post_ra>
